<compile_context>
chip_gen: v7x
topology: tpu7x:2x2x1
jax: 0.10.0
libtpu: 0.0.40
codegen_flags: <defaults>
</compile_context>

<pallas_src>
import functools

import jax
import jax.numpy as jnp
from jax import lax
from jax.experimental import pallas as pl
from jax.experimental.pallas import tpu as pltpu

EPS = 1e-5


# ----------------------------- Pallas kernel --------------------------------
def _basicblock_kernel(H, W, x_ref, w1_ref, t1_ref, w2_ref, t2_ref, o_ref):
    HW = H * W

    x = x_ref[0]                                            # (HW, C) bf16

    # Column index per flattened spatial row, kept (HW, 1) and broadcast.
    col = lax.broadcasted_iota(jnp.int32, (HW, 1), 0) % W
    mask_l = col >= 1           # tap reads column x-1 -> invalid at x == 0
    mask_r = col <= (W - 2)     # tap reads column x+1 -> invalid at x == W-1

    def conv3x3(h, w_ref):
        """h: (HW, C) bf16; w_ref: (3, 3C, Cout) bf16 -> (HW, Cout) f32."""
        C = h.shape[1]
        zero1 = jnp.zeros((1, C), h.dtype)
        zeroW = jnp.zeros((W, C), h.dtype)

        # Horizontal +-1 shifted copies. The column mask also kills the
        # row-wrap contamination at image-row boundaries.
        h_l = jnp.where(mask_l, jnp.concatenate([zero1, h[:HW - 1]], axis=0),
                        jnp.zeros_like(h))
        h_r = jnp.where(mask_r, jnp.concatenate([h[1:], zero1], axis=0),
                        jnp.zeros_like(h))

        acc = jnp.zeros((HW, w_ref.shape[2]), jnp.float32)
        for j, hdx in enumerate((h_l, h, h_r)):          # dx = -1, 0, +1
            # Zero rows provide the vertical halo; +-W row slices stay aligned.
            hp = jnp.concatenate([zeroW, hdx, zeroW], axis=0)          # (HW+2W, C)
            t = jnp.concatenate(
                [hp[0:HW], hp[W:W + HW], hp[2 * W:2 * W + HW]], axis=1)  # (HW, 3C)
            acc = acc + jnp.dot(t, w_ref[j],
                                preferred_element_type=jnp.float32)
        return acc

    # conv1 (BN scale folded into weights) + bias + ReLU  -- f32 epilogue
    h1 = jnp.maximum(conv3x3(x, w1_ref) + t1_ref[...], 0.0)
    # conv2 + bias + identity residual + ReLU
    h2 = conv3x3(h1.astype(jnp.bfloat16), w2_ref) + t2_ref[...]
    o_ref[0] = jnp.maximum(h2 + x.astype(jnp.float32), 0.0).astype(o_ref.dtype)


# ------------------------------- wrapper -------------------------------------
def basicblock_forward(x_nchw, params):
    N, Cin, H, W = x_nchw.shape
    C = params["t1"].shape[1]
    assert Cin == C, "identity residual requires inplanes == planes (stride=1)"
    assert W % 8 == 0, "W must be a multiple of 8 for aligned row slices"
    HW = H * W

    # NCHW -> (N, H*W, C) channels-last, bf16 HBM copy for the MXU path.
    x_flat = jnp.transpose(x_nchw, (0, 2, 3, 1)).reshape(N, HW, Cin)
    x_flat = x_flat.astype(jnp.bfloat16)

    kernel = functools.partial(_basicblock_kernel, H, W)

    # Scoped-VMEM budget: double-buffered x/out blocks + weights + in-kernel
    # intermediates (im2col (HW,3C) bf16 + f32 activations), clamped to
    # [16, 48] MiB so it stays within v5e/v6e/v7x limits with headroom.
    bf, f4 = 2, 4
    x_blk = HW * Cin * bf
    out_blk = HW * C * f4
    w_bytes = (params["w1k"].size + params["w2k"].size) * bf
    interm = HW * max(Cin, C) * (bf * 14 + f4 * 3)
    est = 2 * (x_blk + out_blk) + 2 * w_bytes + interm
    vmem_limit = int(min(max(2 * est, 16 * 1024 * 1024), 48 * 1024 * 1024))

    out_flat = pl.pallas_call(
        kernel,
        out_shape=jax.ShapeDtypeStruct((N, HW, C), jnp.float32),
        grid=(N,),
        in_specs=[
            pl.BlockSpec((1, HW, Cin), lambda n: (n, 0, 0)),     # x (per image)
            pl.BlockSpec((3, 3 * Cin, C), lambda n: (0, 0, 0)),  # conv1 weights
            pl.BlockSpec((1, C), lambda n: (0, 0)),              # conv1+bn1 bias
            pl.BlockSpec((3, 3 * C, C), lambda n: (0, 0, 0)),    # conv2 weights
            pl.BlockSpec((1, C), lambda n: (0, 0)),              # conv2+bn2 bias
        ],
        out_specs=pl.BlockSpec((1, HW, C), lambda n: (n, 0, 0)),
        compiler_params=pltpu.CompilerParams(
            dimension_semantics=("parallel",),
            vmem_limit_bytes=vmem_limit),
    )(x_flat, params["w1k"], params["t1"], params["w2k"], params["t2"])

    return jnp.transpose(out_flat.reshape(N, H, W, C), (0, 3, 1, 2))


# ------------------------ parameter initialization ---------------------------
def _fold_conv_bn(w_oihw, conv_b, gamma, beta, mean, var):
    """Fold inference-mode BN (and the conv bias) into the conv weights.

    Returns:
      wk:   (3, 3*I, O) bf16 -- one (3I, O) block per horizontal tap dx,
            rows ordered [dy=-1 | dy=0 | dy=+1] x input-channel.
      bias: (1, O) f32 -- folded per-channel bias.
    """
    O, I = w_oihw.shape[0], w_oihw.shape[1]
    scale = gamma / jnp.sqrt(var + EPS)                  # (O,)
    w_eff = w_oihw * scale[:, None, None, None]          # BN scale folded (f32)
    bias = beta + scale * (conv_b - mean)                # (O,)
    wk = jnp.stack(
        [jnp.transpose(w_eff[:, :, :, j], (2, 1, 0)).reshape(3 * I, O)
         for j in range(3)], axis=0)                     # (3, 3I, O)
    return wk.astype(jnp.bfloat16), bias[None, :].astype(jnp.float32)


def init_params(key, inplanes, planes):
    assert inplanes == planes, "BasicBlock identity residual (no downsample)"
    ks = jax.random.split(key, 10)

    # PyTorch conv3x3: Conv2d(..., kernel_size=3, padding=1, bias=True)
    w1 = jax.random.normal(ks[0], (planes, inplanes, 3, 3), jnp.float32) * 0.1
    cb1 = jax.random.normal(ks[1], (planes,), jnp.float32) * 0.1
    w2 = jax.random.normal(ks[2], (planes, planes, 3, 3), jnp.float32) * 0.1
    cb2 = jax.random.normal(ks[3], (planes,), jnp.float32) * 0.1

    def bn(kg, km, kv, c):
        gamma = jax.random.uniform(kg, (c,), jnp.float32, 0.5, 1.5)
        beta = jnp.zeros((c,), jnp.float32)   # BatchNorm2d_no_b: bias frozen at 0
        mean = jax.random.normal(km, (c,), jnp.float32) * 0.1
        var = jax.random.uniform(kv, (c,), jnp.float32, 0.5, 1.5)
        return gamma, beta, mean, var

    bn1 = bn(ks[4], ks[5], ks[6], planes)
    bn2 = bn(ks[7], ks[8], ks[9], planes)

    w1k, t1 = _fold_conv_bn(w1, cb1, *bn1)
    w2k, t2 = _fold_conv_bn(w2, cb2, *bn2)

    kernel_params = {"w1k": w1k, "t1": t1, "w2k": w2k, "t2": t2}
    torch_params = {"w1": w1, "cb1": cb1, "w2": w2, "cb2": cb2,
                    "bn1": bn1, "bn2": bn2}
    return kernel_params, torch_params


# ------------------------------ reference ------------------------------------
def ref_forward(x, pt):
    dn = ("NCHW", "OIHW", "NCHW")

    def bn(y, g, b, m, v):
        inv = g / jnp.sqrt(v + EPS)
        return y * inv[None, :, None, None] + (b - m * inv)[None, :, None, None]

    out = lax.conv_general_dilated(x, pt["w1"], (1, 1), ((1, 1), (1, 1)),
                                   dimension_numbers=dn)
    out = out + pt["cb1"][None, :, None, None]
    out = jax.nn.relu(bn(out, *pt["bn1"]))
    out = lax.conv_general_dilated(out, pt["w2"], (1, 1), ((1, 1), (1, 1)),
                                   dimension_numbers=dn)
    out = out + pt["cb2"][None, :, None, None]
    out = bn(out, *pt["bn2"])
    return jax.nn.relu(out + x)


# -------------------------------- main ----------------------------------------
if __name__ == "__main__":
    inplanes = planes = 32       # identity residual (stride=1, downsample=None)
    N, H, W = 2, 16, 16

    key = jax.random.PRNGKey(0)
    kx, kp = jax.random.split(key)
    x = jax.random.normal(kx, (N, inplanes, H, W), jnp.float32)

    kernel_params, torch_params = init_params(kp, inplanes, planes)

    out = jax.block_until_ready(basicblock_forward(x, kernel_params))
    ref = jax.block_until_ready(ref_forward(x, torch_params))

    assert out.shape == (N, planes, H, W), out.shape
    err = float(jnp.max(jnp.abs(out - ref)))
    # Tolerance sized for bf16 MXU operands (f32 reference convs).
    tol = 2e-2 * float(jnp.max(jnp.abs(ref))) + 3e-2
    assert err < tol, f"max abs error {err} exceeds tolerance {tol}"
    print("KERNEL_OK")
</pallas_src>

<mosaic_0001>
module attributes {stable_mosaic.version = 11 : i64} {
  func.func @_basicblock_kernel(%arg0: i32, %arg1: memref<1x256x32xbf16, #tpu.memory_space<vmem>>, %arg2: memref<3x96x32xbf16, #tpu.memory_space<vmem>>, %arg3: memref<1x32xf32, #tpu.memory_space<vmem>>, %arg4: memref<3x96x32xbf16, #tpu.memory_space<vmem>>, %arg5: memref<1x32xf32, #tpu.memory_space<vmem>>, %arg6: memref<1x256x32xf32, #tpu.memory_space<vmem>>) attributes {dimension_semantics = [#tpu.dimension_semantics<parallel>], iteration_bounds = array<i64: 2>, scalar_prefetch = 0 : i64, scratch_operands = 0 : i64, tpu.core_type = #tpu.core_type<tc>, window_params = [{transform_indices = @transform_0, window_bounds = array<i64: 1, 256, 32>}, {pipeline_mode = #tpu.pipeline_mode<synchronous>, transform_indices = @transform_1, window_bounds = array<i64: 3, 96, 32>}, {pipeline_mode = #tpu.pipeline_mode<synchronous>, transform_indices = @transform_2, window_bounds = array<i64: 1, 32>}, {pipeline_mode = #tpu.pipeline_mode<synchronous>, transform_indices = @transform_3, window_bounds = array<i64: 3, 96, 32>}, {pipeline_mode = #tpu.pipeline_mode<synchronous>, transform_indices = @transform_4, window_bounds = array<i64: 1, 32>}, {transform_indices = @transform_5, window_bounds = array<i64: 1, 256, 32>}]} {
    %c0 = arith.constant 0 : index
    %c0_0 = arith.constant 0 : index
    %c0_1 = arith.constant 0 : index
    %0 = vector.load %arg1[%c0, %c0_0, %c0_1] : memref<1x256x32xbf16, #tpu.memory_space<vmem>>, vector<1x256x32xbf16>
    %1 = vector.shape_cast %0 : vector<1x256x32xbf16> to vector<256x32xbf16>
    %2 = tpu.iota {dimensions = array<i32: 0>} : vector<256x1xi32>
    %c16_i32 = arith.constant 16 : i32
    %c0_i32 = arith.constant 0 : i32
    %3 = arith.cmpi eq, %c16_i32, %c0_i32 : i32
    %c1_i32 = arith.constant 1 : i32
    %4 = arith.select %3, %c1_i32, %c16_i32 : i32
    %5 = vector.broadcast %4 : i32 to vector<256x1xi32>
    %6 = arith.remsi %2, %5 : vector<256x1xi32>
    %c0_i32_2 = arith.constant 0 : i32
    %7 = vector.broadcast %c0_i32_2 : i32 to vector<256x1xi32>
    %8 = arith.cmpi ne, %6, %7 : vector<256x1xi32>
    %c0_i32_3 = arith.constant 0 : i32
    %9 = vector.broadcast %c0_i32_3 : i32 to vector<256x1xi32>
    %10 = arith.cmpi slt, %6, %9 : vector<256x1xi32>
    %c0_i32_4 = arith.constant 0 : i32
    %11 = arith.cmpi slt, %4, %c0_i32_4 : i32
    %12 = vector.broadcast %11 : i1 to vector<256x1xi1>
    %13 = vector.broadcast %12 : vector<256x1xi1> to vector<256x1xi1>
    %14 = arith.xori %10, %13 : vector<256x1xi1>
    %15 = arith.andi %14, %8 : vector<256x1xi1>
    %16 = vector.broadcast %4 : i32 to vector<256x1xi32>
    %17 = arith.addi %6, %16 : vector<256x1xi32>
    %18 = arith.select %15, %17, %6 : vector<256x1xi1>, vector<256x1xi32>
    %c1_i32_5 = arith.constant 1 : i32
    %19 = vector.broadcast %c1_i32_5 : i32 to vector<256x1xi32>
    %20 = arith.cmpi sge, %18, %19 : vector<256x1xi32>
    %c14_i32 = arith.constant 14 : i32
    %21 = vector.broadcast %c14_i32 : i32 to vector<256x1xi32>
    %22 = arith.cmpi sle, %18, %21 : vector<256x1xi32>
    %cst = arith.constant 0.000000e+00 : bf16
    %23 = vector.broadcast %cst : bf16 to vector<1x32xbf16>
    %cst_6 = arith.constant 0.000000e+00 : bf16
    %24 = vector.broadcast %cst_6 : bf16 to vector<16x32xbf16>
    %25 = vector.extract_strided_slice %1 {offsets = [0, 0], sizes = [255, 32], strides = [1, 1]} : vector<256x32xbf16> to vector<255x32xbf16>
    %26 = tpu.concatenate %23, %25 in 0 : vector<1x32xbf16>, vector<255x32xbf16> -> vector<256x32xbf16>
    %cst_7 = arith.constant 0.000000e+00 : bf16
    %27 = vector.broadcast %cst_7 : bf16 to vector<256x32xbf16>
    %28 = vector.shape_cast %20 : vector<256x1xi1> to vector<256x1xi1>
    %29 = vector.broadcast %28 : vector<256x1xi1> to vector<256x32xi1>
    %30 = arith.select %29, %26, %27 : vector<256x32xi1>, vector<256x32xbf16>
    %31 = vector.extract_strided_slice %1 {offsets = [1, 0], sizes = [255, 32], strides = [1, 1]} : vector<256x32xbf16> to vector<255x32xbf16>
    %32 = tpu.concatenate %31, %23 in 0 : vector<255x32xbf16>, vector<1x32xbf16> -> vector<256x32xbf16>
    %cst_8 = arith.constant 0.000000e+00 : bf16
    %33 = vector.broadcast %cst_8 : bf16 to vector<256x32xbf16>
    %34 = vector.shape_cast %22 : vector<256x1xi1> to vector<256x1xi1>
    %35 = vector.broadcast %34 : vector<256x1xi1> to vector<256x32xi1>
    %36 = arith.select %35, %32, %33 : vector<256x32xi1>, vector<256x32xbf16>
    %cst_9 = arith.constant 0.000000e+00 : f32
    %37 = vector.broadcast %cst_9 : f32 to vector<256x32xf32>
    %38 = tpu.concatenate %24, %30, %24 in 0 : vector<16x32xbf16>, vector<256x32xbf16>, vector<16x32xbf16> -> vector<288x32xbf16>
    %39 = vector.extract_strided_slice %38 {offsets = [0, 0], sizes = [256, 32], strides = [1, 1]} : vector<288x32xbf16> to vector<256x32xbf16>
    %40 = vector.extract_strided_slice %38 {offsets = [16, 0], sizes = [256, 32], strides = [1, 1]} : vector<288x32xbf16> to vector<256x32xbf16>
    %41 = vector.extract_strided_slice %38 {offsets = [32, 0], sizes = [256, 32], strides = [1, 1]} : vector<288x32xbf16> to vector<256x32xbf16>
    %42 = tpu.concatenate %39, %40, %41 in 1 : vector<256x32xbf16>, vector<256x32xbf16>, vector<256x32xbf16> -> vector<256x96xbf16>
    %c0_10 = arith.constant 0 : index
    %c0_11 = arith.constant 0 : index
    %c0_12 = arith.constant 0 : index
    %43 = vector.load %arg2[%c0_10, %c0_11, %c0_12] : memref<3x96x32xbf16, #tpu.memory_space<vmem>>, vector<1x96x32xbf16>
    %44 = vector.shape_cast %43 : vector<1x96x32xbf16> to vector<96x32xbf16>
    %cst_13 = arith.constant dense<0.000000e+00> : vector<256x32xf32>
    %45 = tpu.matmul %42, %44, %cst_13 {dimension_numbers = #tpu.dot_dimension_numbers<[1], [0], [0], [1], [0, 0, 1, 1], [], []>} : vector<256x96xbf16>, vector<96x32xbf16>, vector<256x32xf32> -> vector<256x32xf32>
    %46 = arith.addf %37, %45 : vector<256x32xf32>
    %47 = tpu.concatenate %24, %1, %24 in 0 : vector<16x32xbf16>, vector<256x32xbf16>, vector<16x32xbf16> -> vector<288x32xbf16>
    %48 = vector.extract_strided_slice %47 {offsets = [0, 0], sizes = [256, 32], strides = [1, 1]} : vector<288x32xbf16> to vector<256x32xbf16>
    %49 = vector.extract_strided_slice %47 {offsets = [16, 0], sizes = [256, 32], strides = [1, 1]} : vector<288x32xbf16> to vector<256x32xbf16>
    %50 = vector.extract_strided_slice %47 {offsets = [32, 0], sizes = [256, 32], strides = [1, 1]} : vector<288x32xbf16> to vector<256x32xbf16>
    %51 = tpu.concatenate %48, %49, %50 in 1 : vector<256x32xbf16>, vector<256x32xbf16>, vector<256x32xbf16> -> vector<256x96xbf16>
    %c1 = arith.constant 1 : index
    %c0_14 = arith.constant 0 : index
    %c0_15 = arith.constant 0 : index
    %52 = vector.load %arg2[%c1, %c0_14, %c0_15] : memref<3x96x32xbf16, #tpu.memory_space<vmem>>, vector<1x96x32xbf16>
    %53 = vector.shape_cast %52 : vector<1x96x32xbf16> to vector<96x32xbf16>
    %cst_16 = arith.constant dense<0.000000e+00> : vector<256x32xf32>
    %54 = tpu.matmul %51, %53, %cst_16 {dimension_numbers = #tpu.dot_dimension_numbers<[1], [0], [0], [1], [0, 0, 1, 1], [], []>} : vector<256x96xbf16>, vector<96x32xbf16>, vector<256x32xf32> -> vector<256x32xf32>
    %55 = arith.addf %46, %54 : vector<256x32xf32>
    %56 = tpu.concatenate %24, %36, %24 in 0 : vector<16x32xbf16>, vector<256x32xbf16>, vector<16x32xbf16> -> vector<288x32xbf16>
    %57 = vector.extract_strided_slice %56 {offsets = [0, 0], sizes = [256, 32], strides = [1, 1]} : vector<288x32xbf16> to vector<256x32xbf16>
    %58 = vector.extract_strided_slice %56 {offsets = [16, 0], sizes = [256, 32], strides = [1, 1]} : vector<288x32xbf16> to vector<256x32xbf16>
    %59 = vector.extract_strided_slice %56 {offsets = [32, 0], sizes = [256, 32], strides = [1, 1]} : vector<288x32xbf16> to vector<256x32xbf16>
    %60 = tpu.concatenate %57, %58, %59 in 1 : vector<256x32xbf16>, vector<256x32xbf16>, vector<256x32xbf16> -> vector<256x96xbf16>
    %c2 = arith.constant 2 : index
    %c0_17 = arith.constant 0 : index
    %c0_18 = arith.constant 0 : index
    %61 = vector.load %arg2[%c2, %c0_17, %c0_18] : memref<3x96x32xbf16, #tpu.memory_space<vmem>>, vector<1x96x32xbf16>
    %62 = vector.shape_cast %61 : vector<1x96x32xbf16> to vector<96x32xbf16>
    %cst_19 = arith.constant dense<0.000000e+00> : vector<256x32xf32>
    %63 = tpu.matmul %60, %62, %cst_19 {dimension_numbers = #tpu.dot_dimension_numbers<[1], [0], [0], [1], [0, 0, 1, 1], [], []>} : vector<256x96xbf16>, vector<96x32xbf16>, vector<256x32xf32> -> vector<256x32xf32>
    %64 = arith.addf %55, %63 : vector<256x32xf32>
    %c0_20 = arith.constant 0 : index
    %c0_21 = arith.constant 0 : index
    %65 = vector.load %arg3[%c0_20, %c0_21] : memref<1x32xf32, #tpu.memory_space<vmem>>, vector<1x32xf32>
    %66 = vector.broadcast %65 : vector<1x32xf32> to vector<256x32xf32>
    %67 = arith.addf %64, %66 : vector<256x32xf32>
    %cst_22 = arith.constant 0.000000e+00 : f32
    %68 = vector.broadcast %cst_22 : f32 to vector<256x32xf32>
    %69 = arith.maximumf %67, %68 : vector<256x32xf32>
    %70 = arith.truncf %69 : vector<256x32xf32> to vector<256x32xbf16>
    %cst_23 = arith.constant 0.000000e+00 : bf16
    %71 = vector.broadcast %cst_23 : bf16 to vector<1x32xbf16>
    %cst_24 = arith.constant 0.000000e+00 : bf16
    %72 = vector.broadcast %cst_24 : bf16 to vector<16x32xbf16>
    %73 = vector.extract_strided_slice %70 {offsets = [0, 0], sizes = [255, 32], strides = [1, 1]} : vector<256x32xbf16> to vector<255x32xbf16>
    %74 = tpu.concatenate %71, %73 in 0 : vector<1x32xbf16>, vector<255x32xbf16> -> vector<256x32xbf16>
    %cst_25 = arith.constant 0.000000e+00 : bf16
    %75 = vector.broadcast %cst_25 : bf16 to vector<256x32xbf16>
    %76 = vector.shape_cast %20 : vector<256x1xi1> to vector<256x1xi1>
    %77 = vector.broadcast %76 : vector<256x1xi1> to vector<256x32xi1>
    %78 = arith.select %77, %74, %75 : vector<256x32xi1>, vector<256x32xbf16>
    %79 = vector.extract_strided_slice %70 {offsets = [1, 0], sizes = [255, 32], strides = [1, 1]} : vector<256x32xbf16> to vector<255x32xbf16>
    %80 = tpu.concatenate %79, %71 in 0 : vector<255x32xbf16>, vector<1x32xbf16> -> vector<256x32xbf16>
    %cst_26 = arith.constant 0.000000e+00 : bf16
    %81 = vector.broadcast %cst_26 : bf16 to vector<256x32xbf16>
    %82 = vector.shape_cast %22 : vector<256x1xi1> to vector<256x1xi1>
    %83 = vector.broadcast %82 : vector<256x1xi1> to vector<256x32xi1>
    %84 = arith.select %83, %80, %81 : vector<256x32xi1>, vector<256x32xbf16>
    %cst_27 = arith.constant 0.000000e+00 : f32
    %85 = vector.broadcast %cst_27 : f32 to vector<256x32xf32>
    %86 = tpu.concatenate %72, %78, %72 in 0 : vector<16x32xbf16>, vector<256x32xbf16>, vector<16x32xbf16> -> vector<288x32xbf16>
    %87 = vector.extract_strided_slice %86 {offsets = [0, 0], sizes = [256, 32], strides = [1, 1]} : vector<288x32xbf16> to vector<256x32xbf16>
    %88 = vector.extract_strided_slice %86 {offsets = [16, 0], sizes = [256, 32], strides = [1, 1]} : vector<288x32xbf16> to vector<256x32xbf16>
    %89 = vector.extract_strided_slice %86 {offsets = [32, 0], sizes = [256, 32], strides = [1, 1]} : vector<288x32xbf16> to vector<256x32xbf16>
    %90 = tpu.concatenate %87, %88, %89 in 1 : vector<256x32xbf16>, vector<256x32xbf16>, vector<256x32xbf16> -> vector<256x96xbf16>
    %c0_28 = arith.constant 0 : index
    %c0_29 = arith.constant 0 : index
    %c0_30 = arith.constant 0 : index
    %91 = vector.load %arg4[%c0_28, %c0_29, %c0_30] : memref<3x96x32xbf16, #tpu.memory_space<vmem>>, vector<1x96x32xbf16>
    %92 = vector.shape_cast %91 : vector<1x96x32xbf16> to vector<96x32xbf16>
    %cst_31 = arith.constant dense<0.000000e+00> : vector<256x32xf32>
    %93 = tpu.matmul %90, %92, %cst_31 {dimension_numbers = #tpu.dot_dimension_numbers<[1], [0], [0], [1], [0, 0, 1, 1], [], []>} : vector<256x96xbf16>, vector<96x32xbf16>, vector<256x32xf32> -> vector<256x32xf32>
    %94 = arith.addf %85, %93 : vector<256x32xf32>
    %95 = tpu.concatenate %72, %70, %72 in 0 : vector<16x32xbf16>, vector<256x32xbf16>, vector<16x32xbf16> -> vector<288x32xbf16>
    %96 = vector.extract_strided_slice %95 {offsets = [0, 0], sizes = [256, 32], strides = [1, 1]} : vector<288x32xbf16> to vector<256x32xbf16>
    %97 = vector.extract_strided_slice %95 {offsets = [16, 0], sizes = [256, 32], strides = [1, 1]} : vector<288x32xbf16> to vector<256x32xbf16>
    %98 = vector.extract_strided_slice %95 {offsets = [32, 0], sizes = [256, 32], strides = [1, 1]} : vector<288x32xbf16> to vector<256x32xbf16>
    %99 = tpu.concatenate %96, %97, %98 in 1 : vector<256x32xbf16>, vector<256x32xbf16>, vector<256x32xbf16> -> vector<256x96xbf16>
    %c1_32 = arith.constant 1 : index
    %c0_33 = arith.constant 0 : index
    %c0_34 = arith.constant 0 : index
    %100 = vector.load %arg4[%c1_32, %c0_33, %c0_34] : memref<3x96x32xbf16, #tpu.memory_space<vmem>>, vector<1x96x32xbf16>
    %101 = vector.shape_cast %100 : vector<1x96x32xbf16> to vector<96x32xbf16>
    %cst_35 = arith.constant dense<0.000000e+00> : vector<256x32xf32>
    %102 = tpu.matmul %99, %101, %cst_35 {dimension_numbers = #tpu.dot_dimension_numbers<[1], [0], [0], [1], [0, 0, 1, 1], [], []>} : vector<256x96xbf16>, vector<96x32xbf16>, vector<256x32xf32> -> vector<256x32xf32>
    %103 = arith.addf %94, %102 : vector<256x32xf32>
    %104 = tpu.concatenate %72, %84, %72 in 0 : vector<16x32xbf16>, vector<256x32xbf16>, vector<16x32xbf16> -> vector<288x32xbf16>
    %105 = vector.extract_strided_slice %104 {offsets = [0, 0], sizes = [256, 32], strides = [1, 1]} : vector<288x32xbf16> to vector<256x32xbf16>
    %106 = vector.extract_strided_slice %104 {offsets = [16, 0], sizes = [256, 32], strides = [1, 1]} : vector<288x32xbf16> to vector<256x32xbf16>
    %107 = vector.extract_strided_slice %104 {offsets = [32, 0], sizes = [256, 32], strides = [1, 1]} : vector<288x32xbf16> to vector<256x32xbf16>
    %108 = tpu.concatenate %105, %106, %107 in 1 : vector<256x32xbf16>, vector<256x32xbf16>, vector<256x32xbf16> -> vector<256x96xbf16>
    %c2_36 = arith.constant 2 : index
    %c0_37 = arith.constant 0 : index
    %c0_38 = arith.constant 0 : index
    %109 = vector.load %arg4[%c2_36, %c0_37, %c0_38] : memref<3x96x32xbf16, #tpu.memory_space<vmem>>, vector<1x96x32xbf16>
    %110 = vector.shape_cast %109 : vector<1x96x32xbf16> to vector<96x32xbf16>
    %cst_39 = arith.constant dense<0.000000e+00> : vector<256x32xf32>
    %111 = tpu.matmul %108, %110, %cst_39 {dimension_numbers = #tpu.dot_dimension_numbers<[1], [0], [0], [1], [0, 0, 1, 1], [], []>} : vector<256x96xbf16>, vector<96x32xbf16>, vector<256x32xf32> -> vector<256x32xf32>
    %112 = arith.addf %103, %111 : vector<256x32xf32>
    %c0_40 = arith.constant 0 : index
    %c0_41 = arith.constant 0 : index
    %113 = vector.load %arg5[%c0_40, %c0_41] : memref<1x32xf32, #tpu.memory_space<vmem>>, vector<1x32xf32>
    %114 = vector.broadcast %113 : vector<1x32xf32> to vector<256x32xf32>
    %115 = arith.addf %112, %114 : vector<256x32xf32>
    %116 = arith.extf %1 : vector<256x32xbf16> to vector<256x32xf32>
    %117 = arith.addf %115, %116 : vector<256x32xf32>
    %cst_42 = arith.constant 0.000000e+00 : f32
    %118 = vector.broadcast %cst_42 : f32 to vector<256x32xf32>
    %119 = arith.maximumf %117, %118 : vector<256x32xf32>
    %c0_43 = arith.constant 0 : index
    %c0_44 = arith.constant 0 : index
    %c0_45 = arith.constant 0 : index
    %120 = vector.load %arg6[%c0_43, %c0_44, %c0_45] : memref<1x256x32xf32, #tpu.memory_space<vmem>>, vector<1x256x32xf32>
    %121 = vector.shape_cast %120 : vector<1x256x32xf32> to vector<256x32xf32>
    %122 = vector.shape_cast %119 : vector<256x32xf32> to vector<1x256x32xf32>
    tpu.vector_store %arg6[%c0_43, %c0_44, %c0_45], %122 {strides = array<i32>} : memref<1x256x32xf32, #tpu.memory_space<vmem>>, vector<1x256x32xf32>,
    return
  }
  func.func @transform_0(%arg0: i32) -> (i32, i32, i32) {
    %c0_i32 = arith.constant 0 : i32
    %c0_i32_0 = arith.constant 0 : i32
    %c0_i32_1 = arith.constant 0 : i32
    return %arg0, %c0_i32, %c0_i32_0 : i32, i32, i32
  }
  func.func @transform_1(%arg0: i32) -> (i32, i32, i32) {
    %c0_i32 = arith.constant 0 : i32
    %c0_i32_0 = arith.constant 0 : i32
    %c0_i32_1 = arith.constant 0 : i32
    %c0_i32_2 = arith.constant 0 : i32
    return %c0_i32, %c0_i32_0, %c0_i32_1 : i32, i32, i32
  }
  func.func @transform_2(%arg0: i32) -> (i32, i32) {
    %c0_i32 = arith.constant 0 : i32
    %c0_i32_0 = arith.constant 0 : i32
    %c0_i32_1 = arith.constant 0 : i32
    return %c0_i32, %c0_i32_0 : i32, i32
  }
  func.func @transform_3(%arg0: i32) -> (i32, i32, i32) {
    %c0_i32 = arith.constant 0 : i32
    %c0_i32_0 = arith.constant 0 : i32
    %c0_i32_1 = arith.constant 0 : i32
    %c0_i32_2 = arith.constant 0 : i32
    return %c0_i32, %c0_i32_0, %c0_i32_1 : i32, i32, i32
  }
  func.func @transform_4(%arg0: i32) -> (i32, i32) {
    %c0_i32 = arith.constant 0 : i32
    %c0_i32_0 = arith.constant 0 : i32
    %c0_i32_1 = arith.constant 0 : i32
    return %c0_i32, %c0_i32_0 : i32, i32
  }
  func.func @transform_5(%arg0: i32) -> (i32, i32, i32) {
    %c0_i32 = arith.constant 0 : i32
    %c0_i32_0 = arith.constant 0 : i32
    %c0_i32_1 = arith.constant 0 : i32
    return %arg0, %c0_i32, %c0_i32_0 : i32, i32, i32
  }
}

</mosaic_0001>

<bundles_post_ra>
// kernel: tpu_custom_call.1
= control target key start
LH: loop header
LB: loop body
LE: loop exit
PB: predicated region body
PF: predicated region fallthrough
CT: control target
= control target key end

     0   :  { %s5317_s18 = smov 0   ;;  %s7561_s0 = inlined_call_operand.vmem [shape: bf16[2,256,32], index: 0, kind: input, shape index: {}]   ;;  %s7562_s1 = inlined_call_operand.vmem [shape: bf16[3,96,32], index: 1, kind: input, shape index: {}]   ;;  %s7563_s2 = inlined_call_operand.vmem [shape: f32[1,32], index: 2, kind: input, shape index: {}]   ;;  %s7564_s3 = inlined_call_operand.vmem [shape: bf16[3,96,32], index: 3, kind: input, shape index: {}]   ;;  %s7565_s4 = inlined_call_operand.vmem [shape: f32[1,32], index: 4, kind: input, shape index: {}]   ;;  %s7566_s5 = inlined_call_operand.vmem [shape: f32[2,256,32], index: 5, kind: output, shape index: {}]  }
   0x1 LB: > { %s4412_s19 = sadd.s32 4294967295, %s5281_s18   ;;  %p4416_p0 = scmp.ge.s32.totalorder %s5281_s18, 1  ;;  %s5281_s18 = sphi %s5317_s18, %s15_s18  }
   0x2   : > { %p187_p1 = scmp.lt.s32.totalorder %s5281_s18, 3 }
   0x4   : > { %p188_p2 = pnand %p4416_p0, %p187_p1 }
   0x6   : > { %191 = sbr.rel (%p188_p2) target bundleno = 1023 (0x3ff), region = 40 }
   0xd   : > { %p215_p3 = scmp.lt.s32.totalorder %s4412_s19, 1  ;;  %v5207_v0 = vld [vmem:[%s7562_s1 + $0x30] sm:$0xff]   ;;  %v5208_v1 = vld [vmem:[%s7562_s1 + $0x38] sm:$0xff]   ;;  %v5209_v5 = vld [vmem:[%s7562_s1 + $0x40] sm:$0xff]   ;;  %s5283_s30 = smov 64   ;;  %v260_v17 = vlaneseq  ;;  %vm5285_vm1 = vmmov 1  }
   0xe   : > { %4787 = vmatprep.subr.bf16.mxu0 %v5207_v0  ;;  %s5284_s6 = smov 32   ;;  %v5210_v7 = vld [vmem:[%s7562_s1 + $0x48] sm:$0xff]   ;;  %v5211_v9 = vld [vmem:[%s7562_s1 + $0x50] sm:$0xff]   ;;  %v5212_v11 = vld [vmem:[%s7562_s1 + $0x58] sm:$0xff]   ;;  %v7600_v35 = vmov 0   ;;  %vm965_vm10 = vcmask 1040384  }
   0xf   : > { %s8259_s19 = smov (!%p215_p3, %s4412_s19), 1  ;;  %4788 = vmatpush3.bf16.msra.mxu0 %v5207_v0  ;;  %v5391_v13 = vld [vmem:[%s7562_s1] sm:$0xff]   ;;  %v5422_v19 = vshrl.u32 %v260_v17, 7  ;;  %vm1033_vm2 = vmpackc.low %vm5285_vm1, %vm5285_vm1  ;;  %vm7588_vm9 = vsmask.f32 256 }
  0x10   : > { %s4653_s24 = sshll.u32 %s8259_s19, 7  ;;  %4789 = vmatprep.subr.bf16.mxu0 %v5208_v1  ;;  %v5470_v36 = vsel %vm1033_vm2, 65537, %v7600_v35  ;;  %vm5526_vm12 = vmand %vm965_vm10, %vm7588_vm9  ;;  %s4654_s15 = sshll.u32 %s8259_s19, 8 }
  0x11   : > { %s5337_s27 = scalar_lea.vmem %s7561_s0, %s4653_s24  ;;  %v263_v21 = vadd.s32 16, %v5422_v19  ;;  %v297_v24 = vand.u32 15, %v5422_v19  ;;  %v265_v25 = vadd.s32 32, %v5422_v19  ;;  %v267_v27 = vadd.s32 48, %v5422_v19  ;;  %s7449_s20 = scalar_lea.vmem %s7566_s5, %s4654_s15 }
  0x12   : > { %v5340_v2 = vld [vmem:[%s5337_s27 + $0x8] sm:$0xff]   ;;  %v5343_v3 = vld [vmem:[%s5337_s27] sm:$0xff]   ;;  %v5346_v4 = vld [vmem:[%s5337_s27 + $0x10] sm:$0xff]   ;;  %v269_v40 = vadd.s32 64, %v5422_v19  ;;  %v271_v50 = vadd.s32 80, %v5422_v19  ;;  %v277_v62 = vadd.s32 128, %v5422_v19 }
  0x13   : > { %1658 = vrot.lane.b32.xlu1 %v5340_v2, %s5283_s30  ;;  %1626 = vrot.lane.b32.xlu0 %v5343_v3, %s5284_s6  ;;  %v5356_v6 = vld [vmem:[%s5337_s27 + $0x18] sm:$0xff]   ;;  %v5366_v8 = vld [vmem:[%s5337_s27 + $0x20] sm:$0xff]   ;;  %v311_v23 = vand.u32 15, %v263_v21  ;;  %v7597_v29 = vshrl.u32 %v5343_v3, 16  ;;  %vm5454_vm3 = vcmp.ge.s32.totalorder %v297_v24, 1  ;;  %v7591_v31 = vshrl.u32 %v5340_v2, 16 }
  0x14   : > { %4790 = vmatpush3.bf16.msra.mxu0 %v5208_v1  ;;  %v5376_v10 = vld [vmem:[%s5337_s27 + $0x28] sm:$0xff]   ;;  %v5386_v12 = vld [vmem:[%s5337_s27 + $0x30] sm:$0xff]   ;;  %v5398_v14 = vld [vmem:[%s5337_s27 + $0x38] sm:$0xff]   ;;  %v325_v32 = vand.u32 15, %v265_v25  ;;  %v339_v34 = vand.u32 15, %v267_v27  ;;  %v7594_v39 = vshll.u32 %v5340_v2, 16 }
  0x15   : > { %4791 = vmatprep.subr.bf16.mxu0 %v5209_v5  ;;  %v5406_v15 = vld [vmem:[%s5337_s27 + $0x40] sm:$0xff]   ;;  %v5413_v16 = vld [vmem:[%s5337_s27 + $0x48] sm:$0xff]   ;;  %v5420_v18 = vld [vmem:[%s5337_s27 + $0x50] sm:$0xff]   ;;  %vm5449_vm0 = vcmp.ge.s32.totalorder %v311_v23, 1  ;;  %v825_v38 = vrot.slane %v7597_v29, 7  ;;  %v832_v41 = vrot.slane %v7591_v31, 7 }
  0x16   : > { %v5429_v20 = vld [vmem:[%s5337_s27 + $0x58] sm:$0xff]   ;;  %v5437_v22 = vld [vmem:[%s5337_s27 + $0x60] sm:$0xff]   ;;  %v5446_v26 = vld [vmem:[%s5337_s27 + $0x68] sm:$0xff]   ;;  %vm5488_vm6 = vcmp.ge.s32.totalorder %v325_v32, 1  ;;  %v7598_v44 = vshll.u32 %v5343_v3, 16  ;;  %vm5495_vm7 = vcmp.ge.s32.totalorder %v339_v34, 1 }
  0x17   : > { %1660 = vrot.lane.b32.xlu1 %v5346_v4, %s5283_s30  ;;  %1628 = vrot.lane.b32.xlu0 %v5340_v2, %s5284_s6  ;;  %v5464_v33 = vld [vmem:[%s5337_s27 + $0x70] sm:$0xff]   ;;  %vm1034_vm4 = vmpackc.low %vm5449_vm0, %vm5449_vm0  ;;  %v5476_v37 = vld [vmem:[%s5337_s27 + $0x78] sm:$0xff]   ;;  %v7583_v47 = vshrl.u32 %v5346_v4, 16  ;;  %v7579_v48 = vshrl.u32 %v5356_v6, 16  ;;  %v353_v49 = vand.u32 15, %v269_v40  ;;  %v835_v52 = vor.u32 %v7594_v39, %v832_v41 }
  0x18   : > { %4792 = vmatpush3.bf16.msra.mxu0 %v5209_v5  ;;  %vm1032_vm5 = vmpackc.low %vm5454_vm3, %vm5454_vm3  ;;  %v1066_v43 = vsel %vm1034_vm4, 65537, %v7600_v35  ;;  %v828_v53 = vor.u32 %v7598_v44, %v825_v38  ;;  %v7584_v55 = vshll.u32 %v5346_v4, 16  ;;  %v7582_v59 = vshll.u32 %v5356_v6, 16 }
  0x19   : > { %4793 = vmatprep.subr.bf16.mxu0 %v5210_v7  ;;  %v1064_v45 = vsel %vm1032_vm5, 65537, %v7600_v35  ;;  %vm1036_vm8 = vmpackc.low %vm5488_vm6, %vm5488_vm6  ;;  %v4438_v51 = vcombine.low %v1066_v43, %v5470_v36  ;;  %v840_v56 = vrot.slane %v7583_v47, 7  ;;  %v848_v58 = vrot.slane %v7579_v48, 7 }
  0x1a   : > { %vm1038_vm11 = vmpackc.low %vm5495_vm7, %vm5495_vm7  ;;  %v4437_v54 = vcombine.low %v1064_v45, %v5470_v36  ;;  %v1068_v57 = vsel %vm1036_vm8, 65537, %v7600_v35  ;;  %vm5531_vm13 = vcmp.ge.s32.totalorder %v353_v49, 1  ;;  %v7576_v63 = vshrl.u32 %v5366_v8, 16 }
  0x1b   : > { %1632 = vrot.lane.b32.xlu1 %v5356_v6, %s5284_s6  ;;  %1630 = vrot.lane.b32.xlu0 %v5346_v4, %s5284_s6  ;;  %v1070_v61 = vsel %vm1038_vm11, 65537, %v7600_v35  ;;  %v367_v0 = vand.u32 15, %v271_v50  ;;  %v273_v1 = vadd.s32 96, %v5422_v19  ;;  %v836_v5 = vsel %vm7588_vm9, %v825_v38, %v835_v52  ;;  %vm1040_vm0 = vmpackc.low %vm5531_vm13, %vm5531_vm13 }
  0x1c   : > { %4794 = vmatpush3.bf16.msra.mxu0 %v5210_v7  ;;  %vm5542_vm14 = vcmp.ne.s16.totalorder %v4438_v51, 0  ;;  %vm5546_vm15 = vcmp.ne.s16.totalorder %v4437_v54, 0  ;;  %v843_v17 = vor.u32 %v7584_v55, %v840_v56  ;;  %v4439_v21 = vcombine.low %v1068_v57, %v5470_v36 }
  0x1d   : > { %4795 = vmatprep.subr.bf16.mxu0 %v5211_v9  ;;  %v4440_v23 = vcombine.low %v1070_v61, %v5470_v36  ;;  %v851_v24 = vor.u32 %v7582_v59, %v848_v58  ;;  %v856_v25 = vrot.slane %v7576_v63, 7  ;;  %v7577_v27 = vshll.u32 %v5366_v8, 16 }
  0x1e   : > { %vm5564_vm1 = vcmp.ge.s32.totalorder %v367_v0, 1  ;;  %v7572_v30 = vshrl.u32 %v5376_v10, 16  ;;  %v381_v32 = vand.u32 15, %v273_v1  ;;  %v275_v34 = vadd.s32 112, %v5422_v19 }
  0x1f   : > { %1664 = vrot.lane.b32.xlu1 %v5366_v8, %s5283_s30  ;;  %1662 = vrot.lane.b32.xlu0 %v5356_v6, %s5283_s30  ;;  %v5576_v38 = vsel %vm5542_vm14, %v836_v5, 0  ;;  %v1072_v42 = vsel %vm1040_vm0, 65537, %v7600_v35  ;;  %v844_v43 = vsel %vm7588_vm9, %v832_v41, %v843_v17  ;;  %vm5584_vm2 = vcmp.ne.s16.totalorder %v4439_v21, 0  ;;  %vm1042_vm3 = vmpackc.low %vm5564_vm1, %vm5564_vm1 }
  0x20   : > { %4796 = vmatpush3.bf16.msra.mxu0 %v5211_v9  ;;  %v852_v46 = vsel %vm7588_vm9, %v840_v56, %v851_v24  ;;  %vm5592_vm4 = vcmp.ne.s16.totalorder %v4440_v23, 0  ;;  %v859_v50 = vor.u32 %v7577_v27, %v856_v25  ;;  %v7573_v51 = vshll.u32 %v5376_v10, 16 }
  0x21   : > { %4797 = vmatprep.subr.bf16.mxu0 %v5212_v11  ;;  %v4441_v41 = vcombine.low %v1072_v42, %v5470_v36  ;;  %v864_v52 = vrot.slane %v7572_v30, 7  ;;  %vm5606_vm5 = vcmp.ge.s32.totalorder %v381_v32, 1  ;;  %v395_v54 = vand.u32 15, %v275_v34 }
  0x22   : > { %v5612_v56 = vsel %vm5584_vm2, %v844_v43, 0  ;;  %v1074_v57 = vsel %vm1042_vm3, 65537, %v7600_v35  ;;  %v7568_v61 = vshrl.u32 %v5386_v12, 16  ;;  %v5619_v0 = vsel %vm5592_vm4, %v852_v46, 0  ;;  %vm1044_vm6 = vmpackc.low %vm5606_vm5, %vm5606_vm5 }
  0x23   : > { %1636 = vrot.lane.b32.xlu1 %v5376_v10, %s5284_s6  ;;  %1634 = vrot.lane.b32.xlu0 %v5366_v8, %s5284_s6  ;;  %v860_v1 = vsel %vm7588_vm9, %v848_v58, %v859_v50  ;;  %vm5629_vm7 = vcmp.ne.s16.totalorder %v4441_v41, 0  ;;  %v4442_v17 = vcombine.low %v1074_v57, %v5470_v36  ;;  %vm5636_vm8 = vcmp.ge.s32.totalorder %v395_v54, 1 }
  0x24   : > { %4798 = vmatpush3.bf16.msra.mxu0 %v5212_v11  ;;  %v967_v11 = vsel %vm5526_vm12, 0, %v828_v53  ;;  %v872_v21 = vrot.slane %v7568_v61, 7  ;;  %v7571_v23 = vshll.u32 %v5386_v12, 16  ;;  %v409_v24 = vand.u32 15, %v277_v62  ;;  %vm1046_vm10 = vmpackc.low %vm5636_vm8, %vm5636_vm8 }
  0x25   : > { %4831 = vmatprep.subr.bf16.mxu0 %v5391_v13  ;;  %v5580_v40 = vsel %vm5546_vm15, %v967_v11, 0  ;;  %v867_v11 = vor.u32 %v7573_v51, %v864_v52  ;;  %v279_v28 = vadd.s32 144, %v5422_v19  ;;  %v1076_v32 = vsel %vm1044_vm6, 65537, %v7600_v35 }
  0x26   : > { %v7567_v34 = vshrl.u32 %v5398_v14, 16  ;;  %v281_v42 = vadd.s32 160, %v5422_v19  ;;  %v5656_v43 = vsel %vm5629_vm7, %v860_v1, 0  ;;  %vm5659_vm11 = vcmp.ne.s16.totalorder %v4442_v17, 0 }
  0x27   : > { %1668 = vrot.lane.b32.xlu1 %v5386_v12, %s5283_s30  ;;  %1666 = vrot.lane.b32.xlu0 %v5376_v10, %s5283_s30  ;;  %v868_v46 = vsel %vm7588_vm9, %v856_v25, %v867_v11  ;;  %v875_v41 = vor.u32 %v7571_v23, %v872_v21  ;;  %v4443_v53 = vcombine.low %v1076_v32, %v5470_v36  ;;  %vm5666_vm13 = vcmp.ge.s32.totalorder %v409_v24, 1 }
  0x28   : > { %v423_v57 = vand.u32 15, %v279_v28  ;;  %v880_v62 = vrot.slane %v7567_v34, 7  ;;  %v7570_v1 = vshll.u32 %v5398_v14, 16  ;;  %v1078_v25 = vsel %vm1046_vm10, 65537, %v7600_v35  ;;  %vm1048_vm0 = vmpackc.low %vm5666_vm13, %vm5666_vm13 }
  0x29   : > { %v7569_v11 = vshrl.u32 %v5406_v15, 16  ;;  %v437_v17 = vand.u32 15, %v281_v42  ;;  %v283_v58 = vadd.s32 176, %v5422_v19  ;;  %v5682_v24 = vsel %vm5659_vm11, %v868_v46, 0 }
  0x2a   : > { %v876_v28 = vsel %vm7588_vm9, %v864_v52, %v875_v41  ;;  %vm5688_vm1 = vcmp.ne.s16.totalorder %v4443_v53, 0  ;;  %v4444_v42 = vcombine.low %v1078_v25, %v5470_v36  ;;  %vm5693_vm3 = vcmp.ge.s32.totalorder %v423_v57, 1 }
  0x2b   : > { %1640 = vrot.lane.b32.xlu1 %v5398_v14, %s5284_s6  ;;  %1638 = vrot.lane.b32.xlu0 %v5386_v12, %s5284_s6  ;;  %v883_v46 = vor.u32 %v7570_v1, %v880_v62  ;;  %v888_v54 = vrot.slane %v7569_v11, 7  ;;  %v7575_v61 = vshll.u32 %v5406_v15, 16  ;;  %v7574_v52 = vshrl.u32 %v5413_v16, 16  ;;  %vm1050_vm6 = vmpackc.low %vm5693_vm3, %vm5693_vm3 }
  0x2c   : > { %v1080_v41 = vsel %vm1048_vm0, 65537, %v7600_v35  ;;  %vm5704_vm5 = vcmp.ge.s32.totalorder %v437_v17, 1  ;;  %v451_v57 = vand.u32 15, %v283_v58  ;;  %v7578_v25 = vshrl.u32 %v5420_v18, 16 }
  0x2d   : > { %v285_v11 = vadd.s32 192, %v5422_v19  ;;  %v5719_v17 = vsel %vm5688_vm1, %v876_v28, 0  ;;  %vm5721_vm8 = vcmp.ne.s16.totalorder %v4444_v42, 0  ;;  %v7703_v58 = vmov 0  ;;  %vm1052_vm10 = vmpackc.low %vm5704_vm5, %vm5704_vm5 }
  0x2e   : > { %v7704_v58 = vsel %vm5721_vm8, 4294967295, %v7703_v58  ;;  %v7581_v1 = vshll.u32 %v5413_v16, 16  ;;  %v884_v23 = vsel %vm7588_vm9, %v872_v21, %v883_v46  ;;  %v891_v34 = vor.u32 %v7575_v61, %v888_v54 }
  0x2f   : > { %1672 = vrot.lane.b32.xlu1 %v5406_v15, %s5283_s30  ;;  %1670 = vrot.lane.b32.xlu0 %v5398_v14, %s5283_s30  ;;  %7705 = vst [vmem:[#allocation2_spill] sm:$0xff] %v7704_v58  ;;  %v4445_v30 = vcombine.low %v1080_v41, %v5470_v36  ;;  %v896_v51 = vrot.slane %v7574_v52, 7  ;;  %v1082_v28 = vsel %vm1050_vm6, 65537, %v7600_v35  ;;  %vm5736_vm13 = vcmp.ge.s32.totalorder %v451_v57, 1 }
  0x30   : > { %v7580_v21 = vshrl.u32 %v5429_v20, 16  ;;  %v904_v46 = vrot.slane %v7578_v25, 7  ;;  %v7587_v41 = vshll.u32 %v5420_v18, 16  ;;  %v465_v53 = vand.u32 15, %v285_v11  ;;  %vm1054_vm3 = vmpackc.low %vm5736_vm13, %vm5736_vm13 }
  0x31   : > { %v5750_v57 = vsel %vm5721_vm8, %v884_v23, 0  ;;  %v1084_v52 = vsel %vm1052_vm10, 65537, %v7600_v35  ;;  %v287_v61 = vadd.s32 208, %v5422_v19  ;;  %v892_v63 = vsel %vm7588_vm9, %v880_v62, %v891_v34 }
  0x32   : > { %vm5755_vm0 = vcmp.ne.s16.totalorder %v4445_v30, 0  ;;  %v7708_v27 = vmov 0  ;;  %v899_v25 = vor.u32 %v7581_v1, %v896_v51  ;;  %v4446_v48 = vcombine.low %v1082_v28, %v5470_v36 }
  0x33   : > { %1644 = vrot.lane.b32.xlu1 %v5413_v16, %s5284_s6  ;;  %1642 = vrot.lane.b32.xlu0 %v5406_v15, %s5284_s6  ;;  %v7709_v27 = vsel %vm5755_vm0, 4294967295, %v7708_v27  ;;  %v912_v23 = vrot.slane %v7580_v21, 7  ;;  %v7586_v11 = vshll.u32 %v5429_v20, 16  ;;  %v7585_v62 = vshrl.u32 %v5437_v22, 16 }
  0x34   : > { %7710 = vst [vmem:[#allocation3_spill] sm:$0xff] %v7709_v27  ;;  %v907_v30 = vor.u32 %v7587_v41, %v904_v46  ;;  %v4447_v34 = vcombine.low %v1084_v52, %v5470_v36  ;;  %vm5776_vm5 = vcmp.ge.s32.totalorder %v465_v53, 1  ;;  %v5782_v42 = vsel %vm5755_vm0, %v892_v63, 0 }
  0x35   : > { %v1086_v21 = vsel %vm1054_vm3, 65537, %v7600_v35  ;;  %v479_v1 = vand.u32 15, %v287_v61  ;;  %v289_v59 = vadd.s32 224, %v5422_v19  ;;  %v900_v47 = vsel %vm7588_vm9, %v888_v54, %v899_v25  ;;  %vm1056_vm10 = vmpackc.low %vm5776_vm5, %vm5776_vm5 }
  0x36   : > { %vm5787_vm6 = vcmp.ne.s16.totalorder %v4446_v48, 0  ;;  %v7713_v55 = vmov 0  ;;  %v915_v52 = vor.u32 %v7586_v11, %v912_v23  ;;  %v920_v53 = vrot.slane %v7585_v62, 7 }
  0x37   : > { %1676 = vrot.lane.b32.xlu1 %v5420_v18, %s5283_s30  ;;  %1674 = vrot.lane.b32.xlu0 %v5413_v16, %s5283_s30  ;;  %v7714_v55 = vsel %vm5787_vm6, 4294967295, %v7713_v55  ;;  %v7589_v63 = vshll.u32 %v5437_v22, 16  ;;  %v908_v48 = vsel %vm7588_vm9, %v896_v51, %v907_v30  ;;  %vm5804_vm13 = vcmp.ne.s16.totalorder %v4447_v34, 0 }
  0x38   : > { %7715 = vst [vmem:[#allocation4_spill] sm:$0xff] %v7714_v55  ;;  %v7716_v61 = vmov 0  ;;  %v4448_v54 = vcombine.low %v1086_v21, %v5470_v36  ;;  %v7590_v25 = vshrl.u32 %v5446_v26, 16  ;;  %v5812_v28 = vsel %vm5787_vm6, %v900_v47, 0 }
  0x39   : > { %v7717_v61 = vsel %vm5804_vm13, 4294967295, %v7716_v61  ;;  %vm5814_vm3 = vcmp.ge.s32.totalorder %v479_v1, 1  ;;  %v493_v11 = vand.u32 15, %v289_v59  ;;  %v291_v41 = vadd.s32 240, %v5422_v19 }
  0x3a   : > { %7718 = vst [vmem:[#allocation5_spill] sm:$0xff] %v7717_v61  ;;  %v1088_v51 = vsel %vm1056_vm10, 65537, %v7600_v35  ;;  %v5822_v30 = vsel %vm5804_vm13, %v908_v48, 0  ;;  %v916_v21 = vsel %vm7588_vm9, %v904_v46, %v915_v52  ;;  %v923_v34 = vor.u32 %v7589_v63, %v920_v53  ;;  %vm1058_vm10 = vmpackc.low %vm5814_vm3, %vm5814_vm3 }
  0x3b   : > { %1648 = vrot.lane.b32.xlu1 %v5429_v20, %s5284_s6  ;;  %1646 = vrot.lane.b32.xlu0 %v5420_v18, %s5284_s6  ;;  %vm5831_vm5 = vcmp.ne.s16.totalorder %v4448_v54, 0  ;;  %v7721_v47 = vmov 0  ;;  %v928_v59 = vrot.slane %v7590_v25, 7  ;;  %v7595_v1 = vshll.u32 %v5446_v26, 16 }
  0x3c   : > { %v7722_v47 = vsel %vm5831_vm5, 4294967295, %v7721_v47  ;;  %v7596_v46 = vshrl.u32 %v5464_v33, 16  ;;  %v4449_v52 = vcombine.low %v1088_v51, %v5470_v36  ;;  %vm5843_vm9 = vcmp.ge.s32.totalorder %v493_v11, 1 }
  0x3d   : > { %7723 = vst [vmem:[#allocation6_spill] sm:$0xff] %v7722_v47  ;;  %v507_v54 = vand.u32 15, %v291_v41  ;;  %v262_v63 = vadd.s32 8, %v5422_v19  ;;  %v5850_v25 = vsel %vm5831_vm5, %v916_v21, 0  ;;  %v1090_v31 = vsel %vm1058_vm10, 65537, %v7600_v35  ;;  %vm1060_vm10 = vmpackc.low %vm5843_vm9, %vm5843_vm9 }
  0x3e   : > { %vm7726_vm3 = vsmask.f32 256  ;;  %v931_v62 = vor.u32 %v7595_v1, %v928_v59  ;;  %v936_v41 = vrot.slane %v7596_v46, 7  ;;  %v7602_v51 = vshll.u32 %v5464_v33, 16 }
  0x3f   : > { %1680 = vrot.lane.b32.xlu1 %v5437_v22, %s5283_s30  ;;  %1678 = vrot.lane.b32.xlu0 %v5429_v20, %s5283_s30  ;;  %v924_v11 = vsel %vm7726_vm3, %v912_v23, %v923_v34  ;;  %vm5866_vm5 = vcmp.ne.s16.totalorder %v4449_v52, 0  ;;  %v7727_v21 = vmov 0  ;;  %vm5870_vm13 = vcmp.ge.s32.totalorder %v507_v54, 1  ;;  %vm7732_vm9 = vmmov %vm7726_vm3 }
  0x40   : > { %v7728_v21 = vsel %vm5866_vm5, 4294967295, %v7727_v21  ;;  %v304_v23 = vand.u32 15, %v262_v63  ;;  %v264_v34 = vadd.s32 24, %v5422_v19  ;;  %v4450_v1 = vcombine.low %v1090_v31, %v5470_v36  ;;  %vm1062_vm3 = vmpackc.low %vm5870_vm13, %vm5870_vm13 }
  0x41   : > { %7729 = vst [vmem:[#allocation7_spill] sm:$0xff] %v7728_v21  ;;  %v7604_v46 = vshrl.u32 %v5476_v37, 16  ;;  %v1092_v29 = vsel %vm1060_vm10, 65537, %v7600_v35  ;;  %v5884_v52 = vsel %vm5866_vm5, %v924_v11, 0  ;;  %v932_v63 = vsel %vm7732_vm9, %v920_v53, %v931_v62 }
  0x42   : > { %v939_v31 = vor.u32 %v7602_v51, %v936_v41  ;;  %vm5892_vm10 = vcmp.le.s32.totalorder %v304_v23, 14  ;;  %v318_v54 = vand.u32 15, %v264_v34  ;;  %v266_v44 = vadd.s32 40, %v5422_v19 }
  0x43   : > { %1652 = vrot.lane.b32.xlu1 %v5446_v26, %s5284_s6  ;;  %1650 = vrot.lane.b32.xlu0 %v5437_v22, %s5284_s6  ;;  %vm5897_vm6 = vcmp.ne.s16.totalorder %v4450_v1, 0  ;;  %v4451_v53 = vcombine.low %v1092_v29, %v5470_v36  ;;  %v944_v39 = vrot.slane %v7604_v46, 7  ;;  %v7738_v62 = vmov 0   ;;  %vm1308_vm13 = vmpackc.low %vm5892_vm10, %vm5892_vm10 }
  0x44   : > { %v1094_v51 = vsel %vm1062_vm3, 65537, %v7738_v62  ;;  %v7739_v23 = vshll.u32 %v5343_v3, 16  ;;  %v5917_v29 = vsel %vm5897_vm6, %v932_v63, 0  ;;  %vm5919_vm9 = vcmp.le.s32.totalorder %v318_v54, 14 }
  0x45   : > { %v332_v34 = vand.u32 15, %v266_v44  ;;  %vm7742_vm3 = vsmask.f32 256  ;;  %vm5925_vm5 = vcmp.ne.s16.totalorder %v4451_v53, 0  ;;  %v7743_v11 = vmov 0  ;;  %vm1310_vm10 = vmpackc.low %vm5919_vm9, %vm5919_vm9 }
  0x46   : > { %v1177_v21 = vrot.slane %v7739_v23, 1  ;;  %v268_v23 = vadd.s32 56, %v5422_v19  ;;  %v940_v46 = vsel %vm7742_vm3, %v928_v59, %v939_v31  ;;  %v7744_v11 = vsel %vm5925_vm5, 4294967295, %v7743_v11 }
  0x47   : > { %1684 = vrot.lane.b32.xlu1 %v5464_v33, %s5283_s30  ;;  %1682 = vrot.lane.b32.xlu0 %v5446_v26, %s5283_s30  ;;  %7745 = vst [vmem:[#allocation9_spill] sm:$0xff] %v7744_v11  ;;  %v7746_v48 = vshll.u32 %v5476_v37, 16  ;;  %v1340_v63 = vsel %vm1308_vm13, 65537, %v7738_v62  ;;  %v7747_v44 = vshrl.u32 %v5343_v3, 16  ;;  %v7748_v31 = vshll.u32 %v5340_v2, 16 }
  0x48   : > { %vm5948_vm13 = vcmp.le.s32.totalorder %v332_v34, 14  ;;  %v7752_v1 = vmov 0  ;;  %vm7755_vm9 = vcmask 261120   ;;  %v1342_v34 = vsel %vm1310_vm10, 65537, %v7738_v62 }
  0x49   : > { %v947_v47 = vor.u32 %v7746_v48, %v944_v39  ;;  %v1178_v59 = vor.u32 %v1177_v21, %v7747_v44  ;;  %v1179_v54 = vrot.slane %v7748_v31, 1  ;;  %v346_v39 = vand.u32 15, %v268_v23 }
  0x4a   : > { %v270_v48 = vadd.s32 72, %v5422_v19  ;;  %v4453_v31 = vcombine.low %v5470_v36, %v1340_v63  ;;  %vm7758_vm8 = vcmask 785408   ;;  %v7764_v53 = vshrl.u32 %v5340_v2, 16 }
  0x4b   : > { %1656 = vrot.lane.b32.xlu1 %v5476_v37, %s5284_s6  ;;  %1654 = vrot.lane.b32.xlu0 %v5464_v33, %s5284_s6  ;;  %vm5973_vm10 = vcmp.le.s32.totalorder %v346_v39, 14  ;;  %v4454_v39 = vcombine.low %v5470_v36, %v1342_v34  ;;  %v7769_v34 = vshll.u32 %v5356_v6, 16  ;;  %v7774_v27 = vmov 0 }
  0x4c   : > { %v360_v63 = vand.u32 15, %v270_v48  ;;  %v5214_v48 = vld [vmem:[%s7562_s1 + $0x8] sm:$0xff]  }
  0x4d   : > { %v1185_v55 = vrot.slane %v7769_v34, 1 }
  0x4f   : > { %1530 = vrot.lane.b32.xlu1 %v7600_v35, %s5283_s30  ;;  %1686 = vrot.lane.b32.xlu0 %v5476_v37, %s5283_s30  ;;  %v7735_v35 = vmov 0 }
  0x50   : > { %v7736_v35 = vsel %vm5897_vm6, 4294967295, %v7735_v35  ;;  %vm7751_vm6 = vmmov %vm7742_vm3  ;;  %vm7757_vm3 = vsmask.f32 7424 }
  0x51   : > { %7737 = vst [vmem:[#allocation8_spill] sm:$0xff] %v7736_v35  ;;  %v4452_v35 = vcombine.low %v1094_v51, %v5470_v36  ;;  %v5946_v51 = vsel %vm5925_vm5, %v940_v46, 0  ;;  %v948_v44 = vsel %vm7751_vm6, %v936_v41, %v947_v47  ;;  %vm7756_vm5 = vcmask 523264   ;;  %vm1312_vm6 = vmpackc.low %vm5948_vm13, %vm5948_vm13 }
  0x52   : > { %v1180_v47 = vsel %vm7757_vm3, %v1178_v59, %v1179_v54  ;;  %v7761_v59 = vmov 0  ;;  %vm7767_vm3 = vcmask 523264   ;;  %vm1314_vm13 = vmpackc.low %vm5973_vm10, %vm5973_vm10  ;;  %vm6016_vm10 = vcmp.ne.s16.totalorder %v4454_v39, 0 }
  0x53   : > { %1469 = vrot.lane.b32.xlu1 %v5576_v38, %s5284_s6  ;;  %1467 = vrot.lane.b32.xlu0 %v5580_v40, %s5284_s6  ;;  %vm5954_vm0 = vcmp.ne.s16.totalorder %v4452_v35, 0  ;;  %v7775_v27 = vsel %vm6016_vm10, 4294967295, %v7774_v27  ;;  %v7779_v39 = vshll.u32 %v5366_v8, 16 }
  0x54   : > { %v7753_v1 = vsel %vm5954_vm0, 4294967295, %v7752_v1  ;;  %v1175_v35 = vsel %vm5954_vm0, %v948_v44, 0  ;;  %7776 = vst [vmem:[#allocation12_spill] sm:$0xff] %v7775_v27  ;;  %v7784_v27 = vmov 0  ;;  %vm7854_vm0 = vcmask 785408  }
  0x55   : > { %7754 = vst [vmem:[#allocation10_spill] sm:$0xff] %v7753_v1 }
  0x57   : > { %1502 = vrot.lane.b32.xlu1 %v5612_v56, %s5283_s30  ;;  %1500 = vrot.lane.b32.xlu0 %v5576_v38, %s5283_s30 }
  0x5b   : > { %1473 = vrot.lane.b32.xlu1 %v5619_v0, %s5284_s6  ;;  %1471 = vrot.lane.b32.xlu0 %v5612_v56, %s5284_s6 }
  0x5f   : > { %1506 = vrot.lane.b32.xlu1 %v5656_v43, %s5283_s30  ;;  %1504 = vrot.lane.b32.xlu0 %v5619_v0, %s5283_s30 }
  0x63   : > { %1477 = vrot.lane.b32.xlu1 %v5682_v24, %s5284_s6  ;;  %1475 = vrot.lane.b32.xlu0 %v5656_v43, %s5284_s6 }
  0x67   : > { %1510 = vrot.lane.b32.xlu1 %v5719_v17, %s5283_s30  ;;  %1508 = vrot.lane.b32.xlu0 %v5682_v24, %s5283_s30 }
  0x6b   : > { %1481 = vrot.lane.b32.xlu1 %v5750_v57, %s5284_s6  ;;  %1479 = vrot.lane.b32.xlu0 %v5719_v17, %s5284_s6 }
  0x6f   : > { %1514 = vrot.lane.b32.xlu1 %v5782_v42, %s5283_s30  ;;  %1512 = vrot.lane.b32.xlu0 %v5750_v57, %s5283_s30 }
  0x73   : > { %1485 = vrot.lane.b32.xlu1 %v5812_v28, %s5284_s6  ;;  %1483 = vrot.lane.b32.xlu0 %v5782_v42, %s5284_s6 }
  0x77   : > { %1518 = vrot.lane.b32.xlu1 %v5822_v30, %s5283_s30  ;;  %1516 = vrot.lane.b32.xlu0 %v5812_v28, %s5283_s30 }
  0x7b   : > { %1489 = vrot.lane.b32.xlu1 %v5850_v25, %s5284_s6  ;;  %1487 = vrot.lane.b32.xlu0 %v5822_v30, %s5284_s6 }
  0x7f   : > { %1522 = vrot.lane.b32.xlu1 %v5884_v52, %s5283_s30  ;;  %1520 = vrot.lane.b32.xlu0 %v5850_v25, %s5283_s30 }
  0x83   : > { %1493 = vrot.lane.b32.xlu1 %v5917_v29, %s5284_s6  ;;  %1491 = vrot.lane.b32.xlu0 %v5884_v52, %s5284_s6 }
  0x85   : > { %v1659_v61 = vpop.permute.xlu1 %1658  ;;  %v1627_v21 = vpop.permute.xlu0 %1626 }
  0x86   : > { %v1689_v46 = vsel %vm7755_vm9, 0, %v1627_v21  ;;  %v272_v21 = vadd.s32 88, %v5422_v19 }
  0x87   : > { %1526 = vrot.lane.b32.xlu1 %v5946_v51, %s5283_s30  ;;  %1524 = vrot.lane.b32.xlu0 %v5917_v29, %s5283_s30  ;;  %v1721_v23 = vsel %vm7756_vm5, %v1689_v46, %v1659_v61  ;;  %vm5978_vm5 = vcmp.ne.s16.totalorder %v4453_v31, 0  ;;  %v1181_v46 = vor.u32 %v1179_v54, %v7764_v53  ;;  %v1344_v31 = vsel %vm1312_vm6, 65537, %v7738_v62 }
  0x88   : > { %4799 = vmatprep.mubr.msk.bf16.mxu0 %vm7758_vm8, %v1721_v23  ;;  %v7762_v59 = vsel %vm5978_vm5, 4294967295, %v7761_v59  ;;  %v7765_v23 = vshll.u32 %v5346_v4, 16  ;;  %vm7766_vm8 = vmmov %vm7755_vm9  ;;  %v7768_v53 = vshrl.u32 %v5346_v4, 16  ;;  %vm7770_vm9 = vcmask 785408  }
  0x89   : > { %v1661_v11 = vpop.permute.xlu1 %1660  ;;  %v1629_v61 = vpop.permute.xlu0 %1628  ;;  %7763 = vst [vmem:[#allocation11_spill] sm:$0xff] %v7762_v59  ;;  %vm6009_vm6 = vcmp.le.s32.totalorder %v360_v63, 14  ;;  %v1346_v63 = vsel %vm1314_vm13, 65537, %v7738_v62 }
  0x8a   : > { %v1182_v1 = vrot.slane %v7765_v23, 1  ;;  %v1691_v44 = vsel %vm7766_vm8, %v5343_v3, %v1629_v61  ;;  %v6007_v3 = vsel %vm5978_vm5, %v1180_v47, 0  ;;  %vm7773_vm8 = vsmask.f32 7424  ;;  %vm1316_vm13 = vmpackc.low %vm6009_vm6, %vm6009_vm6 }
  0x8b   : > { %1497 = vrot.lane.b32.xlu1 %v1175_v35, %s5284_s6  ;;  %1495 = vrot.lane.b32.xlu0 %v5946_v51, %s5284_s6  ;;  %v1723_v54 = vsel %vm7767_vm3, %v1691_v44, %v1661_v11  ;;  %v374_v11 = vand.u32 15, %v272_v21  ;;  %v274_v44 = vadd.s32 104, %v5422_v19  ;;  %v4455_v47 = vcombine.low %v5470_v36, %v1344_v31  ;;  %v5215_v21 = vld [vmem:[%s7562_s1 + $0x10] sm:$0xff]   ;;  %vm7777_vm3 = vmmov %vm7773_vm8 }
  0x8c   : > { %v1184_v23 = vor.u32 %v1182_v1, %v7768_v53  ;;  %4800 = vmatmul.mubr.msk.bf16.vlgmr.msra.gmra.mrb[0].mxu0 %vm7770_vm9, %v1723_v54  ;;  %v1183_v41 = vsel %vm7773_vm8, %v1181_v46, %v1182_v1  ;;  %v7778_v1 = vshrl.u32 %v5356_v6, 16  ;;  %v1188_v31 = vrot.slane %v7779_v39, 1 }
  0x8d   : > { %4832 = vmatpush3.bf16.msra.mxu0 %v5391_v13  ;;  %v1633_v53 = vpop.permute.xlu1 %1632  ;;  %v1631_v34 = vpop.permute.xlu0 %1630  ;;  %v6038_v54 = vsel %vm6016_vm10, %v1183_v41, 0  ;;  %vm6040_vm9 = vcmp.le.s32.totalorder %v374_v11, 14  ;;  %v388_v59 = vand.u32 15, %v274_v44  ;;  %vm7782_vm8 = vcmask 261120  }
  0x8e   : > { %4833 = vmatprep.subr.bf16.mxu0 %v5214_v48  ;;  %v1186_v13 = vsel %vm7777_vm3, %v1184_v23, %v1185_v55  ;;  %v1187_v46 = vor.u32 %v1185_v55, %v7778_v1  ;;  %v276_v23 = vadd.s32 120, %v5422_v19  ;;  %v1695_v55 = vsel %vm7782_vm8, %v5346_v4, %v1633_v53  ;;  %vm7783_vm3 = vmmov %vm7782_vm8 }
  0x8f   : > { %1528 = vrot.lane.b32.xlu0 %v1175_v35, %s5283_s30  ;;  %2239 = vrot.lane.b32.xlu1 %v6007_v3, %s5284_s6  ;;  %v1693_v1 = vsel %vm7783_vm3, %v5340_v2, %v1631_v34  ;;  %vm6049_vm6 = vcmp.ne.s16.totalorder %v4455_v47, 0  ;;  %v4456_v11 = vcombine.low %v5470_v36, %v1346_v63  ;;  %vm7787_vm10 = vcmask 523264   ;;  %v5216_v2 = vld [vmem:[%s7562_s1 + $0x18] sm:$0xff]  }
  0x90   : > { %v7785_v27 = vsel %vm6049_vm6, 4294967295, %v7784_v27  ;;  %vm7788_vm5 = vmmov %vm7787_vm10  ;;  %v1348_v58 = vsel %vm1316_vm13, 65537, %v7738_v62  ;;  %vm7789_vm8 = vcmask 785408   ;;  %v7790_v4 = vshrl.u32 %v5366_v8, 16 }
  0x91   : > { %v1665_v61 = vpop.permute.xlu1 %1664  ;;  %v1663_v39 = vpop.permute.xlu0 %1662  ;;  %4834 = vmatpush3.bf16.msra.mxu0 %v5214_v48  ;;  %7786 = vst [vmem:[#allocation13_spill] sm:$0xff] %v7785_v27  ;;  %v7791_v53 = vshll.u32 %v5376_v10, 16  ;;  %v6075_v47 = vsel %vm6049_vm6, %v1186_v13, 0  ;;  %vm6077_vm13 = vcmp.le.s32.totalorder %v388_v59, 14  ;;  %vm7795_vm3 = vsmask.f32 7424 }
  0x92   : > { %v1727_v41 = vsel %vm7787_vm10, %v1695_v55, %v1665_v61  ;;  %v1725_v44 = vsel %vm7788_vm5, %v1693_v1, %v1663_v39  ;;  %4835 = vmatprep.subr.bf16.mxu0 %v5215_v21  ;;  %v1190_v48 = vor.u32 %v1188_v31, %v7790_v4  ;;  %vm1318_vm5 = vmpackc.low %vm6040_vm9, %vm6040_vm9  ;;  %v402_v55 = vand.u32 15, %v276_v23  ;;  %v5217_v59 = vld [vmem:[%s7562_s1 + $0x20] sm:$0xff]  }
  0x93   : > { %4803 = vmatprep.mubr.msk.bf16.mxu0 %vm7789_vm8, %v1725_v44  ;;  %2241 = vrot.lane.b32.xlu0 %v6038_v54, %s5284_s6  ;;  %v1191_v34 = vrot.slane %v7791_v53, 1  ;;  %vm7792_vm10 = vmmov %vm7789_vm8  ;;  %v278_v1 = vadd.s32 136, %v5422_v19  ;;  %v1189_v39 = vsel %vm7795_vm3, %v1187_v46, %v1188_v31  ;;  %vm6083_vm9 = vcmp.ne.s16.totalorder %v4456_v11, 0 }
  0x94   : > { %4804 = vmatmul.mubr.msk.bf16.gmra.mrb[4].mxu0 %vm7792_vm10, %v1727_v41  ;;  %2271 = vrot.lane.b32.xlu1 %v6038_v54, %s5283_s30  ;;  %v7796_v41 = vmov 0  ;;  %v4457_v44 = vcombine.low %v5470_v36, %v1348_v58  ;;  %v1350_v13 = vsel %vm1318_vm5, 65537, %v7738_v62  ;;  %vm7799_vm8 = vmmov %vm7795_vm3  ;;  %v7800_v46 = vshrl.u32 %v5376_v10, 16 }
  0x95   : > { %v1637_v61 = vpop.permute.xlu1 %1636  ;;  %v1635_v35 = vpop.permute.xlu0 %1634  ;;  %v7797_v41 = vsel %vm6083_vm9, 4294967295, %v7796_v41  ;;  %4836 = vmatpush3.bf16.msra.mxu0 %v5215_v21  ;;  %v1192_v23 = vsel %vm7799_vm8, %v1190_v48, %v1191_v34  ;;  %v7801_v11 = vshll.u32 %v5386_v12, 16  ;;  %vm1320_vm5 = vmpackc.low %vm6077_vm13, %vm6077_vm13  ;;  %v6106_v58 = vsel %vm6083_vm9, %v1189_v39, 0 }
  0x96   : > { %7798 = vst [vmem:[#allocation14_spill] sm:$0xff] %v7797_v41  ;;  %4837 = vmatprep.subr.bf16.mxu0 %v5216_v2  ;;  %v1193_v31 = vor.u32 %v1191_v34, %v7800_v46  ;;  %vm6108_vm10 = vcmp.le.s32.totalorder %v402_v55, 14  ;;  %v416_v48 = vand.u32 15, %v278_v1  ;;  %v280_v53 = vadd.s32 152, %v5422_v19 }
  0x97   : > { %2273 = vrot.lane.b32.xlu0 %v6075_v47, %s5283_s30  ;;  %v1194_v4 = vrot.slane %v7801_v11, 1  ;;  %vm7804_vm3 = vcmask 261120   ;;  %vm6117_vm13 = vcmp.ne.s16.totalorder %v4457_v44, 0  ;;  %v7806_v27 = vmov 0 }
  0x98   : > { %2243 = vrot.lane.b32.xlu1 %v6075_v47, %s5284_s6  ;;  %v1699_v34 = vsel %vm7804_vm3, %v5366_v8, %v1637_v61  ;;  %vm7805_vm8 = vmmov %vm7804_vm3  ;;  %v7807_v27 = vsel %vm6117_vm13, 4294967295, %v7806_v27  ;;  %v4458_v55 = vcombine.low %v5470_v36, %v1350_v13  ;;  %vm7809_vm9 = vcmask 523264  }
  0x99   : > { %v1697_v63 = vsel %vm7805_vm8, %v5356_v6, %v1635_v35  ;;  %v1669_v46 = vpop.permute.xlu1 %1668  ;;  %v1667_v11 = vpop.permute.xlu0 %1666  ;;  %7808 = vst [vmem:[#allocation15_spill] sm:$0xff] %v7807_v27  ;;  %4838 = vmatpush3.bf16.msra.mxu0 %v5216_v2  ;;  %vm7810_vm6 = vmmov %vm7809_vm9  ;;  %v1352_v41 = vsel %vm1320_vm5, 65537, %v7738_v62  ;;  %v5218_v6 = vld [vmem:[%s7562_s1 + $0x28] sm:$0xff]   ;;  %vm7811_vm3 = vcmask 785408   ;;  %v7812_v8 = vshrl.u32 %v5386_v12, 16 }
  0x9a   : > { %v1731_v39 = vsel %vm7809_vm9, %v1699_v34, %v1669_v46  ;;  %v1729_v1 = vsel %vm7810_vm6, %v1697_v63, %v1667_v11  ;;  %4839 = vmatprep.subr.bf16.mxu0 %v5217_v59  ;;  %v7813_v2 = vshll.u32 %v5398_v14, 16  ;;  %vm1322_vm6 = vmpackc.low %vm6108_vm10, %vm6108_vm10  ;;  %v6143_v44 = vsel %vm6117_vm13, %v1192_v23, 0 }
  0x9b   : > { %4807 = vmatprep.mubr.msk.bf16.mxu0 %vm7811_vm3, %v1729_v1  ;;  %2245 = vrot.lane.b32.xlu0 %v6106_v58, %s5284_s6  ;;  %v1196_v61 = vor.u32 %v1194_v4, %v7812_v8  ;;  %vm7814_vm9 = vmmov %vm7811_vm3  ;;  %vm6145_vm5 = vcmp.le.s32.totalorder %v416_v48, 14  ;;  %v430_v34 = vand.u32 15, %v280_v53  ;;  %v282_v63 = vadd.s32 168, %v5422_v19  ;;  %v6160_v48 = vld [vmem:[%s7562_s1 + $0x60] sm:$0xff]  }
  0x9c   : > { %v1197_v35 = vrot.slane %v7813_v2, 1  ;;  %4808 = vmatmul.mubr.msk.bf16.gmra.mrb[8].mxu0 %vm7814_vm9, %v1731_v39  ;;  %2275 = vrot.lane.b32.xlu1 %v6106_v58, %s5283_s30  ;;  %vm7817_vm8 = vsmask.f32 7424  ;;  %vm6151_vm10 = vcmp.ne.s16.totalorder %v4458_v55, 0  ;;  %v7818_v39 = vmov 0 }
  0x9d   : > { %v1641_v46 = vpop.permute.xlu1 %1640  ;;  %v1639_v21 = vpop.permute.xlu0 %1638  ;;  %v1195_v11 = vsel %vm7817_vm8, %v1193_v31, %v1194_v4  ;;  %v7819_v39 = vsel %vm6151_vm10, 4294967295, %v7818_v39  ;;  %v4459_v1 = vcombine.low %v5470_v36, %v1352_v41  ;;  %4840 = vmatpush3.bf16.msra.mxu0 %v5217_v59  ;;  %v1354_v23 = vsel %vm1322_vm6, 65537, %v7738_v62  ;;  %vm7821_vm3 = vmmov %vm7817_vm8 }
  0x9e   : > { %7820 = vst [vmem:[#allocation16_spill] sm:$0xff] %v7819_v39  ;;  %4841 = vmatprep.subr.bf16.mxu0 %v5218_v6  ;;  %v1198_v31 = vsel %vm7821_vm3, %v1196_v61, %v1197_v35  ;;  %v7822_v4 = vshrl.u32 %v5398_v14, 16  ;;  %v7823_v55 = vshll.u32 %v5406_v15, 16  ;;  %vm1324_vm6 = vmpackc.low %vm6145_vm5, %vm6145_vm5  ;;  %v6176_v59 = vsel %vm6151_vm10, %v1195_v11, 0 }
  0x9f   : > { %2277 = vrot.lane.b32.xlu0 %v6143_v44, %s5283_s30  ;;  %vm6178_vm9 = vcmp.le.s32.totalorder %v430_v34, 14  ;;  %v444_v61 = vand.u32 15, %v282_v63  ;;  %v284_v2 = vadd.s32 184, %v5422_v19  ;;  %vm7826_vm8 = vcmask 261120  }
  0xa0   : > { %v1199_v53 = vor.u32 %v1197_v35, %v7822_v4  ;;  %v1200_v41 = vrot.slane %v7823_v55, 1  ;;  %2247 = vrot.lane.b32.xlu1 %v6143_v44, %s5284_s6  ;;  %v1703_v35 = vsel %vm7826_vm8, %v5386_v12, %v1641_v46  ;;  %vm7827_vm3 = vmmov %vm7826_vm8  ;;  %vm6187_vm5 = vcmp.ne.s16.totalorder %v4459_v1, 0 }
  0xa1   : > { %v1701_v13 = vsel %vm7827_vm3, %v5376_v10, %v1639_v21  ;;  %v1673_v4 = vpop.permute.xlu1 %1672  ;;  %v1671_v55 = vpop.permute.xlu0 %1670  ;;  %v7828_v27 = vmov 0  ;;  %v4460_v34 = vcombine.low %v5470_v36, %v1354_v23  ;;  %4842 = vmatpush3.bf16.msra.mxu0 %v5218_v6  ;;  %vm7830_vm10 = vcmask 523264  }
  0xa2   : > { %v7829_v27 = vsel %vm6187_vm5, 4294967295, %v7828_v27  ;;  %v1735_v11 = vsel %vm7830_vm10, %v1703_v35, %v1673_v4  ;;  %vm7831_vm13 = vmmov %vm7830_vm10  ;;  %v1356_v39 = vsel %vm1324_vm6, 65537, %v7738_v62  ;;  %4875 = vmatprep.subr.bf16.mxu0 %v6160_v48  ;;  %vm7832_vm8 = vcmask 785408  }
  0xa3   : > { %v1733_v63 = vsel %vm7831_vm13, %v1701_v13, %v1671_v55  ;;  %2249 = vrot.lane.b32.xlu0 %v6176_v59, %s5284_s6  ;;  %v7833_v10 = vshrl.u32 %v5406_v15, 16  ;;  %v7834_v46 = vshll.u32 %v5413_v16, 16  ;;  %vm1326_vm10 = vmpackc.low %vm6178_vm9, %vm6178_vm9  ;;  %v6211_v6 = vsel %vm6187_vm5, %v1198_v31, 0 }
  0xa4   : > { %4811 = vmatprep.mubr.msk.bf16.mxu0 %vm7832_vm8, %v1733_v63  ;;  %vm7835_vm13 = vmmov %vm7832_vm8  ;;  %2279 = vrot.lane.b32.xlu1 %v6176_v59, %s5283_s30  ;;  %vm6213_vm6 = vcmp.le.s32.totalorder %v444_v61, 14  ;;  %v458_v23 = vand.u32 15, %v284_v2  ;;  %v286_v35 = vadd.s32 200, %v5422_v19  ;;  %vm7838_vm3 = vsmask.f32 7424 }
  0xa5   : > { %v1202_v12 = vor.u32 %v1200_v41, %v7833_v10  ;;  %v1203_v21 = vrot.slane %v7834_v46, 1  ;;  %4812 = vmatmul.mubr.msk.bf16.gmra.mrb[12].mxu0 %vm7835_vm13, %v1735_v11  ;;  %v1645_v13 = vpop.permute.xlu1 %1644  ;;  %v1643_v8 = vpop.permute.xlu0 %1642  ;;  %v1201_v4 = vsel %vm7838_vm3, %v1199_v53, %v1200_v41  ;;  %vm6219_vm9 = vcmp.ne.s16.totalorder %v4460_v34, 0  ;;  %vm7842_vm8 = vmmov %vm7838_vm3 }
  0xa6   : > { %v7839_v55 = vmov 0  ;;  %v4461_v11 = vcombine.low %v5470_v36, %v1356_v39  ;;  %v1358_v31 = vsel %vm1326_vm10, 65537, %v7738_v62  ;;  %v7843_v2 = vshrl.u32 %v5413_v16, 16  ;;  %vm1328_vm13 = vmpackc.low %vm6213_vm6, %vm6213_vm6 }
  0xa7   : > { %v7840_v55 = vsel %vm6219_vm9, 4294967295, %v7839_v55  ;;  %2281 = vrot.lane.b32.xlu0 %v6211_v6, %s5283_s30  ;;  %v1204_v61 = vsel %vm7842_vm8, %v1202_v12, %v1203_v21  ;;  %v7844_v10 = vshll.u32 %v5420_v18, 16  ;;  %v6239_v39 = vsel %vm6219_vm9, %v1201_v4, 0 }
  0xa8   : > { %7841 = vst [vmem:[#allocation17_spill] sm:$0xff] %v7840_v55  ;;  %v1205_v63 = vor.u32 %v1203_v21, %v7843_v2  ;;  %2251 = vrot.lane.b32.xlu1 %v6211_v6, %s5284_s6  ;;  %vm6241_vm10 = vcmp.le.s32.totalorder %v458_v23, 14  ;;  %v472_v41 = vand.u32 15, %v286_v35  ;;  %v288_v34 = vadd.s32 216, %v5422_v19 }
  0xa9   : > { %v1206_v46 = vrot.slane %v7844_v10, 1  ;;  %vm7847_vm3 = vcmask 261120   ;;  %v1677_v1 = vpop.permute.xlu1 %1676  ;;  %v1675_v2 = vpop.permute.xlu0 %1674  ;;  %vm6250_vm6 = vcmp.ne.s16.totalorder %v4461_v11, 0  ;;  %v7849_v10 = vmov 0 }
  0xaa   : > { %v1707_v12 = vsel %vm7847_vm3, %v5406_v15, %v1645_v13  ;;  %vm7848_vm8 = vmmov %vm7847_vm3  ;;  %v7850_v10 = vsel %vm6250_vm6, 4294967295, %v7849_v10  ;;  %v4462_v23 = vcombine.low %v5470_v36, %v1358_v31  ;;  %vm7852_vm9 = vcmask 523264  }
  0xab   : > { %v1705_v21 = vsel %vm7848_vm8, %v5398_v14, %v1643_v8  ;;  %7851 = vst [vmem:[#allocation18_spill] sm:$0xff] %v7850_v10  ;;  %v1739_v4 = vsel %vm7852_vm9, %v1707_v12, %v1677_v1  ;;  %vm7853_vm5 = vmmov %vm7852_vm9  ;;  %v1360_v55 = vsel %vm1328_vm13, 65537, %v7738_v62  ;;  %2253 = vrot.lane.b32.xlu0 %v6239_v39, %s5284_s6  ;;  %v7855_v14 = vshrl.u32 %v5420_v18, 16 }
  0xac   : > { %v1737_v35 = vsel %vm7853_vm5, %v1705_v21, %v1675_v2  ;;  %v7856_v13 = vshll.u32 %v5429_v20, 16  ;;  %vm1330_vm3 = vmpackc.low %vm6241_vm10, %vm6241_vm10  ;;  %2283 = vrot.lane.b32.xlu1 %v6239_v39, %s5283_s30  ;;  %v6273_v11 = vsel %vm6250_vm6, %v1204_v61, 0  ;;  %v486_v12 = vand.u32 15, %v288_v34 }
  0xad   : > { %4815 = vmatprep.mubr.msk.bf16.mxu0 %vm7854_vm0, %v1737_v35  ;;  %v1208_v15 = vor.u32 %v1206_v46, %v7855_v14  ;;  %vm7857_vm9 = vmmov %vm7854_vm0  ;;  %vm6275_vm0 = vcmp.le.s32.totalorder %v472_v41, 14  ;;  %v290_v21 = vadd.s32 232, %v5422_v19  ;;  %v1649_v1 = vpop.permute.xlu1 %1648  ;;  %v1647_v53 = vpop.permute.xlu0 %1646  ;;  %vm7860_vm5 = vsmask.f32 7424 }
  0xae   : > { %v1209_v8 = vrot.slane %v7856_v13, 1  ;;  %4816 = vmatmul.mubr.msk.bf16.gmra.mrb[16].mxu0 %vm7857_vm9, %v1739_v4  ;;  %v1207_v2 = vsel %vm7860_vm5, %v1205_v63, %v1206_v46  ;;  %vm6281_vm13 = vcmp.ne.s16.totalorder %v4462_v23, 0  ;;  %v7861_v4 = vmov 0  ;;  %vm7863_vm10 = vmmov %vm7860_vm5 }
  0xaf   : > { %v7862_v4 = vsel %vm6281_vm13, 4294967295, %v7861_v4  ;;  %v4463_v35 = vcombine.low %v5470_v36, %v1360_v55  ;;  %v1362_v61 = vsel %vm1330_vm3, 65537, %v7738_v62  ;;  %2285 = vrot.lane.b32.xlu0 %v6273_v11, %s5283_s30  ;;  %v7864_v34 = vshrl.u32 %v5429_v20, 16  ;;  %vm1332_vm8 = vmpackc.low %vm6275_vm0, %vm6275_vm0 }
  0xb0   : > { %v1210_v41 = vsel %vm7863_vm10, %v1208_v15, %v1209_v8  ;;  %v7865_v13 = vshll.u32 %v5437_v22, 16  ;;  %2255 = vrot.lane.b32.xlu1 %v6273_v11, %s5284_s6  ;;  %v6301_v55 = vsel %vm6281_vm13, %v1207_v2, 0  ;;  %vm6303_vm3 = vcmp.le.s32.totalorder %v486_v12, 14 }
  0xb1   : > { %v1211_v14 = vor.u32 %v1209_v8, %v7864_v34  ;;  %v500_v46 = vand.u32 15, %v290_v21  ;;  %v292_v23 = vadd.s32 248, %v5422_v19  ;;  %vm7868_vm9 = vcmask 261120   ;;  %v1681_v31 = vpop.permute.xlu1 %1680  ;;  %v1679_v34 = vpop.permute.xlu0 %1678 }
  0xb2   : > { %v1212_v10 = vrot.slane %v7865_v13, 1  ;;  %v1711_v15 = vsel %vm7868_vm9, %v5420_v18, %v1649_v1  ;;  %vm7869_vm5 = vmmov %vm7868_vm9  ;;  %vm6312_vm0 = vcmp.ne.s16.totalorder %v4463_v35, 0  ;;  %v7870_v13 = vmov 0 }
  0xb3   : > { %v1709_v8 = vsel %vm7869_vm5, %v5413_v16, %v1647_v53  ;;  %v7871_v13 = vsel %vm6312_vm0, 4294967295, %v7870_v13  ;;  %v4464_v12 = vcombine.low %v5470_v36, %v1362_v61  ;;  %vm7872_vm10 = vcmask 523264   ;;  %2257 = vrot.lane.b32.xlu0 %v6301_v55, %s5284_s6  ;;  %vm1334_vm9 = vmpackc.low %vm6303_vm3, %vm6303_vm3 }
  0xb4   : > { %v1743_v2 = vsel %vm7872_vm10, %v1711_v15, %v1681_v31  ;;  %vm7873_vm13 = vmmov %vm7872_vm10  ;;  %v1364_v19 = vsel %vm1332_vm8, 65537, %v7738_v62  ;;  %vm7874_vm6 = vcmask 785408   ;;  %v7875_v16 = vshrl.u32 %v5437_v22, 16  ;;  %2287 = vrot.lane.b32.xlu1 %v6301_v55, %s5283_s30 }
  0xb5   : > { %v1741_v21 = vsel %vm7873_vm13, %v1709_v8, %v1679_v34  ;;  %v7876_v1 = vshll.u32 %v5446_v26, 16  ;;  %vm7877_vm5 = vmmov %vm7874_vm6  ;;  %v6335_v35 = vsel %vm6312_vm0, %v1210_v41, 0  ;;  %v514_v15 = vand.u32 15, %v292_v23  ;;  %v1653_v8 = vpop.permute.xlu1 %1652  ;;  %v1651_v31 = vpop.permute.xlu0 %1650 }
  0xb6   : > { %4819 = vmatprep.mubr.msk.bf16.mxu0 %vm7874_vm6, %v1741_v21  ;;  %v1214_v18 = vor.u32 %v1212_v10, %v7875_v16  ;;  %vm6337_vm6 = vcmp.le.s32.totalorder %v500_v46, 14  ;;  %vm7880_vm13 = vsmask.f32 7424  ;;  %vm6342_vm8 = vcmp.ne.s16.totalorder %v4464_v12, 0 }
  0xb7   : > { %v1215_v53 = vrot.slane %v7876_v1, 1  ;;  %4820 = vmatmul.mubr.msk.bf16.gmra.mrb[20].mxu0 %vm7877_vm5, %v1743_v2  ;;  %v1213_v63 = vsel %vm7880_vm13, %v1211_v14, %v1212_v10  ;;  %v7881_v34 = vmov 0  ;;  %v4465_v2 = vcombine.low %v5470_v36, %v1364_v19  ;;  %2289 = vrot.lane.b32.xlu0 %v6335_v35, %s5283_s30  ;;  %vm7883_vm3 = vmmov %vm7880_vm13 }
  0xb8   : > { %v7882_v34 = vsel %vm6342_vm8, 4294967295, %v7881_v34  ;;  %v1366_v21 = vsel %vm1334_vm9, 65537, %v7738_v62  ;;  %vm1336_vm10 = vmpackc.low %vm6337_vm6, %vm6337_vm6  ;;  %2259 = vrot.lane.b32.xlu1 %v6335_v35, %s5284_s6  ;;  %v6358_v10 = vsel %vm6342_vm8, %v1213_v63, 0  ;;  %v7884_v14 = vshrl.u32 %v5446_v26, 16 }
  0xb9   : > { %v1216_v41 = vsel %vm7883_vm3, %v1214_v18, %v1215_v53  ;;  %v7885_v23 = vshll.u32 %v5464_v33, 16  ;;  %vm6364_vm9 = vcmp.le.s32.totalorder %v514_v15, 14  ;;  %vm7888_vm5 = vcmask 261120   ;;  %v1685_v1 = vpop.permute.xlu1 %1684  ;;  %v1683_v61 = vpop.permute.xlu0 %1682 }
  0xba   : > { %v1217_v46 = vor.u32 %v1215_v53, %v7884_v14  ;;  %v1715_v16 = vsel %vm7888_vm5, %v5437_v22, %v1653_v8  ;;  %vm7889_vm6 = vmmov %vm7888_vm5  ;;  %vm6372_vm13 = vcmp.ne.s16.totalorder %v4465_v2, 0  ;;  %v7890_v63 = vmov 0 }
  0xbb   : > { %v1218_v12 = vrot.slane %v7885_v23, 1  ;;  %v1713_v18 = vsel %vm7889_vm6, %v5429_v20, %v1651_v31  ;;  %v7891_v63 = vsel %vm6372_vm13, 4294967295, %v7890_v63  ;;  %v4466_v53 = vcombine.low %v5470_v36, %v1366_v21  ;;  %2261 = vrot.lane.b32.xlu0 %v6358_v10, %s5284_s6  ;;  %vm1338_vm5 = vmpackc.low %vm6364_vm9, %vm6364_vm9 }
  0xbc   : > { %vm7892_vm3 = vcmask 523264   ;;  %v1368_v23 = vsel %vm1336_vm10, 65537, %v7738_v62  ;;  %vm7894_vm0 = vcmask 785408   ;;  %2291 = vrot.lane.b32.xlu1 %v6358_v10, %s5283_s30  ;;  %v6391_v20 = vsel %vm6372_vm13, %v1216_v41, 0 }
  0xbd   : > { %v1747_v14 = vsel %vm7892_vm3, %v1715_v16, %v1685_v1  ;;  %vm7893_vm8 = vmmov %vm7892_vm3  ;;  %v7896_v22 = vshrl.u32 %v5464_v33, 16  ;;  %v7897_v31 = vshll.u32 %v5476_v37, 16  ;;  %v1657_v21 = vpop.permute.xlu1 %1656  ;;  %v1655_v16 = vpop.permute.xlu0 %1654  ;;  %v4467_v1 = vcombine.low %v5470_v36, %v1368_v23 }
  0xbe   : > { %v1745_v15 = vsel %vm7893_vm8, %v1713_v18, %v1683_v61  ;;  %vm7895_vm6 = vmmov %vm7894_vm0  ;;  %vm6398_vm8 = vcmp.ne.s16.totalorder %v4466_v53, 0  ;;  %v7899_v18 = vmov 0  ;;  %v1370_v61 = vsel %vm1338_vm5, 65537, %v7738_v62 }
  0xbf   : > { %4823 = vmatprep.mubr.msk.bf16.mxu0 %vm7894_vm0, %v1745_v15  ;;  %v1220_v8 = vor.u32 %v1218_v12, %v7896_v22  ;;  %v1221_v2 = vrot.slane %v7897_v31, 1  ;;  %vm7898_vm0 = vsmask.f32 7424  ;;  %v7900_v18 = vsel %vm6398_vm8, 4294967295, %v7899_v18  ;;  %2293 = vrot.lane.b32.xlu0 %v6391_v20, %s5283_s30 }
  0xc0   : > { %4824 = vmatmul.mubr.msk.bf16.gmra.mrb[24].mxu0 %vm7895_vm6, %v1747_v14  ;;  %v1219_v19 = vsel %vm7898_vm0, %v1217_v46, %v1218_v12  ;;  %vm1240_vm10 = vcmask 1047552   ;;  %2263 = vrot.lane.b32.xlu1 %v6391_v20, %s5284_s6  ;;  %vm7901_vm9 = vmmov %vm7898_vm0  ;;  %v7902_v12 = vshrl.u32 %v5476_v37, 16  ;;  %vm7903_vm3 = vcmask 261120  }
  0xc1   : > { %v6410_v41 = vsel %vm6398_vm8, %v1219_v19, 0  ;;  %v1222_v46 = vsel %vm7901_vm9, %v1220_v8, %v1221_v2  ;;  %v1719_v14 = vsel %vm7903_vm3, %v5464_v33, %v1657_v21  ;;  %vm7904_vm5 = vmmov %vm7903_vm3  ;;  %v6419_v15 = vpop.permute.xlu1 %1530  ;;  %v1687_v23 = vpop.permute.xlu0 %1686  ;;  %vm6421_vm6 = vcmp.ne.s16.totalorder %v4467_v1, 0 }
  0xc2   : > { %v1223_v53 = vor.u32 %v1221_v2, %v7902_v12  ;;  %v1717_v62 = vsel %vm7904_vm5, %v5446_v26, %v1655_v16  ;;  %v7905_v22 = vmov 0  ;;  %v4468_v31 = vcombine.low %v5470_v36, %v1370_v61 }
  0xc3   : > { %v7906_v22 = vsel %vm6421_vm6, 4294967295, %v7905_v22  ;;  %vm7907_vm0 = vcmask 523264   ;;  %vm7909_vm8 = vsmask.f32 7424  ;;  %v7910_v33 = vmov 0  ;;  %2265 = vrot.lane.b32.xlu0 %v6410_v41, %s5284_s6 }
  0xc4   : > { %v1749_v8 = vsel %vm7907_vm0, %v1717_v62, %v1687_v23  ;;  %vm7908_vm9 = vmmov %vm7907_vm0  ;;  %vm7912_vm3 = vcmask 785408   ;;  %2295 = vrot.lane.b32.xlu1 %v6410_v41, %s5283_s30  ;;  %v6442_v26 = vsel %vm6421_vm6, %v1222_v46, 0  ;;  %v7914_v16 = vmov 0  ;;  %v5220_v62 = vld [vmem:[%s7562_s1 + $0x68] sm:$0xff]  }
  0xc5   : > { %v1750_v37 = vsel %vm7908_vm9, %v1719_v14, %v6419_v15  ;;  %vm6430_vm13 = vmand %vm1240_vm10, %vm7909_vm8  ;;  %4827 = vmatprep.mubr.msk.bf16.mxu0 %vm7912_vm3, %v1749_v8  ;;  %v1470_v36 = vpop.permute.xlu1 %1469  ;;  %v1468_v2 = vpop.permute.xlu0 %1467  ;;  %vm6446_vm8 = vcmp.ne.s16.totalorder %v4468_v31, 0  ;;  %vm7916_vm10 = vcmask 261120   ;;  %v5221_v31 = vld [vmem:[%s7562_s1 + $0x70] sm:$0xff]  }
  0xc6   : > { %v7911_v33 = vsel %vm6430_vm13, 4294967295, %v7910_v33  ;;  %vm7913_vm5 = vmmov %vm7912_vm3  ;;  %v1242_v21 = vsel %vm6430_vm13, %v1223_v53, 0  ;;  %v7915_v16 = vsel %vm6446_vm8, 4294967295, %v7914_v16  ;;  %v1538_v1 = vsel %vm7916_vm10, %v5580_v40, %v1470_v36 }
  0xc7   : > { %2297 = vrot.lane.b32.xlu0 %v6442_v26, %s5283_s30  ;;  %v1450_v19 = vsel %vm6446_vm8, %v1242_v21, 0  ;;  %vm7917_vm0 = vmmov %vm7916_vm10 }
  0xc8   : > { %4828 = vmatmul.mubr.msk.bf16.gmra.mrb[28].mxu0 %vm7913_vm5, %v1750_v37  ;;  %2267 = vrot.lane.b32.xlu1 %v6442_v26, %s5284_s6  ;;  %v1535_v61 = vsel %vm7917_vm0, 0, %v1468_v2  ;;  %vm7918_vm3 = vmmov %vm7908_vm9 }
  0xc9   : > { %v1503_v46 = vpop.permute.xlu1 %1502  ;;  %v1501_v12 = vpop.permute.xlu0 %1500  ;;  %vm7919_vm8 = vmmov %vm7913_vm5 }
  0xca   : > { %v1585_v53 = vsel %vm7908_vm9, %v1538_v1, %v1503_v46  ;;  %v1583_v14 = vsel %vm7918_vm3, %v1535_v61, %v1501_v12  ;;  %vm7920_vm10 = vmmov %vm7917_vm0 }
  0xcb   : > { %2269 = vrot.lane.b32.xlu0 %v1450_v19, %s5284_s6  ;;  %4843 = vmatprep.mubr.msk.bf16.mxu0 %vm7913_vm5, %v1583_v14  ;;  %vm7921_vm9 = vmmov %vm7918_vm3 }
  0xcc   : > { %2299 = vrot.lane.b32.xlu1 %v1450_v19, %s5283_s30  ;;  %v5222_v19 = vld [vmem:[%s7562_s1 + $0x78] sm:$0xff]   ;;  %vm7931_vm13 = vmmov %vm7917_vm0 }
  0xcd   : > { %v1474_v40 = vpop.permute.xlu1 %1473  ;;  %v1472_v23 = vpop.permute.xlu0 %1471 }
  0xce   : > { %v1544_v8 = vsel %vm7920_vm10, %v5612_v56, %v1474_v40  ;;  %v1541_v37 = vsel %vm7917_vm0, %v5576_v38, %v1472_v23  ;;  %v5223_v38 = vld [vmem:[%s7562_s1 + $0x80] sm:$0xff]   ;;  %vm7925_vm10 = vmmov %vm7917_vm0  ;;  %v5224_v40 = vld [vmem:[%s7562_s1 + $0x88] sm:$0xff]  }
  0xd0   : > { %4844 = vmatmul.mubr.msk.bf16.vlgmr.msra.gmra.mrb[0].mxu0 %vm7919_vm8, %v1585_v53  ;;  %vm7922_vm8 = vmmov %vm7918_vm3 }
  0xd1   : > { %4876 = vmatpush3.bf16.msra.mxu0 %v6160_v48  ;;  %v1507_v36 = vpop.permute.xlu1 %1506  ;;  %v1505_v2 = vpop.permute.xlu0 %1504  ;;  %vm7923_vm3 = vmmov %vm7913_vm5 }
  0xd2   : > { %4877 = vmatprep.subr.bf16.mxu0 %v5220_v62  ;;  %v1589_v21 = vsel %vm7921_vm9, %v1544_v8, %v1507_v36  ;;  %v1587_v48 = vsel %vm7922_vm8, %v1541_v37, %v1505_v2  ;;  %vm7924_vm5 = vmmov %vm7923_vm3 }
  0xd3   : > { %4847 = vmatprep.mubr.msk.bf16.mxu0 %vm7923_vm3, %v1587_v48  ;;  %vm7926_vm9 = vmmov %vm7922_vm8 }
  0xd5   : > { %4878 = vmatpush3.bf16.msra.mxu0 %v5220_v62  ;;  %v1478_v56 = vpop.permute.xlu1 %1477  ;;  %v1476_v1 = vpop.permute.xlu0 %1475 }
  0xd6   : > { %4879 = vmatprep.subr.bf16.mxu0 %v5221_v31  ;;  %v1550_v61 = vsel %vm7925_vm10, %v5656_v43, %v1478_v56  ;;  %v1547_v46 = vsel %vm7917_vm0, %v5619_v0, %v1476_v1  ;;  %vm7928_vm10 = vmmov %vm7917_vm0 }
  0xd8   : > { %4848 = vmatmul.mubr.msk.bf16.gmra.mrb[4].mxu0 %vm7924_vm5, %v1589_v21  ;;  %vm7927_vm5 = vmmov %vm7923_vm3 }
  0xd9   : > { %4880 = vmatpush3.bf16.msra.mxu0 %v5221_v31  ;;  %v1511_v12 = vpop.permute.xlu1 %1510  ;;  %v1509_v53 = vpop.permute.xlu0 %1508 }
  0xda   : > { %4881 = vmatprep.subr.bf16.mxu0 %v5222_v19  ;;  %v1593_v14 = vsel %vm7926_vm9, %v1550_v61, %v1511_v12  ;;  %v1591_v62 = vsel %vm7922_vm8, %v1547_v46, %v1509_v53  ;;  %vm7929_vm9 = vmmov %vm7922_vm8 }
  0xdb   : > { %4851 = vmatprep.mubr.msk.bf16.mxu0 %vm7923_vm3, %v1591_v62 }
  0xdd   : > { %4882 = vmatpush3.bf16.msra.mxu0 %v5222_v19  ;;  %v1482_v43 = vpop.permute.xlu1 %1481  ;;  %v1480_v23 = vpop.permute.xlu0 %1479 }
  0xde   : > { %4883 = vmatprep.subr.bf16.mxu0 %v5223_v38  ;;  %v1556_v0 = vsel %vm7928_vm10, %v5719_v17, %v1482_v43  ;;  %v1553_v31 = vsel %vm7917_vm0, %v5682_v24, %v1480_v23  ;;  %vm7932_vm10 = vmmov %vm7917_vm0 }
  0xdf   : > { %vm7933_vm0 = vmmov %vm7922_vm8 }
  0xe0   : > { %4852 = vmatmul.mubr.msk.bf16.gmra.mrb[8].mxu0 %vm7927_vm5, %v1593_v14  ;;  %vm7930_vm5 = vmmov %vm7923_vm3 }
  0xe1   : > { %4884 = vmatpush3.bf16.msra.mxu0 %v5223_v38  ;;  %v1515_v8 = vpop.permute.xlu1 %1514  ;;  %v1513_v37 = vpop.permute.xlu0 %1512  ;;  %vm7934_vm6 = vmmov %vm7933_vm0 }
  0xe2   : > { %4885 = vmatprep.subr.bf16.mxu0 %v5224_v40  ;;  %v1597_v36 = vsel %vm7929_vm9, %v1556_v0, %v1515_v8  ;;  %v1595_v2 = vsel %vm7922_vm8, %v1553_v31, %v1513_v37  ;;  %vm7935_vm9 = vmmov %vm7923_vm3 }
  0xe3   : > { %4855 = vmatprep.mubr.msk.bf16.mxu0 %vm7923_vm3, %v1595_v2  ;;  %vm7936_vm8 = vmmov %vm7923_vm3 }
  0xe4   : > { %vm7937_vm3 = vmmov %vm7932_vm10 }
  0xe5   : > { %4886 = vmatpush3.bf16.msra.mxu0 %v5224_v40  ;;  %v1486_v21 = vpop.permute.xlu1 %1485  ;;  %v1484_v48 = vpop.permute.xlu0 %1483 }
  0xe6   : > { %v1562_v19 = vsel %vm7931_vm13, %v5782_v42, %v1486_v21  ;;  %v1559_v17 = vsel %vm7932_vm10, %v5750_v57, %v1484_v48  ;;  %vm7938_vm13 = vmmov %vm7937_vm3 }
  0xe7   : > { %vm7940_vm10 = vmmov %vm7933_vm0 }
  0xe8   : > { %4856 = vmatmul.mubr.msk.bf16.gmra.mrb[12].mxu0 %vm7930_vm5, %v1597_v36  ;;  %vm7939_vm5 = vmmov %vm7933_vm0 }
  0xe9   : > { %v1519_v24 = vpop.permute.xlu1 %1518  ;;  %v1517_v56 = vpop.permute.xlu0 %1516 }
  0xea   : > { %v1601_v1 = vsel %vm7933_vm0, %v1562_v19, %v1519_v24  ;;  %v1599_v38 = vsel %vm7934_vm6, %v1559_v17, %v1517_v56  ;;  %vm7941_vm0 = vmmov %vm7936_vm8 }
  0xeb   : > { %4859 = vmatprep.mubr.msk.bf16.mxu0 %vm7935_vm9, %v1599_v38  ;;  %vm7942_vm6 = vmmov %vm7941_vm0 }
  0xec   : > { %vm7943_vm9 = vmmov %vm7937_vm3 }
  0xed   : > { %v1490_v61 = vpop.permute.xlu1 %1489  ;;  %v1488_v46 = vpop.permute.xlu0 %1487 }
  0xee   : > { %v1568_v12 = vsel %vm7937_vm3, %v5822_v30, %v1490_v61  ;;  %v1565_v42 = vsel %vm7938_vm13, %v5812_v28, %v1488_v46 }
  0xf0   : > { %4860 = vmatmul.mubr.msk.bf16.gmra.mrb[16].mxu0 %vm7936_vm8, %v1601_v1  ;;  %vm7944_vm8 = vmmov %vm7937_vm3 }
  0xf1   : > { %v1523_v53 = vpop.permute.xlu1 %1522  ;;  %v1521_v57 = vpop.permute.xlu0 %1520  ;;  %vm7945_vm3 = vmmov %vm7939_vm5 }
  0xf2   : > { %v1605_v14 = vsel %vm7939_vm5, %v1568_v12, %v1523_v53  ;;  %v1603_v62 = vsel %vm7940_vm10, %v1565_v42, %v1521_v57  ;;  %vm7946_vm13 = vmmov %vm7945_vm3 }
  0xf3   : > { %4863 = vmatprep.mubr.msk.bf16.mxu0 %vm7941_vm0, %v1603_v62  ;;  %vm7947_vm5 = vmmov %vm7941_vm0 }
  0xf4   : > { %vm7948_vm10 = vmmov %vm7941_vm0 }
  0xf5   : > { %v1494_v40 = vpop.permute.xlu1 %1493  ;;  %v1492_v43 = vpop.permute.xlu0 %1491  ;;  %vm7949_vm0 = vmmov %vm7944_vm8 }
  0xf6   : > { %v1574_v23 = vsel %vm7943_vm9, %v5884_v52, %v1494_v40  ;;  %v1571_v30 = vsel %vm7944_vm8, %v5850_v25, %v1492_v43  ;;  %vm7951_vm9 = vmmov %vm7945_vm3 }
  0xf7   : > { %vm7952_vm8 = vmmov %vm7947_vm5 }
  0xf8   : > { %4864 = vmatmul.mubr.msk.bf16.gmra.mrb[20].mxu0 %vm7942_vm6, %v1605_v14  ;;  %vm7950_vm6 = vmmov %vm7949_vm0 }
  0xf9   : > { %v1527_v0 = vpop.permute.xlu1 %1526  ;;  %v1525_v28 = vpop.permute.xlu0 %1524 }
  0xfa   : > { %v1609_v31 = vsel %vm7945_vm3, %v1574_v23, %v1527_v0  ;;  %v1607_v8 = vsel %vm7946_vm13, %v1571_v30, %v1525_v28  ;;  %vm7953_vm13 = vmmov %vm7949_vm0 }
  0xfb   : > { %4867 = vmatprep.mubr.msk.bf16.mxu0 %vm7947_vm5, %v1607_v8 }
  0xfd   : > { %v1498_v37 = vpop.permute.xlu1 %1497  ;;  %v1496_v36 = vpop.permute.xlu0 %1495 }
  0xfe   : > { %v1580_v2 = vsel %vm7949_vm0, %v5946_v51, %v1498_v37  ;;  %v1577_v52 = vsel %vm7950_vm6, %v5917_v29, %v1496_v36  ;;  %vm7955_vm0 = vmmov %vm7947_vm5 }
  0xff   : > { %v1613_v19 = vsel %vm7945_vm3, %v1580_v2, %v6419_v15 }
 0x100   : > { %4868 = vmatmul.mubr.msk.bf16.gmra.mrb[24].mxu0 %vm7948_vm10, %v1609_v31  ;;  %vm7954_vm10 = vmmov %vm7945_vm3 }
 0x101   : > { %v1529_v21 = vpop.permute.xlu0 %1528  ;;  %v2240_v25 = vpop.permute.xlu1 %2239 }
 0x102   : > { %v1611_v48 = vsel %vm7951_vm9, %v1577_v52, %v1529_v21  ;;  %v2302_v17 = vsel %vm7953_vm13, 0, %v2240_v25  ;;  %vm7956_vm9 = vmmov %vm7945_vm3 }
 0x103   : > { %4871 = vmatprep.mubr.msk.bf16.mxu0 %vm7952_vm8, %v1611_v48  ;;  %vm7957_vm8 = vmmov %vm7950_vm6 }
 0x104   : > { %vm7958_vm3 = vmmov %vm7955_vm0 }
 0x105   : > { %v2242_v24 = vpop.permute.xlu0 %2241  ;;  %vm7959_vm13 = vmmov %vm7956_vm9 }
 0x106   : > { %v2272_v56 = vpop.permute.xlu1 %2271  ;;  %v2305_v29 = vsel %vm7950_vm6, %v6007_v3, %v2242_v24 }
 0x107   : > { %v2349_v51 = vsel %vm7954_vm10, %v2302_v17, %v2272_v56  ;;  %vm7961_vm10 = vmmov %vm7950_vm6 }
 0x108   : > { %4872 = vmatmul.mubr.msk.bf16.gmra.mrb[28].mxu0 %vm7947_vm5, %v1613_v19  ;;  %vm7960_vm5 = vmmov %vm7955_vm0 }
 0x109   : > { %4887 = vmatprep.mubr.msk.bf16.mxu0 %vm7955_vm0, %v2349_v51  ;;  %v2274_v1 = vpop.permute.xlu0 %2273  ;;  %vm7962_vm0 = vmmov %vm7956_vm9 }
 0x10a   : > { %v2351_v38 = vsel %vm7956_vm9, %v2305_v29, %v2274_v1  ;;  %v2244_v61 = vpop.permute.xlu1 %2243  ;;  %vm7963_vm9 = vmmov %vm7958_vm3 }
 0x10b   : > { %v2308_v46 = vsel %vm7957_vm8, %v6038_v54, %v2244_v61  ;;  %vm7964_vm8 = vmmov %vm7962_vm0 }
 0x10d   : > { %v2246_v12 = vpop.permute.xlu0 %2245 }
 0x10e   : > { %v2276_v42 = vpop.permute.xlu1 %2275  ;;  %v2311_v57 = vsel %vm7961_vm10, %v6075_v47, %v2246_v12  ;;  %vm7967_vm10 = vmmov %vm7950_vm6 }
 0x10f   : > { %v2353_v53 = vsel %vm7959_vm13, %v2308_v46, %v2276_v42  ;;  %vm7965_vm13 = vmmov %vm7950_vm6 }
 0x110   : > { %4888 = vmatmul.mubr.msk.bf16.vlgmr.msra.gmra.mrb[0].mxu0 %vm7958_vm3, %v2351_v38 }
 0x111   : > { %4891 = vmatprep.mubr.msk.bf16.mxu0 %vm7960_vm5, %v2353_v53  ;;  %v2278_v14 = vpop.permute.xlu0 %2277  ;;  %vm7966_vm5 = vmmov %vm7962_vm0 }
 0x112   : > { %v2355_v3 = vsel %vm7962_vm0, %v2311_v57, %v2278_v14  ;;  %v2248_v62 = vpop.permute.xlu1 %2247  ;;  %vm7968_vm0 = vmmov %vm7958_vm3 }
 0x113   : > { %v2314_v40 = vsel %vm7950_vm6, %v6106_v58, %v2248_v62  ;;  %vm7969_vm6 = vmmov %vm7966_vm5 }
 0x115   : > { %v2250_v54 = vpop.permute.xlu0 %2249 }
 0x116   : > { %v2280_v43 = vpop.permute.xlu1 %2279  ;;  %v2317_v30 = vsel %vm7965_vm13, %v6143_v44, %v2250_v54 }
 0x117   : > { %v2357_v23 = vsel %vm7964_vm8, %v2314_v40, %v2280_v43  ;;  %vm7971_vm8 = vmmov %vm7967_vm10  ;;  %v5226_v43 = vld [vmem:[%s7564_s3 + $0x38] sm:$0xff]  }
 0x118   : > { %4892 = vmatmul.mubr.msk.bf16.gmra.mrb[4].mxu0 %vm7963_vm9, %v2355_v3  ;;  %vm7970_vm9 = vmmov %vm7968_vm0 }
 0x119   : > { %4895 = vmatprep.mubr.msk.bf16.mxu0 %vm7958_vm3, %v2357_v23  ;;  %v2282_v0 = vpop.permute.xlu0 %2281  ;;  %vm7972_vm3 = vmmov %vm7966_vm5  ;;  %v5228_v23 = vld [vmem:[%s7564_s3 + $0x48] sm:$0xff]  }
 0x11a   : > { %v2359_v47 = vsel %vm7966_vm5, %v2317_v30, %v2282_v0  ;;  %v2252_v28 = vpop.permute.xlu1 %2251  ;;  %vm7973_vm13 = vmmov %vm7971_vm8  ;;  %v5229_v30 = vld [vmem:[%s7564_s3 + $0x50] sm:$0xff]   ;;  %v6620_v0 = vld [vmem:[%s7563_s2] ss:$0 sm:$0xff] }
 0x11b   : > { %v2320_v31 = vsel %vm7967_vm10, %v6176_v59, %v2252_v28  ;;  %vm7974_vm5 = vmmov %vm7968_vm0  ;;  %v5230_v28 = vld [vmem:[%s7564_s3 + $0x58] sm:$0xff]  }
 0x11c   : > { %vm7975_vm10 = vmmov %vm7972_vm3 }
 0x11d   : > { %v2254_v58 = vpop.permute.xlu0 %2253 }
 0x11e   : > { %v2284_v8 = vpop.permute.xlu1 %2283  ;;  %v2323_v36 = vsel %vm7971_vm8, %v6211_v6, %v2254_v58 }
 0x11f   : > { %v2361_v37 = vsel %vm7969_vm6, %v2320_v31, %v2284_v8  ;;  %vm7976_vm6 = vmmov %vm7971_vm8 }
 0x120   : > { %4896 = vmatmul.mubr.msk.bf16.gmra.mrb[8].mxu0 %vm7968_vm0, %v2359_v47  ;;  %vm7978_vm8 = vmmov %vm7976_vm6 }
 0x121   : > { %4899 = vmatprep.mubr.msk.bf16.mxu0 %vm7970_vm9, %v2361_v37  ;;  %v2286_v2 = vpop.permute.xlu0 %2285  ;;  %vm7977_vm9 = vmmov %vm7972_vm3 }
 0x122   : > { %v2363_v44 = vsel %vm7972_vm3, %v2323_v36, %v2286_v2  ;;  %v2256_v52 = vpop.permute.xlu1 %2255  ;;  %vm7979_vm3 = vmmov %vm7968_vm0 }
 0x123   : > { %v2326_v21 = vsel %vm7973_vm13, %v6239_v39, %v2256_v52  ;;  %vm7980_vm13 = vmmov %vm7977_vm9 }
 0x125   : > { %v2258_v59 = vpop.permute.xlu0 %2257 }
 0x126   : > { %v2288_v25 = vpop.permute.xlu1 %2287  ;;  %v2329_v19 = vsel %vm7976_vm6, %v6273_v11, %v2258_v59  ;;  %v6632_v59 = vld [vmem:[%s7564_s3] sm:$0xff]  }
 0x127   : > { %v2365_v48 = vsel %vm7975_vm10, %v2326_v21, %v2288_v25  ;;  %vm7982_vm10 = vmmov %vm7976_vm6 }
 0x128   : > { %4900 = vmatmul.mubr.msk.bf16.gmra.mrb[12].mxu0 %vm7974_vm5, %v2363_v44  ;;  %vm7981_vm5 = vmmov %vm7968_vm0 }
 0x129   : > { %4903 = vmatprep.mubr.msk.bf16.mxu0 %vm7968_vm0, %v2365_v48  ;;  %v2290_v17 = vpop.permute.xlu0 %2289  ;;  %vm7983_vm0 = vmmov %vm7977_vm9 }
 0x12a   : > { %v2367_v6 = vsel %vm7977_vm9, %v2329_v19, %v2290_v17  ;;  %v2260_v24 = vpop.permute.xlu1 %2259  ;;  %vm7984_vm9 = vmmov %vm7979_vm3 }
 0x12b   : > { %v2332_v56 = vsel %vm7978_vm8, %v6301_v55, %v2260_v24  ;;  %vm7985_vm8 = vmmov %vm7983_vm0 }
 0x12d   : > { %v2262_v39 = vpop.permute.xlu0 %2261 }
 0x12e   : > { %v2292_v51 = vpop.permute.xlu1 %2291  ;;  %v2335_v1 = vsel %vm7982_vm10, %v6335_v35, %v2262_v39  ;;  %vm7988_vm10 = vmmov %vm7976_vm6 }
 0x12f   : > { %v2369_v29 = vsel %vm7980_vm13, %v2332_v56, %v2292_v51  ;;  %vm7986_vm13 = vmmov %vm7976_vm6 }
 0x130   : > { %4904 = vmatmul.mubr.msk.bf16.gmra.mrb[16].mxu0 %vm7979_vm3, %v2367_v6 }
 0x131   : > { %4907 = vmatprep.mubr.msk.bf16.mxu0 %vm7981_vm5, %v2369_v29  ;;  %v2294_v38 = vpop.permute.xlu0 %2293  ;;  %vm7987_vm5 = vmmov %vm7983_vm0 }
 0x132   : > { %v2371_v11 = vsel %vm7983_vm0, %v2335_v1, %v2294_v38  ;;  %v2264_v61 = vpop.permute.xlu1 %2263  ;;  %vm7989_vm0 = vmmov %vm7979_vm3 }
 0x133   : > { %v2338_v46 = vsel %vm7976_vm6, %v6358_v10, %v2264_v61  ;;  %vm7990_vm6 = vmmov %vm7987_vm5 }
 0x135   : > { %v2266_v55 = vpop.permute.xlu0 %2265 }
 0x136   : > { %v2296_v12 = vpop.permute.xlu1 %2295  ;;  %v2341_v53 = vsel %vm7986_vm13, %v6391_v20, %v2266_v55  ;;  %vm7994_vm13 = vmmov %vm7989_vm0 }
 0x137   : > { %v2373_v42 = vsel %vm7985_vm8, %v2338_v46, %v2296_v12  ;;  %vm7992_vm8 = vmmov %vm7989_vm0 }
 0x138   : > { %4908 = vmatmul.mubr.msk.bf16.gmra.mrb[20].mxu0 %vm7984_vm9, %v2371_v11  ;;  %vm7991_vm9 = vmmov %vm7988_vm10 }
 0x139   : > { %4911 = vmatprep.mubr.msk.bf16.mxu0 %vm7979_vm3, %v2373_v42  ;;  %v2298_v57 = vpop.permute.xlu0 %2297  ;;  %vm7993_vm3 = vmmov %vm7987_vm5 }
 0x13a   : > { %v2375_v35 = vsel %vm7987_vm5, %v2341_v53, %v2298_v57  ;;  %v2268_v14 = vpop.permute.xlu1 %2267  ;;  %vm7995_vm5 = vsmask.f32 256 }
 0x13b   : > { %v2344_v3 = vsel %vm7988_vm10, %v6410_v41, %v2268_v14  ;;  %v5225_v41 = vld [vmem:[%s7564_s3 + $0x30] sm:$0xff]   ;;  %vm7997_vm10 = vmmov %vm7995_vm5 }
 0x13c   : > { %4919 = vmatprep.subr.bf16.mxu1 %v5225_v41 }
 0x13d   : > { %v2270_v10 = vpop.permute.xlu0 %2269  ;;  %4920 = vmatpush3.bf16.msra.mxu1 %v5225_v41 }
 0x13e   : > { %v2300_v62 = vpop.permute.xlu1 %2299  ;;  %v2347_v54 = vsel %vm7991_vm9, %v6442_v26, %v2270_v10  ;;  %4921 = vmatprep.subr.bf16.mxu1 %v5226_v43  ;;  %v5227_v26 = vld [vmem:[%s7564_s3 + $0x40] sm:$0xff]  }
 0x13f   : > { %v2377_v40 = vsel %vm7990_vm6, %v2344_v3, %v2300_v62  ;;  %v2378_v20 = vsel %vm7993_vm3, %v2347_v54, %v6419_v15 }
 0x140   : > { %4912 = vmatmul.mubr.msk.bf16.gmra.mrb[24].mxu0 %vm7989_vm0, %v2375_v35 }
 0x141   : > { %4915 = vmatprep.mubr.msk.bf16.mxu0 %vm7992_vm8, %v2377_v40  ;;  %4922 = vmatpush3.bf16.msra.mxu1 %v5226_v43 }
 0x142   : > { %4923 = vmatprep.subr.bf16.mxu1 %v5227_v26 }
 0x145   : > { %4924 = vmatpush3.bf16.msra.mxu1 %v5227_v26 }
 0x146   : > { %4925 = vmatprep.subr.bf16.mxu1 %v5228_v23 }
 0x148   : > { %4916 = vmatmul.mubr.msk.bf16.gmra.mrb[28].mxu0 %vm7994_vm13, %v2378_v20 }
 0x149   : > { %4926 = vmatpush3.bf16.msra.mxu1 %v5228_v23 }
 0x14a   : > { %4927 = vmatprep.subr.bf16.mxu1 %v5229_v30 }
 0x14d   : > { %4928 = vmatpush3.bf16.msra.mxu1 %v5229_v30 }
 0x14e   : > { %4929 = vmatprep.subr.bf16.mxu1 %v5230_v28 }
 0x151   : > { %4930 = vmatpush3.bf16.msra.mxu1 %v5230_v28 }
 0x152   : > { %4963 = vmatprep.subr.bf16.mxu1 %v6632_v59 }
 0x1e3   : > { %v4889_v47 = vpop.f32.mrb[0].mxu0 }
 0x1e4   : > { %v2662_v31 = vadd.f32 %v4889_v47, %v6620_v0  ;;  %v2494_v58 = vpop.f32.mrb[1].mxu0 }
 0x1e5   : > { %v2660_v8 = vadd.f32 %v6620_v0, %v2494_v58  ;;  %v4890_v37 = vpop.f32.mrb[2].mxu0 }
 0x1e6   : > { %v2663_v36 = vadd.f32 %v4890_v37, %v6620_v0  ;;  %v2497_v2 = vpop.f32.mrb[3].mxu0  ;;  %v2694_v52 = vmax.f32 %v2662_v31, 0.0 }
 0x1e7   : > { %v2661_v44 = vadd.f32 %v6620_v0, %v2497_v2  ;;  %v2692_v25 = vmax.f32 %v2660_v8, 0.0 }
 0x1e8   : > { %v2695_v21 = vmax.f32 %v2663_v36, 0.0 }
 0x1e9   : > { %v2693_v48 = vmax.f32 %v2661_v44, 0.0 }
 0x1ea   : > { %v6634_v19 = vpack.c.bf16 %v2695_v21, %v2694_v52 }
 0x1eb   : > { %v6637_v17 = vpack.c.bf16 %v2693_v48, %v2692_v25  ;;  %v4893_v6 = vpop.f32.mrb[4].mxu0 }
 0x1ec   : > { %v2666_v24 = vadd.f32 %v4893_v6, %v6620_v0  ;;  %3166 = vrot.lane.b32.xlu1 %v6634_v19, %s5284_s6  ;;  %v2510_v56 = vpop.f32.mrb[5].mxu0 }
 0x1ed   : > { %v2664_v39 = vadd.f32 %v6620_v0, %v2510_v56  ;;  %3164 = vrot.lane.b32.xlu0 %v6637_v17, %s5284_s6  ;;  %v4894_v51 = vpop.f32.mrb[6].mxu0 }
 0x1ee   : > { %v2667_v29 = vadd.f32 %v4894_v51, %v6620_v0  ;;  %v2513_v1 = vpop.f32.mrb[7].mxu0  ;;  %v2698_v11 = vmax.f32 %v2666_v24, 0.0 }
 0x1ef   : > { %v2665_v38 = vadd.f32 %v6620_v0, %v2513_v1  ;;  %v2696_v46 = vmax.f32 %v2664_v39, 0.0 }
 0x1f0   : > { %v2699_v61 = vmax.f32 %v2667_v29, 0.0 }
 0x1f1   : > { %v2697_v55 = vmax.f32 %v2665_v38, 0.0  ;;  %3196 = vrot.lane.b32.xlu0 %v6634_v19, %s5283_s30 }
 0x1f2   : > { %v6649_v12 = vpack.c.bf16 %v2699_v61, %v2698_v11 }
 0x1f3   : > { %v6651_v42 = vpack.c.bf16 %v2697_v55, %v2696_v46  ;;  %v4897_v53 = vpop.f32.mrb[8].mxu0 }
 0x1f4   : > { %v2670_v57 = vadd.f32 %v4897_v53, %v6620_v0  ;;  %v2526_v35 = vpop.f32.mrb[9].mxu0 }
 0x1f5   : > { %v2668_v14 = vadd.f32 %v6620_v0, %v2526_v35  ;;  %3168 = vrot.lane.b32.xlu0 %v6651_v42, %s5284_s6  ;;  %3198 = vrot.lane.b32.xlu1 %v6651_v42, %s5283_s30  ;;  %v4898_v3 = vpop.f32.mrb[10].mxu0 }
 0x1f6   : > { %v2671_v10 = vadd.f32 %v4898_v3, %v6620_v0  ;;  %v2529_v62 = vpop.f32.mrb[11].mxu0  ;;  %v2702_v54 = vmax.f32 %v2670_v57, 0.0 }
 0x1f7   : > { %v2669_v40 = vadd.f32 %v6620_v0, %v2529_v62  ;;  %v2700_v41 = vmax.f32 %v2668_v14, 0.0 }
 0x1f8   : > { %v2703_v20 = vmax.f32 %v2671_v10, 0.0 }
 0x1f9   : > { %v2701_v43 = vmax.f32 %v2669_v40, 0.0  ;;  %3200 = vrot.lane.b32.xlu0 %v6649_v12, %s5283_s30  ;;  %3170 = vrot.lane.b32.xlu1 %v6649_v12, %s5284_s6 }
 0x1fa   : > { %v6665_v26 = vpack.c.bf16 %v2703_v20, %v2702_v54 }
 0x1fb   : > { %v6667_v23 = vpack.c.bf16 %v2701_v43, %v2700_v41  ;;  %v4901_v30 = vpop.f32.mrb[12].mxu0 }
 0x1fc   : > { %v2674_v47 = vadd.f32 %v4901_v30, %v6620_v0  ;;  %v2542_v28 = vpop.f32.mrb[13].mxu0  ;;  %v7650_v45 = vshll.u32 %v6665_v26, 16 }
 0x1fd   : > { %v2672_v31 = vadd.f32 %v6620_v0, %v2542_v28  ;;  %3172 = vrot.lane.b32.xlu0 %v6667_v23, %s5284_s6  ;;  %3202 = vrot.lane.b32.xlu1 %v6667_v23, %s5283_s30  ;;  %v4902_v58 = vpop.f32.mrb[14].mxu0  ;;  %v7659_v9 = vshll.u32 %v6667_v23, 16 }
 0x1fe   : > { %v2675_v8 = vadd.f32 %v4902_v58, %v6620_v0  ;;  %v2545_v37 = vpop.f32.mrb[15].mxu0  ;;  %v2706_v2 = vmax.f32 %v2674_v47, 0.0 }
 0x1ff   : > { %v2673_v36 = vadd.f32 %v6620_v0, %v2545_v37  ;;  %v2704_v52 = vmax.f32 %v2672_v31, 0.0 }
 0x200   : > { %v2707_v44 = vmax.f32 %v2675_v8, 0.0 }
 0x201   : > { %v2705_v21 = vmax.f32 %v2673_v36, 0.0  ;;  %3204 = vrot.lane.b32.xlu0 %v6665_v26, %s5283_s30  ;;  %3174 = vrot.lane.b32.xlu1 %v6665_v26, %s5284_s6 }
 0x202   : > { %v6681_v25 = vpack.c.bf16 %v2707_v44, %v2706_v2 }
 0x203   : > { %v6683_v48 = vpack.c.bf16 %v2705_v21, %v2704_v52  ;;  %v4905_v6 = vpop.f32.mrb[16].mxu0 }
 0x204   : > { %v2678_v24 = vadd.f32 %v4905_v6, %v6620_v0  ;;  %v2558_v56 = vpop.f32.mrb[17].mxu0  ;;  %v7649_v5 = vshll.u32 %v6681_v25, 16 }
 0x205   : > { %v2676_v39 = vadd.f32 %v6620_v0, %v2558_v56  ;;  %3176 = vrot.lane.b32.xlu0 %v6683_v48, %s5284_s6  ;;  %3206 = vrot.lane.b32.xlu1 %v6683_v48, %s5283_s30  ;;  %v4906_v51 = vpop.f32.mrb[18].mxu0  ;;  %v7647_v49 = vshll.u32 %v6683_v48, 16 }
 0x206   : > { %v2679_v29 = vadd.f32 %v4906_v51, %v6620_v0  ;;  %v2561_v1 = vpop.f32.mrb[19].mxu0  ;;  %v2710_v11 = vmax.f32 %v2678_v24, 0.0 }
 0x207   : > { %v2677_v38 = vadd.f32 %v6620_v0, %v2561_v1  ;;  %v2708_v46 = vmax.f32 %v2676_v39, 0.0 }
 0x208   : > { %v2711_v61 = vmax.f32 %v2679_v29, 0.0 }
 0x209   : > { %v2709_v55 = vmax.f32 %v2677_v38, 0.0  ;;  %3208 = vrot.lane.b32.xlu0 %v6681_v25, %s5283_s30  ;;  %3178 = vrot.lane.b32.xlu1 %v6681_v25, %s5284_s6 }
 0x20a   : > { %v6697_v53 = vpack.c.bf16 %v2711_v61, %v2710_v11  ;;  %v2741_v61 = vshrl.u32 %v6637_v17, 16 }
 0x20b   : > { %v6699_v57 = vpack.c.bf16 %v2709_v55, %v2708_v46  ;;  %v4909_v35 = vpop.f32.mrb[20].mxu0  ;;  %v2748_v46 = vshrl.u32 %v6634_v19, 16 }
 0x20c   : > { %v2682_v14 = vadd.f32 %v4909_v35, %v6620_v0  ;;  %v2574_v3 = vpop.f32.mrb[21].mxu0  ;;  %v7655_v32 = vshll.u32 %v6697_v53, 16 }
 0x20d   : > { %v2680_v10 = vadd.f32 %v6620_v0, %v2574_v3  ;;  %3180 = vrot.lane.b32.xlu0 %v6699_v57, %s5284_s6  ;;  %3210 = vrot.lane.b32.xlu1 %v6699_v57, %s5283_s30  ;;  %v4910_v62 = vpop.f32.mrb[22].mxu0  ;;  %v7652_v50 = vshll.u32 %v6699_v57, 16 }
 0x20e   : > { %v2683_v40 = vadd.f32 %v4910_v62, %v6620_v0  ;;  %v2577_v54 = vpop.f32.mrb[23].mxu0  ;;  %v2714_v41 = vmax.f32 %v2682_v14, 0.0 }
 0x20f   : > { %v2681_v20 = vadd.f32 %v6620_v0, %v2577_v54  ;;  %v2712_v30 = vmax.f32 %v2680_v10, 0.0  ;;  %v2743_v54 = vrot.slane %v2741_v61, 7 }
 0x210   : > { %v2715_v43 = vmax.f32 %v2683_v40, 0.0 }
 0x211   : > { %v2713_v47 = vmax.f32 %v2681_v20, 0.0  ;;  %3212 = vrot.lane.b32.xlu0 %v6697_v53, %s5283_s30  ;;  %3182 = vrot.lane.b32.xlu1 %v6697_v53, %s5284_s6  ;;  %v2750_v20 = vrot.slane %v2748_v46, 7 }
 0x212   : > { %v6713_v28 = vpack.c.bf16 %v2715_v43, %v2714_v41 }
 0x213   : > { %v6715_v31 = vpack.c.bf16 %v2713_v47, %v2712_v30  ;;  %v4913_v58 = vpop.f32.mrb[24].mxu0  ;;  %v2756_v30 = vshrl.u32 %v6651_v42, 16 }
 0x214   : > { %v2686_v8 = vadd.f32 %v4913_v58, %v6620_v0  ;;  %v2590_v37 = vpop.f32.mrb[25].mxu0  ;;  %v2744_v58 = vshll.u32 %v6637_v17, 16 }
 0x215   : > { %v2684_v36 = vadd.f32 %v6620_v0, %v2590_v37  ;;  %3184 = vrot.lane.b32.xlu0 %v6715_v31, %s5284_s6  ;;  %3214 = vrot.lane.b32.xlu1 %v6715_v31, %s5283_s30  ;;  %v4914_v2 = vpop.f32.mrb[26].mxu0 }
 0x216   : > { %v2687_v44 = vadd.f32 %v4914_v2, %v6620_v0  ;;  %v2593_v52 = vpop.f32.mrb[27].mxu0  ;;  %v2718_v6 = vmax.f32 %v2686_v8, 0.0 }
 0x217   : > { %v2685_v21 = vadd.f32 %v6620_v0, %v2593_v52  ;;  %v2716_v56 = vmax.f32 %v2684_v36, 0.0  ;;  %v2746_v36 = vor.u32 %v2744_v58, %v2743_v54  ;;  %v7656_v52 = vshrl.u32 %v6649_v12, 16 }
 0x218   : > { %v2719_v24 = vmax.f32 %v2687_v44, 0.0  ;;  %v2758_v44 = vrot.slane %v2756_v30, 7 }
 0x219   : > { %v2717_v39 = vmax.f32 %v2685_v21, 0.0  ;;  %3216 = vrot.lane.b32.xlu0 %v6713_v28, %s5283_s30  ;;  %3186 = vrot.lane.b32.xlu1 %v6713_v28, %s5284_s6 }
 0x21a   : > { %v6729_v51 = vpack.c.bf16 %v2719_v24, %v2718_v6 }
 0x21b   : > { %v6731_v29 = vpack.c.bf16 %v2717_v39, %v2716_v56  ;;  %v4917_v1 = vpop.f32.mrb[28].mxu0  ;;  %v2759_v56 = vshll.u32 %v6651_v42, 16 }
 0x21c   : > { %v2690_v38 = vadd.f32 %v4917_v1, %v6620_v0  ;;  %v2606_v11 = vpop.f32.mrb[29].mxu0 }
 0x21d   : > { %v2688_v55 = vadd.f32 %v6620_v0, %v2606_v11  ;;  %3188 = vrot.lane.b32.xlu0 %v6731_v29, %s5284_s6  ;;  %3218 = vrot.lane.b32.xlu1 %v6731_v29, %s5283_s30  ;;  %v4918_v35 = vpop.f32.mrb[30].mxu0  ;;  %v2883_v11 = vsel %vm5526_vm12, 0, %v2746_v36  ;;  %vm7996_vm12 = vsmask.f32 7424 }
 0x21e   : > { %v2691_v14 = vadd.f32 %v4918_v35, %v6620_v0  ;;  %v2609_v3 = vpop.f32.mrb[31].mxu0  ;;  %v2722_v62 = vmax.f32 %v2690_v38, 0.0  ;;  %v2761_v35 = vor.u32 %v2759_v56, %v2758_v44 }
 0x21f   : > { %v2689_v10 = vadd.f32 %v6620_v0, %v2609_v3  ;;  %v2720_v41 = vmax.f32 %v2688_v55, 0.0  ;;  %v2751_v0 = vshll.u32 %v6634_v19, 16  ;;  %v7653_v3 = vshrl.u32 %v6667_v23, 16 }
 0x220   : > { %v2723_v40 = vmax.f32 %v2691_v14, 0.0  ;;  %v2766_v14 = vrot.slane %v7656_v52, 7 }
 0x221   : > { %v2721_v43 = vmax.f32 %v2689_v10, 0.0  ;;  %3220 = vrot.lane.b32.xlu0 %v6729_v51, %s5283_s30  ;;  %3190 = vrot.lane.b32.xlu1 %v6729_v51, %s5284_s6  ;;  %v2753_v37 = vor.u32 %v2751_v0, %v2750_v20  ;;  %v7662_v10 = vshll.u32 %v6649_v12, 16  ;;  %v2774_v7 = vrot.slane %v7653_v3, 7 }
 0x222   : > { %v6752_v47 = vpack.c.bf16 %v2723_v40, %v2722_v62 }
 0x223   : > { %v6756_v8 = vpack.c.bf16 %v2721_v43, %v2720_v41  ;;  %v2754_v38 = vsel %vm7995_vm5, %v2743_v54, %v2753_v37  ;;  %v6809_v54 = vsel %vm5546_vm15, %v2883_v11, 0  ;;  %v2762_v41 = vsel %vm7997_vm10, %v2750_v20, %v2761_v35  ;;  %vm7999_vm15 = vmmov %vm7995_vm5 }
 0x224   : > { %v2863_v2 = vshll.u32 %v6752_v47, 16  ;;  %v2860_v6 = vshrl.u32 %v6752_v47, 16  ;;  %v6805_v40 = vsel %vm5542_vm14, %v2754_v38, 0  ;;  %v2769_v43 = vor.u32 %v7662_v10, %v2766_v14  ;;  %vm7998_vm14 = vmmov %vm7995_vm5  ;;  %v8015_v10 = vld [vmem:[#allocation6_spill] sm:$0xff] }
 0x225   : > { %3192 = vrot.lane.b32.xlu0 %v6756_v8, %s5284_s6  ;;  %3222 = vrot.lane.b32.xlu1 %v6756_v8, %s5283_s30  ;;  %v2855_v21 = vshll.u32 %v6756_v8, 16  ;;  %v2852_v39 = vshrl.u32 %v6756_v8, 16  ;;  %v7645_v37 = vshrl.u32 %v6665_v26, 16  ;;  %v6824_v36 = vsel %vm5584_vm2, %v2762_v41, 0  ;;  %vm8000_vm2 = vmmov %vm7995_vm5 }
 0x226   : > { %v2944_v24 = vrot.slane %v2863_v2, 1  ;;  %v2770_v20 = vsel %vm7998_vm14, %v2758_v44, %v2769_v43  ;;  %v7644_v11 = vshrl.u32 %v6683_v48, 16  ;;  %v7646_v43 = vshrl.u32 %v6681_v25, 16 }
 0x227   : > { %v6778_v1 = vrot.slane %v2855_v21, 1  ;;  %v2782_v38 = vrot.slane %v7645_v37, 7  ;;  %v6839_v35 = vsel %vm5592_vm4, %v2770_v20, 0  ;;  %v7648_v37 = vshrl.u32 %v6699_v57, 16  ;;  %vm8001_vm4 = vmmov %vm8000_vm2 }
 0x228   : > { %v6785_v55 = vor.u32 %v2944_v24, %v2860_v6  ;;  %v2790_v41 = vrot.slane %v7644_v11, 7  ;;  %v2798_v11 = vrot.slane %v7646_v43, 7  ;;  %vm8016_vm5 = vnez %v8015_v10 }
 0x229   : > { %3224 = vrot.lane.b32.xlu0 %v6752_v47, %s5283_s30  ;;  %3194 = vrot.lane.b32.xlu1 %v6752_v47, %s5284_s6  ;;  %v2943_v60 = vor.u32 %v6778_v1, %v2852_v39  ;;  %v2806_v43 = vrot.slane %v7648_v37, 7 }
 0x22b   : > { %v6801_v62 = vsel %vm7996_vm12, %v2943_v60, %v2944_v24  ;;  %v2777_v24 = vor.u32 %v7659_v9, %v2774_v7  ;;  %v2785_v60 = vor.u32 %v7650_v45, %v2782_v38 }
 0x22d   : > { %2998 = vrot.lane.b32.xlu0 %v6805_v40, %s5284_s6  ;;  %2996 = vrot.lane.b32.xlu1 %v6809_v54, %s5284_s6  ;;  %v2778_v44 = vsel %vm7999_vm15, %v2766_v14, %v2777_v24  ;;  %v2786_v14 = vsel %vm8000_vm2, %v2774_v7, %v2785_v60  ;;  %v2793_v24 = vor.u32 %v7647_v49, %v2790_v41  ;;  %v7651_v49 = vshrl.u32 %v6697_v53, 16 }
 0x22e   : > { %v6854_v20 = vsel %vm5629_vm7, %v2778_v44, 0  ;;  %v6869_v44 = vsel %vm5659_vm11, %v2786_v14, 0  ;;  %v2801_v60 = vor.u32 %v7649_v5, %v2798_v11  ;;  %vm8002_vm7 = vmmov %vm8000_vm2  ;;  %v7654_v5 = vshrl.u32 %v6715_v31, 16 }
 0x22f   : > { %v2794_v7 = vsel %vm8001_vm4, %v2782_v38, %v2793_v24  ;;  %v2809_v24 = vor.u32 %v7652_v50, %v2806_v43  ;;  %v2814_v37 = vrot.slane %v7651_v49, 7  ;;  %v7657_v50 = vshrl.u32 %v6713_v28, 16 }
 0x230   : > { %v6884_v14 = vsel %vm5688_vm1, %v2794_v7, 0  ;;  %v2802_v38 = vsel %vm8002_vm7, %v2790_v41, %v2801_v60  ;;  %v8003_v7 = vld [vmem:[#allocation2_spill] sm:$0xff]  ;;  %vm8005_vm1 = vmmov %vm8000_vm2  ;;  %v2822_v49 = vrot.slane %v7654_v5, 7 }
 0x231   : > { %3030 = vrot.lane.b32.xlu0 %v6824_v36, %s5283_s30  ;;  %3028 = vrot.lane.b32.xlu1 %v6805_v40, %s5283_s30  ;;  %vm8004_vm11 = vnez %v8003_v7  ;;  %v2810_v41 = vsel %vm8005_vm1, %v2798_v11, %v2809_v24  ;;  %v2817_v60 = vor.u32 %v7655_v32, %v2814_v37  ;;  %v7658_v7 = vshll.u32 %v6715_v31, 16  ;;  %vm8008_vm6 = vmmov %vm8005_vm1 }
 0x232   : > { %v6899_v45 = vsel %vm8004_vm11, %v2802_v38, 0  ;;  %v8006_v38 = vld [vmem:[#allocation3_spill] sm:$0xff]  ;;  %v2830_v5 = vrot.slane %v7657_v50, 7  ;;  %v7660_v32 = vshrl.u32 %v6731_v29, 16  ;;  %vm8011_vm8 = vmmov %vm8005_vm1  ;;  %vm8027_vm11 = vcmask 261120  }
 0x233   : > { %vm8007_vm0 = vnez %v8006_v38  ;;  %v2818_v11 = vsel %vm8008_vm6, %v2806_v43, %v2817_v60  ;;  %v2825_v24 = vor.u32 %v7658_v7, %v2822_v49  ;;  %v7661_v38 = vshll.u32 %v6713_v28, 16  ;;  %vm8014_vm13 = vmmov %vm8005_vm1 }
 0x234   : > { %v6914_v3 = vsel %vm8007_vm0, %v2810_v41, 0  ;;  %v8009_v41 = vld [vmem:[#allocation4_spill] sm:$0xff]  ;;  %v2838_v50 = vrot.slane %v7660_v32, 7  ;;  %v7663_v7 = vshrl.u32 %v6729_v51, 16  ;;  %vm8017_vm12 = vmmov %vm8005_vm1  ;;  %vm8029_vm0 = vcmask 785408  }
 0x235   : > { %3002 = vrot.lane.b32.xlu0 %v6839_v35, %s5284_s6  ;;  %3000 = vrot.lane.b32.xlu1 %v6824_v36, %s5284_s6  ;;  %vm8010_vm9 = vnez %v8009_v41  ;;  %v2826_v43 = vsel %vm8011_vm8, %v2814_v37, %v2825_v24  ;;  %v2833_v60 = vor.u32 %v7661_v38, %v2830_v5  ;;  %v7664_v41 = vshll.u32 %v6731_v29, 16  ;;  %vm8020_vm14 = vmmov %vm8005_vm1 }
 0x236   : > { %v6929_v52 = vsel %vm8010_vm9, %v2818_v11, 0  ;;  %v8012_v11 = vld [vmem:[#allocation5_spill] sm:$0xff]  ;;  %v2846_v32 = vrot.slane %v7663_v7, 7  ;;  %v2847_v38 = vshll.u32 %v6729_v51, 16  ;;  %v8018_v7 = vld [vmem:[#allocation7_spill] sm:$0xff]  ;;  %vm8023_vm2 = vmmov %vm8005_vm1 }
 0x237   : > { %vm8013_vm3 = vnez %v8012_v11  ;;  %v2834_v37 = vsel %vm8014_vm13, %v2822_v49, %v2833_v60  ;;  %v2841_v24 = vor.u32 %v7664_v41, %v2838_v50  ;;  %v2854_v11 = vrot.slane %v2852_v39, 7  ;;  %vm8026_vm7 = vmmov %vm8005_vm1 }
 0x238   : > { %v6944_v9 = vsel %vm8013_vm3, %v2826_v43, 0  ;;  %v6958_v43 = vsel %vm8016_vm5, %v2834_v37, 0  ;;  %v2849_v60 = vor.u32 %v2847_v38, %v2846_v32  ;;  %vm8019_vm10 = vnez %v8018_v7  ;;  %vm8033_vm8 = vmmov %vm8027_vm11 }
 0x239   : > { %3034 = vrot.lane.b32.xlu0 %v6854_v20, %s5283_s30  ;;  %3032 = vrot.lane.b32.xlu1 %v6839_v35, %s5283_s30  ;;  %v2842_v49 = vsel %vm8017_vm12, %v2830_v5, %v2841_v24  ;;  %v2857_v5 = vor.u32 %v2855_v21, %v2854_v11  ;;  %v2862_v37 = vrot.slane %v2860_v6, 7  ;;  %v8021_v24 = vld [vmem:[#allocation8_spill] sm:$0xff]  ;;  %v8024_v6 = vld [vmem:[#allocation9_spill] sm:$0xff]  ;;  %vm8028_vm1 = vcmask 523264   ;;  %vm8035_vm13 = vmmov %vm8029_vm0 }
 0x23a   : > { %v6971_v41 = vsel %vm8019_vm10, %v2842_v49, 0  ;;  %v2850_v10 = vsel %vm8020_vm14, %v2838_v50, %v2849_v60  ;;  %vm8022_vm15 = vnez %v8021_v24  ;;  %v2900_v50 = vrot.slane %v2744_v58, 1  ;;  %v8030_v24 = vld [vmem:[#allocation10_spill] sm:$0xff]  ;;  %vm8034_vm3 = vmmov %vm8028_vm1 }
 0x23b   : > { %v6984_v39 = vsel %vm8022_vm15, %v2850_v10, 0  ;;  %v2858_v7 = vsel %vm8023_vm2, %v2846_v32, %v2857_v5  ;;  %v2865_v21 = vor.u32 %v2863_v2, %v2862_v37  ;;  %vm8025_vm4 = vnez %v8024_v6  ;;  %v5232_v6 = vld [vmem:[%s7564_s3 + $0x8] sm:$0xff]   ;;  %vm8039_vm10 = vmmov %vm8033_vm8 }
 0x23c   : > { %v6997_v60 = vsel %vm8025_vm4, %v2858_v7, 0  ;;  %v2901_v32 = vor.u32 %v2900_v50, %v2741_v61  ;;  %v2902_v5 = vrot.slane %v2751_v0, 1  ;;  %vm8031_vm6 = vnez %v8030_v24  ;;  %v5233_v24 = vld [vmem:[%s7564_s3 + $0x10] sm:$0xff]   ;;  %vm8041_vm14 = vmmov %vm8028_vm1 }
 0x23d   : > { %3006 = vrot.lane.b32.xlu0 %v6869_v44, %s5284_s6  ;;  %3004 = vrot.lane.b32.xlu1 %v6854_v20, %s5284_s6  ;;  %v2866_v10 = vsel %vm8026_vm7, %v2854_v11, %v2865_v21  ;;  %v2905_v61 = vrot.slane %v2759_v56, 1  ;;  %vm8032_vm9 = vsmask.f32 7424  ;;  %v8036_v56 = vld [vmem:[#allocation11_spill] sm:$0xff]  ;;  %vm8044_vm2 = vmmov %vm8029_vm0 }
 0x23e   : > { %v2899_v11 = vsel %vm8031_vm6, %v2866_v10, 0  ;;  %v2903_v7 = vsel %vm8032_vm9, %v2901_v32, %v2902_v5  ;;  %vm8037_vm5 = vnez %v8036_v56  ;;  %vm8038_vm12 = vmmov %vm8032_vm9  ;;  %v5234_v56 = vld [vmem:[%s7564_s3 + $0x18] sm:$0xff]  }
 0x23f   : > { %v7031_v32 = vsel %vm8037_vm5, %v2903_v7, 0  ;;  %vm8045_vm4 = vmmov %vm8032_vm9 }
 0x240   : > { %vm8047_vm7 = vmmov %vm8033_vm8 }
 0x241   : > { %3038 = vrot.lane.b32.xlu0 %v6884_v14, %s5283_s30  ;;  %3036 = vrot.lane.b32.xlu1 %v6869_v44, %s5283_s30  ;;  %vm8052_vm6 = vmmov %vm8045_vm4 }
 0x242   : > { %vm8054_vm9 = vmmov %vm8047_vm7 }
 0x243   : > { %vm8060_vm5 = vmmov %vm8045_vm4 }
 0x245   : > { %3010 = vrot.lane.b32.xlu0 %v6899_v45, %s5284_s6  ;;  %3008 = vrot.lane.b32.xlu1 %v6884_v14, %s5284_s6 }
 0x249   : > { %3042 = vrot.lane.b32.xlu0 %v6914_v3, %s5283_s30  ;;  %3040 = vrot.lane.b32.xlu1 %v6899_v45, %s5283_s30 }
 0x24d   : > { %3014 = vrot.lane.b32.xlu0 %v6929_v52, %s5284_s6  ;;  %3012 = vrot.lane.b32.xlu1 %v6914_v3, %s5284_s6 }
 0x251   : > { %3046 = vrot.lane.b32.xlu0 %v6944_v9, %s5283_s30  ;;  %3044 = vrot.lane.b32.xlu1 %v6929_v52, %s5283_s30 }
 0x255   : > { %3018 = vrot.lane.b32.xlu0 %v6958_v43, %s5284_s6  ;;  %3016 = vrot.lane.b32.xlu1 %v6944_v9, %s5284_s6 }
 0x259   : > { %3050 = vrot.lane.b32.xlu0 %v6971_v41, %s5283_s30  ;;  %3048 = vrot.lane.b32.xlu1 %v6958_v43, %s5283_s30 }
 0x25d   : > { %3022 = vrot.lane.b32.xlu0 %v6984_v39, %s5284_s6  ;;  %3020 = vrot.lane.b32.xlu1 %v6971_v41, %s5284_s6 }
 0x25e   : > { %v3167_v58 = vpop.permute.xlu1 %3166 }
 0x25f   : > { %v3165_v49 = vpop.permute.xlu0 %3164  ;;  %v3229_v0 = vsel %vm8033_vm8, %v6637_v17, %v3167_v58  ;;  %v2907_v58 = vor.u32 %v2905_v61, %v2756_v30  ;;  %vm8056_vm8 = vmmov %vm8034_vm3 }
 0x260   : > { %v3227_v47 = vsel %vm8027_vm11, 0, %v3165_v49  ;;  %v2904_v49 = vor.u32 %v2902_v5, %v2748_v46  ;;  %v8040_v5 = vshll.u32 %v6649_v12, 16  ;;  %vm8049_vm11 = vmmov %vm8028_vm1 }
 0x261   : > { %3052 = vrot.lane.b32.xlu1 %v6984_v39, %s5283_s30  ;;  %3054 = vrot.lane.b32.xlu0 %v6997_v60, %s5283_s30 }
 0x262   : > { %v2906_v17 = vsel %vm8038_vm12, %v2904_v49, %v2905_v61  ;;  %v8046_v61 = vshll.u32 %v6667_v23, 16  ;;  %v8048_v49 = vshrl.u32 %v6649_v12, 16  ;;  %vm8062_vm12 = vmmov %vm8047_vm7 }
 0x263   : > { %v3197_v2 = vpop.permute.xlu0 %3196 }
 0x264   : > { %v3259_v37 = vsel %vm8028_vm1, %v3227_v47, %v3197_v2  ;;  %v2911_v7 = vrot.slane %v8046_v61, 1 }
 0x265   : > { %4931 = vmatprep.mubr.msk.bf16.mxu1 %vm8029_vm0, %v3259_v37  ;;  %3024 = vrot.lane.b32.xlu1 %v6997_v60, %s5284_s6  ;;  %v2908_v37 = vrot.slane %v8040_v5, 1 }
 0x266   : > { %3026 = vrot.lane.b32.xlu0 %v2899_v11, %s5284_s6 }
 0x267   : > { %v3169_v50 = vpop.permute.xlu0 %3168  ;;  %v3199_v21 = vpop.permute.xlu1 %3198 }
 0x268   : > { %v3261_v10 = vsel %vm8034_vm3, %v3229_v0, %v3199_v21  ;;  %v3231_v46 = vsel %vm8039_vm10, %v6634_v19, %v3169_v50  ;;  %v2909_v19 = vsel %vm8045_vm4, %v2907_v58, %v2908_v37  ;;  %v8050_v58 = vld [vmem:[#allocation13_spill] sm:$0xff]  ;;  %vm8064_vm10 = vmmov %vm8056_vm8 }
 0x269   : > { %4932 = vmatmul.mubr.msk.bf16.vlgmr.msra.gmra.mrb[0].mxu1 %vm8035_vm13, %v3261_v10  ;;  %3056 = vrot.lane.b32.xlu1 %v2899_v11, %s5283_s30  ;;  %v8042_v11 = vld [vmem:[#allocation12_spill] sm:$0xff]  ;;  %v2910_v10 = vor.u32 %v2908_v37, %v8048_v49  ;;  %vm8051_vm1 = vnez %v8050_v58  ;;  %vm8059_vm13 = vmmov %vm8029_vm0 }
 0x26a   : > { %4964 = vmatpush3.bf16.msra.mxu1 %v6632_v59  ;;  %3776 = vrot.lane.b32.xlu0 %v7031_v32, %s5284_s6  ;;  %vm8043_vm15 = vnez %v8042_v11 }
 0x26b   : > { %v3201_v47 = vpop.permute.xlu0 %3200  ;;  %v3171_v2 = vpop.permute.xlu1 %3170  ;;  %4965 = vmatprep.subr.bf16.mxu1 %v5232_v6  ;;  %v7049_v59 = vsel %vm8043_vm15, %v2906_v17, 0  ;;  %vm8067_vm15 = vmmov %vm8029_vm0 }
 0x26c   : > { %v3263_v30 = vsel %vm8041_vm14, %v3231_v46, %v3201_v47  ;;  %v3233_v0 = vsel %vm8047_vm7, %v6651_v42, %v3171_v2  ;;  %v7069_v46 = vsel %vm8051_vm1, %v2909_v19, 0  ;;  %v2912_v42 = vsel %vm8052_vm6, %v2910_v10, %v2911_v7  ;;  %v5235_v19 = vld [vmem:[%s7564_s3 + $0x20] sm:$0xff]   ;;  %vm8075_vm1 = vmmov %vm8029_vm0 }
 0x26d   : > { %4935 = vmatprep.mubr.msk.bf16.mxu1 %vm8044_vm2, %v3263_v30  ;;  %3778 = vrot.lane.b32.xlu1 %v7049_v59, %s5284_s6  ;;  %v8055_v30 = vshll.u32 %v6665_v26, 16  ;;  %vm8068_vm2 = vmmov %vm8045_vm4 }
 0x26e   : > { %3808 = vrot.lane.b32.xlu0 %v7049_v59, %s5283_s30  ;;  %4966 = vmatpush3.bf16.msra.mxu1 %v5232_v6  ;;  %v8053_v6 = vshrl.u32 %v6667_v23, 16  ;;  %vm8070_vm4 = vmmov %vm8047_vm7 }
 0x26f   : > { %v3173_v50 = vpop.permute.xlu0 %3172  ;;  %v3203_v21 = vpop.permute.xlu1 %3202  ;;  %4967 = vmatprep.subr.bf16.mxu1 %v5233_v24  ;;  %v2914_v11 = vrot.slane %v8055_v30, 1  ;;  %vm8072_vm7 = vmmov %vm8056_vm8 }
 0x270   : > { %v3265_v17 = vsel %vm8049_vm11, %v3233_v0, %v3203_v21  ;;  %v2913_v47 = vor.u32 %v2911_v7, %v8053_v6  ;;  %v3235_v2 = vsel %vm8054_vm9, %v6649_v12, %v3173_v50  ;;  %v8057_v7 = vld [vmem:[#allocation14_spill] sm:$0xff]  ;;  %vm8078_vm6 = vmmov %vm8070_vm4 }
 0x271   : > { %4936 = vmatmul.mubr.msk.bf16.gmra.mrb[4].mxu1 %vm8029_vm0, %v3265_v17  ;;  %3810 = vrot.lane.b32.xlu1 %v7069_v46, %s5283_s30  ;;  %vm8058_vm3 = vnez %v8057_v7  ;;  %v8063_v17 = vshrl.u32 %v6665_v26, 16  ;;  %vm8076_vm0 = vmmov %vm8068_vm2 }
 0x272   : > { %3780 = vrot.lane.b32.xlu0 %v7069_v46, %s5284_s6  ;;  %4968 = vmatpush3.bf16.msra.mxu1 %v5233_v24  ;;  %v7089_v0 = vsel %vm8058_vm3, %v2912_v42, 0  ;;  %v2915_v12 = vsel %vm8060_vm5, %v2913_v47, %v2914_v11  ;;  %v8061_v24 = vshll.u32 %v6683_v48, 16  ;;  %v5236_v42 = vld [vmem:[%s7564_s3 + $0x28] sm:$0xff]   ;;  %vm8080_vm9 = vmmov %vm8072_vm7 }
 0x273   : > { %v3205_v5 = vpop.permute.xlu0 %3204  ;;  %v3175_v37 = vpop.permute.xlu1 %3174  ;;  %4969 = vmatprep.subr.bf16.mxu1 %v5234_v56  ;;  %v2916_v58 = vor.u32 %v2914_v11, %v8063_v17  ;;  %v8065_v47 = vld [vmem:[#allocation15_spill] sm:$0xff]  ;;  %vm8082_vm3 = vmmov %vm8075_vm1 }
 0x274   : > { %v3267_v61 = vsel %vm8056_vm8, %v3235_v2, %v3205_v5  ;;  %v2917_v50 = vrot.slane %v8061_v24, 1  ;;  %v3237_v21 = vsel %vm8062_vm12, %v6667_v23, %v3175_v37  ;;  %vm8066_vm14 = vnez %v8065_v47  ;;  %vm8085_vm5 = vmmov %vm8070_vm4 }
 0x275   : > { %4939 = vmatprep.mubr.msk.bf16.mxu1 %vm8059_vm13, %v3267_v61  ;;  %3782 = vrot.lane.b32.xlu1 %v7089_v0, %s5284_s6  ;;  %v7109_v2 = vsel %vm8066_vm14, %v2915_v12, 0  ;;  %v8071_v61 = vshll.u32 %v6681_v25, 16  ;;  %v7126_v12 = vld [vmem:[%s7564_s3 + $0x60] sm:$0xff]   ;;  %vm8081_vm8 = vnez %v7829_v27  ;;  %vm8083_vm13 = vmmov %vm8076_vm0 }
 0x276   : > { %3812 = vrot.lane.b32.xlu0 %v7089_v0, %s5283_s30  ;;  %4970 = vmatpush3.bf16.msra.mxu1 %v5234_v56  ;;  %v2918_v23 = vsel %vm8068_vm2, %v2916_v58, %v2917_v50  ;;  %v8069_v56 = vshrl.u32 %v6683_v48, 16  ;;  %vm8087_vm12 = vmmov %vm8072_vm7 }
 0x277   : > { %v3177_v49 = vpop.permute.xlu0 %3176  ;;  %v3207_v10 = vpop.permute.xlu1 %3206  ;;  %4971 = vmatprep.subr.bf16.mxu1 %v5235_v19  ;;  %v2920_v7 = vrot.slane %v8071_v61, 1  ;;  %vm8090_vm14 = vmmov %vm8075_vm1 }
 0x278   : > { %v3269_v6 = vsel %vm8064_vm10, %v3237_v21, %v3207_v10  ;;  %v2919_v5 = vor.u32 %v2917_v50, %v8069_v56  ;;  %v3239_v37 = vsel %vm8070_vm4, %v6665_v26, %v3177_v49  ;;  %v8073_v50 = vld [vmem:[#allocation16_spill] sm:$0xff]  ;;  %vm8093_vm2 = vmmov %vm8070_vm4 }
 0x279   : > { %4940 = vmatmul.mubr.msk.bf16.gmra.mrb[8].mxu1 %vm8067_vm15, %v3269_v6  ;;  %3814 = vrot.lane.b32.xlu1 %v7109_v2, %s5283_s30  ;;  %vm8074_vm11 = vnez %v8073_v50  ;;  %v8079_v6 = vshrl.u32 %v6681_v25, 16  ;;  %vm8091_vm15 = vmmov %vm8076_vm0 }
 0x27a   : > { %3784 = vrot.lane.b32.xlu0 %v7109_v2, %s5284_s6  ;;  %4972 = vmatpush3.bf16.msra.mxu1 %v5235_v19  ;;  %v7131_v21 = vsel %vm8074_vm11, %v2918_v23, 0  ;;  %v2921_v26 = vsel %vm8076_vm0, %v2919_v5, %v2920_v7  ;;  %v8077_v19 = vshll.u32 %v6699_v57, 16  ;;  %vm8095_vm4 = vmmov %vm8072_vm7 }
 0x27b   : > { %v3209_v30 = vpop.permute.xlu0 %3208  ;;  %v3179_v11 = vpop.permute.xlu1 %3178  ;;  %4973 = vmatprep.subr.bf16.mxu1 %v5236_v42  ;;  %v2922_v47 = vor.u32 %v2920_v7, %v8079_v6  ;;  %v7149_v56 = vsel %vm8081_vm8, %v2921_v26, 0  ;;  %vm8098_vm11 = vmmov %vm8075_vm1 }
 0x27c   : > { %v3271_v24 = vsel %vm8072_vm7, %v3239_v37, %v3209_v30  ;;  %v2923_v49 = vrot.slane %v8077_v19, 1  ;;  %v3241_v10 = vsel %vm8078_vm6, %v6683_v48, %v3179_v11  ;;  %v8086_v11 = vshll.u32 %v6697_v53, 16  ;;  %vm8103_vm6 = vmmov %vm8095_vm4 }
 0x27d   : > { %4943 = vmatprep.mubr.msk.bf16.mxu1 %vm8075_vm1, %v3271_v24  ;;  %3786 = vrot.lane.b32.xlu1 %v7131_v21, %s5284_s6  ;;  %v8088_v24 = vld [vmem:[#allocation17_spill] sm:$0xff]  ;;  %vm8099_vm1 = vmmov %vm8076_vm0 }
 0x27e   : > { %3816 = vrot.lane.b32.xlu0 %v7131_v21, %s5283_s30  ;;  %4974 = vmatpush3.bf16.msra.mxu1 %v5236_v42  ;;  %v2924_v48 = vsel %vm8083_vm13, %v2922_v47, %v2923_v49  ;;  %v8084_v42 = vshrl.u32 %v6699_v57, 16  ;;  %v2926_v61 = vrot.slane %v8086_v11, 1  ;;  %vm8089_vm10 = vnez %v8088_v24  ;;  %vm8101_vm0 = vmmov %vm8093_vm2 }
 0x27f   : > { %v3181_v17 = vpop.permute.xlu0 %3180  ;;  %v3211_v58 = vpop.permute.xlu1 %3210  ;;  %5007 = vmatprep.subr.bf16.mxu1 %v7126_v12  ;;  %v7166_v50 = vsel %vm8089_vm10, %v2924_v48, 0  ;;  %v8102_v11 = vshll.u32 %v6713_v28, 16  ;;  %vm8105_vm8 = vmmov %vm8082_vm3 }
 0x280   : > { %v3273_v23 = vsel %vm8080_vm9, %v3241_v10, %v3211_v58  ;;  %v2925_v5 = vor.u32 %v2923_v49, %v8084_v42  ;;  %v3243_v37 = vsel %vm8085_vm5, %v6681_v25, %v3181_v17  ;;  %v8092_v25 = vshll.u32 %v6715_v31, 16  ;;  %vm8108_vm13 = vmmov %vm8101_vm0 }
 0x281   : > { %4944 = vmatmul.mubr.msk.bf16.gmra.mrb[12].mxu1 %vm8082_vm3, %v3273_v23  ;;  %3818 = vrot.lane.b32.xlu1 %v7149_v56, %s5283_s30  ;;  %v8094_v58 = vshrl.u32 %v6697_v53, 16  ;;  %v8096_v23 = vld [vmem:[#allocation18_spill] sm:$0xff]  ;;  %vm8104_vm9 = vnez %v7862_v4  ;;  %vm8106_vm3 = vmmov %vm8099_vm1 }
 0x282   : > { %3788 = vrot.lane.b32.xlu0 %v7149_v56, %s5284_s6  ;;  %v2927_v26 = vsel %vm8091_vm15, %v2925_v5, %v2926_v61  ;;  %v2929_v19 = vrot.slane %v8092_v25, 1  ;;  %vm8097_vm7 = vnez %v8096_v23  ;;  %vm8110_vm5 = vmmov %vm8095_vm4 }
 0x283   : > { %v3213_v30 = vpop.permute.xlu0 %3212  ;;  %v3183_v27 = vpop.permute.xlu1 %3182  ;;  %v2928_v6 = vor.u32 %v2926_v61, %v8094_v58  ;;  %v7183_v48 = vsel %vm8097_vm7, %v2927_v26, 0  ;;  %v2932_v61 = vrot.slane %v8102_v11, 1  ;;  %vm8112_vm10 = vmmov %vm8105_vm8 }
 0x284   : > { %v3275_v7 = vsel %vm8087_vm12, %v3243_v37, %v3213_v30  ;;  %v3245_v49 = vsel %vm8093_vm2, %v6699_v57, %v3183_v27  ;;  %v8100_v57 = vshrl.u32 %v6715_v31, 16  ;;  %vm8111_vm12 = vnez %v7871_v13  ;;  %vm8115_vm15 = vmmov %vm8101_vm0 }
 0x285   : > { %4947 = vmatprep.mubr.msk.bf16.mxu1 %vm8090_vm14, %v3275_v7  ;;  %3790 = vrot.lane.b32.xlu1 %v7166_v50, %s5284_s6  ;;  %v2930_v42 = vsel %vm8099_vm1, %v2928_v6, %v2929_v19  ;;  %vm8113_vm14 = vmmov %vm8099_vm1 }
 0x286   : > { %3820 = vrot.lane.b32.xlu0 %v7166_v50, %s5283_s30  ;;  %v2931_v5 = vor.u32 %v2929_v19, %v8100_v57  ;;  %v7200_v24 = vsel %vm8104_vm9, %v2930_v42, 0  ;;  %vm8116_vm2 = vmmov %vm8095_vm4 }
 0x287   : > { %v3185_v10 = vpop.permute.xlu0 %3184  ;;  %v3215_v17 = vpop.permute.xlu1 %3214  ;;  %vm8118_vm7 = vmmov %vm8105_vm8 }
 0x288   : > { %v3277_v47 = vsel %vm8095_vm4, %v3245_v49, %v3215_v17  ;;  %v3247_v37 = vsel %vm8101_vm0, %v6697_v53, %v3185_v10  ;;  %v2933_v26 = vsel %vm8106_vm3, %v2931_v5, %v2932_v61  ;;  %v8107_v53 = vshll.u32 %v6731_v29, 16  ;;  %vm8124_vm9 = vmmov %vm8118_vm7 }
 0x289   : > { %4948 = vmatmul.mubr.msk.bf16.gmra.mrb[16].mxu1 %vm8098_vm11, %v3277_v47  ;;  %3822 = vrot.lane.b32.xlu1 %v7183_v48, %s5283_s30  ;;  %v8109_v10 = vshrl.u32 %v6713_v28, 16  ;;  %v7217_v6 = vsel %vm8111_vm12, %v2933_v26, 0  ;;  %v2938_v5 = vrot.slane %v2847_v38, 1  ;;  %vm8117_vm4 = vnez %v7882_v34  ;;  %vm8119_vm11 = vmmov %vm8099_vm1 }
 0x28a   : > { %3792 = vrot.lane.b32.xlu0 %v7183_v48, %s5284_s6  ;;  %v2935_v25 = vrot.slane %v8107_v53, 1  ;;  %vm8120_vm1 = vmmov %vm8101_vm0 }
 0x28b   : > { %v3217_v30 = vpop.permute.xlu0 %3216  ;;  %v3187_v27 = vpop.permute.xlu1 %3186  ;;  %v2934_v17 = vor.u32 %v2932_v61, %v8109_v10  ;;  %v8121_v61 = vshrl.u32 %v6729_v51, 16  ;;  %vm8122_vm0 = vmmov %vm8116_vm2 }
 0x28c   : > { %v3279_v7 = vsel %vm8103_vm6, %v3247_v37, %v3217_v30  ;;  %v3249_v19 = vsel %vm8108_vm13, %v6715_v31, %v3187_v27  ;;  %v8114_v31 = vshrl.u32 %v6731_v29, 16  ;;  %vm8123_vm6 = vnez %v7891_v63  ;;  %vm8127_vm13 = vmmov %vm8122_vm0 }
 0x28d   : > { %4951 = vmatprep.mubr.msk.bf16.mxu1 %vm8105_vm8, %v3279_v7  ;;  %3794 = vrot.lane.b32.xlu1 %v7200_v24, %s5284_s6  ;;  %v2936_v47 = vsel %vm8113_vm14, %v2934_v17, %v2935_v25  ;;  %v2940_v34 = vor.u32 %v2938_v5, %v8121_v61  ;;  %vm8125_vm8 = vmmov %vm8106_vm3 }
 0x28e   : > { %3824 = vrot.lane.b32.xlu0 %v7200_v24, %s5283_s30  ;;  %v2937_v23 = vor.u32 %v2935_v25, %v8114_v31  ;;  %v7234_v30 = vsel %vm8117_vm4, %v2936_v47, 0  ;;  %vm8126_vm3 = vmmov %vm8120_vm1  ;;  %vm8134_vm4 = vnez %v7911_v33 }
 0x28f   : > { %v3189_v49 = vpop.permute.xlu0 %3188  ;;  %v3219_v4 = vpop.permute.xlu1 %3218  ;;  %v2942_v53 = vsel %vm8125_vm8, %v2940_v34, %v6778_v1  ;;  %vm8129_vm12 = vmmov %vm8120_vm1 }
 0x290   : > { %v3281_v58 = vsel %vm8110_vm5, %v3249_v19, %v3219_v4  ;;  %v3251_v42 = vsel %vm8115_vm15, %v6713_v28, %v3189_v49  ;;  %v2939_v27 = vsel %vm8119_vm11, %v2937_v23, %v2938_v5  ;;  %vm8128_vm5 = vnez %v7900_v18  ;;  %vm8131_vm14 = vmmov %vm8122_vm0  ;;  %v5238_v23 = vld [vmem:[%s7564_s3 + $0x68] sm:$0xff]  }
 0x291   : > { %4952 = vmatmul.mubr.msk.bf16.gmra.mrb[20].mxu1 %vm8112_vm10, %v3281_v58  ;;  %3826 = vrot.lane.b32.xlu1 %v7217_v6, %s5283_s30  ;;  %v7249_v26 = vsel %vm8123_vm6, %v2939_v27, 0  ;;  %v7263_v49 = vsel %vm8128_vm5, %v2942_v53, 0  ;;  %vm8130_vm10 = vmmov %vm8118_vm7  ;;  %vm8132_vm15 = vnez %v7906_v22 }
 0x292   : > { %3796 = vrot.lane.b32.xlu0 %v7217_v6, %s5284_s6  ;;  %v7277_v18 = vsel %vm8132_vm15, %v6801_v62, 0  ;;  %vm8136_vm11 = vmmov %vm8122_vm0 }
 0x293   : > { %v3221_v57 = vpop.permute.xlu0 %3220  ;;  %v3191_v13 = vpop.permute.xlu1 %3190  ;;  %vm8139_vm6 = vmmov %vm8126_vm3 }
 0x294   : > { %v3283_v37 = vsel %vm8116_vm2, %v3251_v42, %v3221_v57  ;;  %v3253_v28 = vsel %vm8120_vm1, %v6731_v29, %v3191_v13  ;;  %vm8133_vm2 = vmmov %vm8118_vm7 }
 0x295   : > { %4955 = vmatprep.mubr.msk.bf16.mxu1 %vm8118_vm7, %v3283_v37  ;;  %3798 = vrot.lane.b32.xlu1 %v7234_v30, %s5284_s6  ;;  %vm8135_vm7 = vmmov %vm8120_vm1  ;;  %vm8137_vm1 = vnez %v7915_v16 }
 0x296   : > { %3828 = vrot.lane.b32.xlu0 %v7234_v30, %s5283_s30  ;;  %vm8147_vm15 = vmmov %vm8126_vm3 }
 0x297   : > { %v3193_v38 = vpop.permute.xlu0 %3192  ;;  %v3223_v11 = vpop.permute.xlu1 %3222 }
 0x298   : > { %v3285_v7 = vsel %vm8122_vm0, %v3253_v28, %v3223_v11  ;;  %v3255_v29 = vsel %vm8126_vm3, %v6729_v51, %v3193_v38  ;;  %vm8138_vm0 = vmmov %vm8133_vm2 }
 0x299   : > { %4956 = vmatmul.mubr.msk.bf16.gmra.mrb[24].mxu1 %vm8124_vm9, %v3285_v7  ;;  %3830 = vrot.lane.b32.xlu1 %v7249_v26, %s5283_s30  ;;  %vm8140_vm9 = vmmov %vm8136_vm11 }
 0x29a   : > { %3800 = vrot.lane.b32.xlu0 %v7249_v26, %s5284_s6  ;;  %vm8141_vm8 = vmmov %vm8138_vm0 }
 0x29b   : > { %v3225_v25 = vpop.permute.xlu0 %3224  ;;  %v3195_v19 = vpop.permute.xlu1 %3194  ;;  %vm8143_vm5 = vmmov %vm8138_vm0 }
 0x29c   : > { %v3287_v63 = vsel %vm8127_vm13, %v3255_v29, %v3225_v25  ;;  %v3257_v4 = vsel %vm8129_vm12, %v6756_v8, %v3195_v19  ;;  %v2963_v8 = vsel %vm8134_vm4, %v6785_v55, 0  ;;  %vm8142_vm13 = vmmov %vm8140_vm9 }
 0x29d   : > { %4959 = vmatprep.mubr.msk.bf16.mxu1 %vm8130_vm10, %v3287_v63  ;;  %3802 = vrot.lane.b32.xlu1 %v7263_v49, %s5284_s6  ;;  %v3288_v10 = vsel %vm8131_vm14, %v3257_v4, %v6419_v15  ;;  %v2979_v62 = vsel %vm8137_vm1, %v2963_v8, 0  ;;  %vm8144_vm12 = vmmov %vm8126_vm3 }
 0x29e   : > { %3832 = vrot.lane.b32.xlu0 %v7263_v49, %s5283_s30  ;;  %vm8145_vm10 = vmmov %vm8140_vm9 }
 0x29f   : > { %v2999_v51 = vpop.permute.xlu0 %2998  ;;  %v2997_v1 = vpop.permute.xlu1 %2996  ;;  %vm8146_vm14 = vmmov %vm8138_vm0 }
 0x2a0   : > { %v3059_v17 = vsel %vm8135_vm7, 0, %v2997_v1  ;;  %v3062_v33 = vsel %vm8139_vm6, %v6809_v54, %v2999_v51  ;;  %v5239_v54 = vld [vmem:[%s7564_s3 + $0x70] sm:$0xff]   ;;  %vm8149_vm4 = vmmov %vm8138_vm0 }
 0x2a1   : > { %4960 = vmatmul.mubr.msk.bf16.gmra.mrb[28].mxu1 %vm8133_vm2, %v3288_v10  ;;  %3834 = vrot.lane.b32.xlu1 %v7277_v18, %s5283_s30  ;;  %vm8148_vm2 = vmmov %vm8140_vm9 }
 0x2a2   : > { %3804 = vrot.lane.b32.xlu0 %v7277_v18, %s5284_s6  ;;  %vm8150_vm7 = vmmov %vm8126_vm3 }
 0x2a3   : > { %v3031_v58 = vpop.permute.xlu0 %3030  ;;  %v3029_v47 = vpop.permute.xlu1 %3028  ;;  %vm8152_vm1 = vmmov %vm8138_vm0 }
 0x2a4   : > { %v3106_v22 = vsel %vm8136_vm11, %v3059_v17, %v3029_v47  ;;  %v3108_v42 = vsel %vm8140_vm9, %v3062_v33, %v3031_v58  ;;  %vm8151_vm11 = vmmov %vm8148_vm2 }
 0x2a5   : > { %4975 = vmatprep.mubr.msk.bf16.mxu1 %vm8138_vm0, %v3106_v22  ;;  %3806 = vrot.lane.b32.xlu1 %v2979_v62, %s5284_s6  ;;  %vm8153_vm0 = vmmov %vm8126_vm3 }
 0x2a6   : > { %3836 = vrot.lane.b32.xlu0 %v2979_v62, %s5283_s30  ;;  %vm8154_vm6 = vmmov %vm8148_vm2 }
 0x2a7   : > { %v3003_v55 = vpop.permute.xlu0 %3002  ;;  %v3001_v31 = vpop.permute.xlu1 %3000  ;;  %vm8155_vm9 = vmmov %vm8152_vm1 }
 0x2a8   : > { %v3065_v16 = vsel %vm8126_vm3, %v6805_v40, %v3001_v31  ;;  %v3068_v37 = vsel %vm8144_vm12, %v6824_v36, %v3003_v55  ;;  %v5240_v40 = vld [vmem:[%s7564_s3 + $0x78] sm:$0xff]   ;;  %v5241_v36 = vld [vmem:[%s7564_s3 + $0x80] sm:$0xff]   ;;  %vm8157_vm3 = vmmov %vm8148_vm2 }
 0x2a9   : > { %4976 = vmatmul.mubr.msk.bf16.vlgmr.msra.gmra.mrb[0].mxu1 %vm8141_vm8, %v3108_v42  ;;  %vm8156_vm8 = vmmov %vm8153_vm0 }
 0x2aa   : > { %5008 = vmatpush3.bf16.msra.mxu1 %v7126_v12  ;;  %vm8160_vm12 = vmmov %vm8148_vm2 }
 0x2ab   : > { %v3035_v57 = vpop.permute.xlu0 %3034  ;;  %v3033_v13 = vpop.permute.xlu1 %3032  ;;  %5009 = vmatprep.subr.bf16.mxu1 %v5238_v23 }
 0x2ac   : > { %v3110_v5 = vsel %vm8142_vm13, %v3065_v16, %v3033_v13  ;;  %v3112_v28 = vsel %vm8145_vm10, %v3068_v37, %v3035_v57  ;;  %vm8158_vm13 = vmmov %vm8152_vm1 }
 0x2ad   : > { %4979 = vmatprep.mubr.msk.bf16.mxu1 %vm8143_vm5, %v3110_v5  ;;  %vm8159_vm5 = vmmov %vm8153_vm0 }
 0x2ae   : > { %5010 = vmatpush3.bf16.msra.mxu1 %v5238_v23  ;;  %vm8161_vm10 = vmmov %vm8152_vm1 }
 0x2af   : > { %v3007_v27 = vpop.permute.xlu0 %3006  ;;  %v3005_v12 = vpop.permute.xlu1 %3004  ;;  %5011 = vmatprep.subr.bf16.mxu1 %v5239_v54 }
 0x2b0   : > { %v3071_v38 = vsel %vm8147_vm15, %v6839_v35, %v3005_v12  ;;  %v3074_v7 = vsel %vm8150_vm7, %v6854_v20, %v3007_v27  ;;  %v5242_v35 = vld [vmem:[%s7564_s3 + $0x88] sm:$0xff]   ;;  %vm8163_vm15 = vmmov %vm8148_vm2 }
 0x2b1   : > { %4980 = vmatmul.mubr.msk.bf16.gmra.mrb[4].mxu1 %vm8146_vm14, %v3112_v28  ;;  %vm8162_vm14 = vmmov %vm8153_vm0 }
 0x2b2   : > { %5012 = vmatpush3.bf16.msra.mxu1 %v5239_v54  ;;  %vm8166_vm7 = vmmov %vm8157_vm3 }
 0x2b3   : > { %v3039_v11 = vpop.permute.xlu0 %3038  ;;  %v3037_v61 = vpop.permute.xlu1 %3036  ;;  %5013 = vmatprep.subr.bf16.mxu1 %v5240_v40 }
 0x2b4   : > { %v3114_v34 = vsel %vm8148_vm2, %v3071_v38, %v3037_v61  ;;  %v3116_v25 = vsel %vm8151_vm11, %v3074_v7, %v3039_v11  ;;  %vm8164_vm2 = vmmov %vm8152_vm1 }
 0x2b5   : > { %4983 = vmatprep.mubr.msk.bf16.mxu1 %vm8149_vm4, %v3114_v34  ;;  %vm8165_vm4 = vmmov %vm8153_vm0 }
 0x2b6   : > { %5014 = vmatpush3.bf16.msra.mxu1 %v5240_v40  ;;  %vm8167_vm11 = vmmov %vm8152_vm1 }
 0x2b7   : > { %v3011_v53 = vpop.permute.xlu0 %3010  ;;  %v3009_v29 = vpop.permute.xlu1 %3008  ;;  %5015 = vmatprep.subr.bf16.mxu1 %v5241_v36 }
 0x2b8   : > { %v3077_v19 = vsel %vm8153_vm0, %v6869_v44, %v3009_v29  ;;  %v3080_v51 = vsel %vm8156_vm8, %v6884_v14, %v3011_v53 }
 0x2b9   : > { %4984 = vmatmul.mubr.msk.bf16.gmra.mrb[8].mxu1 %vm8152_vm1, %v3116_v25  ;;  %vm8168_vm1 = vmmov %vm8153_vm0 }
 0x2ba   : > { %5016 = vmatpush3.bf16.msra.mxu1 %v5241_v36  ;;  %vm8169_vm0 = vmmov %vm8157_vm3 }
 0x2bb   : > { %v3043_v63 = vpop.permute.xlu0 %3042  ;;  %v3041_v4 = vpop.permute.xlu1 %3040  ;;  %5017 = vmatprep.subr.bf16.mxu1 %v5242_v35  ;;  %vm8172_vm8 = vmmov %vm8169_vm0 }
 0x2bc   : > { %v3118_v20 = vsel %vm8154_vm6, %v3077_v19, %v3041_v4  ;;  %v3120_v8 = vsel %vm8157_vm3, %v3080_v51, %v3043_v63  ;;  %vm8170_vm6 = vmmov %vm8164_vm2 }
 0x2bd   : > { %4987 = vmatprep.mubr.msk.bf16.mxu1 %vm8155_vm9, %v3118_v20  ;;  %vm8171_vm9 = vmmov %vm8168_vm1 }
 0x2be   : > { %5018 = vmatpush3.bf16.msra.mxu1 %v5242_v35  ;;  %vm8173_vm3 = vmmov %vm8164_vm2 }
 0x2bf   : > { %v3015_v1 = vpop.permute.xlu0 %3014  ;;  %v3013_v10 = vpop.permute.xlu1 %3012 }
 0x2c0   : > { %v3083_v44 = vsel %vm8159_vm5, %v6899_v45, %v3013_v10  ;;  %v3086_v22 = vsel %vm8162_vm14, %v6914_v3, %v3015_v1  ;;  %vm8175_vm5 = vmmov %vm8169_vm0 }
 0x2c1   : > { %4988 = vmatmul.mubr.msk.bf16.gmra.mrb[12].mxu1 %vm8158_vm13, %v3120_v8  ;;  %vm8174_vm13 = vmmov %vm8168_vm1 }
 0x2c2   : > { %vm8178_vm14 = vmmov %vm8169_vm0 }
 0x2c3   : > { %v3047_v17 = vpop.permute.xlu0 %3046  ;;  %v3045_v58 = vpop.permute.xlu1 %3044 }
 0x2c4   : > { %v3122_v47 = vsel %vm8160_vm12, %v3083_v44, %v3045_v58  ;;  %v3124_v33 = vsel %vm8163_vm15, %v3086_v22, %v3047_v17  ;;  %vm8176_vm12 = vmmov %vm8164_vm2 }
 0x2c5   : > { %4991 = vmatprep.mubr.msk.bf16.mxu1 %vm8161_vm10, %v3122_v47  ;;  %vm8177_vm10 = vmmov %vm8168_vm1 }
 0x2c6   : > { %vm8179_vm15 = vmmov %vm8168_vm1 }
 0x2c7   : > { %v3019_v62 = vpop.permute.xlu0 %3018  ;;  %v3017_v14 = vpop.permute.xlu1 %3016 }
 0x2c8   : > { %v3089_v55 = vsel %vm8165_vm4, %v6929_v52, %v3017_v14  ;;  %v3092_v42 = vsel %vm8168_vm1, %v6944_v9, %v3019_v62  ;;  %vm8180_vm4 = vmmov %vm8168_vm1 }
 0x2c9   : > { %4992 = vmatmul.mubr.msk.bf16.gmra.mrb[16].mxu1 %vm8164_vm2, %v3124_v33  ;;  %vm8183_vm1 = vmmov %vm8164_vm2 }
 0x2cb   : > { %v3051_v31 = vpop.permute.xlu0 %3050  ;;  %v3049_v45 = vpop.permute.xlu1 %3048 }
 0x2cc   : > { %v3126_v23 = vsel %vm8166_vm7, %v3089_v55, %v3049_v45  ;;  %v3128_v57 = vsel %vm8169_vm0, %v3092_v42, %v3051_v31  ;;  %vm8181_vm7 = vmmov %vm8169_vm0 }
 0x2cd   : > { %4995 = vmatprep.mubr.msk.bf16.mxu1 %vm8167_vm11, %v3126_v23  ;;  %vm8182_vm11 = vmmov %vm8169_vm0 }
 0x2ce   : > { %vm8184_vm0 = vmmov %vm8183_vm1 }
 0x2cf   : > { %v3023_v16 = vpop.permute.xlu0 %3022  ;;  %v3021_v3 = vpop.permute.xlu1 %3020 }
 0x2d0   : > { %v3095_v13 = vsel %vm8171_vm9, %v6958_v43, %v3021_v3  ;;  %v3098_v37 = vsel %vm8174_vm13, %v6971_v41, %v3023_v16  ;;  %vm8186_vm9 = vmmov %vm8175_vm5 }
 0x2d1   : > { %4996 = vmatmul.mubr.msk.bf16.gmra.mrb[20].mxu1 %vm8170_vm6, %v3128_v57  ;;  %vm8185_vm6 = vmmov %vm8180_vm4 }
 0x2d2   : > { %vm8189_vm13 = vmmov %vm8184_vm0 }
 0x2d3   : > { %v3053_v54 = vpop.permute.xlu1 %3052  ;;  %v3055_v52 = vpop.permute.xlu0 %3054 }
 0x2d4   : > { %v3130_v5 = vsel %vm8172_vm8, %v3095_v13, %v3053_v54  ;;  %v3132_v9 = vsel %vm8175_vm5, %v3098_v37, %v3055_v52  ;;  %vm8187_vm8 = vmmov %vm8180_vm4 }
 0x2d5   : > { %4999 = vmatprep.mubr.msk.bf16.mxu1 %vm8173_vm3, %v3130_v5  ;;  %vm8188_vm3 = vmmov %vm8175_vm5 }
 0x2d6   : > { %vm8190_vm5 = vmmov %vm8184_vm0 }
 0x2d7   : > { %v3025_v27 = vpop.permute.xlu1 %3024 }
 0x2d8   : > { %v3027_v12 = vpop.permute.xlu0 %3026  ;;  %v3101_v40 = vsel %vm8177_vm10, %v6984_v39, %v3025_v27  ;;  %vm8192_vm10 = vmmov %vm8188_vm3 }
 0x2d9   : > { %5000 = vmatmul.mubr.msk.bf16.gmra.mrb[24].mxu1 %vm8176_vm12, %v3132_v9  ;;  %v3104_v11 = vsel %vm8179_vm15, %v6997_v60, %v3027_v12  ;;  %vm8191_vm12 = vmmov %vm8180_vm4 }
 0x2da   : > { %v3135_v34 = vsel %vm8181_vm7, %v3104_v11, %v6419_v15  ;;  %vm8194_vm15 = vmmov %vm8188_vm3 }
 0x2db   : > { %v3057_v28 = vpop.permute.xlu1 %3056  ;;  %vm8197_vm7 = vmmov %vm8185_vm6 }
 0x2dc   : > { %v3134_v43 = vsel %vm8178_vm14, %v3101_v40, %v3057_v28  ;;  %v3777_v38 = vpop.permute.xlu0 %3776  ;;  %vm8193_vm14 = vmmov %vm8180_vm4 }
 0x2dd   : > { %5003 = vmatprep.mubr.msk.bf16.mxu1 %vm8164_vm2, %v3134_v43  ;;  %v3839_v41 = vsel %vm8180_vm4, 0, %v3777_v38  ;;  %vm8195_vm2 = vmmov %vm8184_vm0 }
 0x2de   : > { %vm8196_vm4 = vmmov %vm8184_vm0 }
 0x2df   : > { %v3779_v61 = vpop.permute.xlu1 %3778 }
 0x2e0   : > { %v3809_v36 = vpop.permute.xlu0 %3808  ;;  %v3842_v60 = vsel %vm8185_vm6, %v7031_v32, %v3779_v61 }
 0x2e1   : > { %v3886_v7 = vsel %vm8182_vm11, %v3839_v41, %v3809_v36  ;;  %5004 = vmatmul.mubr.msk.bf16.gmra.mrb[28].mxu1 %vm8183_vm1, %v3135_v34  ;;  %vm8198_vm11 = vmmov %vm8188_vm3  ;;  %v5259_v36 = vld [vmem:[%s5337_s27 + $0x8] sm:$0xff]  }
 0x2e2   : > { %5019 = vmatprep.mubr.msk.bf16.mxu1 %vm8184_vm0, %v3886_v7  ;;  %vm8199_vm1 = vmmov %vm8185_vm6  ;;  %v4231_v34 = vunpack.c.l.bf16 %v5259_v36 }
 0x2e3   : > { %v3811_v39 = vpop.permute.xlu1 %3810  ;;  %vm8200_vm0 = vmmov %vm8188_vm3 }
 0x2e4   : > { %v3781_v53 = vpop.permute.xlu0 %3780  ;;  %v3888_v35 = vsel %vm8186_vm9, %v3842_v60, %v3811_v39  ;;  %vm8201_vm6 = vmmov %vm8195_vm2  ;;  %v5260_v39 = vld [vmem:[%s5337_s27] sm:$0xff]  }
 0x2e5   : > { %v3845_v25 = vsel %vm8187_vm8, %v7049_v59, %v3781_v53  ;;  %vm8202_vm9 = vmmov %vm8195_vm2  ;;  %v4229_v53 = vunpack.c.l.bf16 %v5260_v39 }
 0x2e6   : > { %vm8203_vm8 = vmmov %vm8199_vm1 }
 0x2e7   : > { %v3783_v29 = vpop.permute.xlu1 %3782 }
 0x2e8   : > { %v3813_v19 = vpop.permute.xlu0 %3812  ;;  %v3848_v51 = vsel %vm8191_vm12, %v7069_v46, %v3783_v29  ;;  %vm8207_vm12 = vmmov %vm8195_vm2 }
 0x2e9   : > { %v3890_v63 = vsel %vm8188_vm3, %v3845_v25, %v3813_v19  ;;  %5020 = vmatmul.mubr.msk.bf16.vlgmr.msra.gmra.mrb[0].mxu1 %vm8189_vm13, %v3888_v35  ;;  %vm8204_vm3 = vmmov %vm8200_vm0  ;;  %v4230_v25 = vunpack.c.h.bf16 %v5260_v39 }
 0x2ea   : > { %5023 = vmatprep.mubr.msk.bf16.mxu1 %vm8190_vm5, %v3890_v63  ;;  %vm8205_vm13 = vmmov %vm8199_vm1 }
 0x2eb   : > { %v3815_v4 = vpop.permute.xlu1 %3814  ;;  %vm8206_vm5 = vmmov %vm8200_vm0 }
 0x2ec   : > { %v3785_v20 = vpop.permute.xlu0 %3784  ;;  %v3892_v32 = vsel %vm8192_vm10, %v3848_v51, %v3815_v4  ;;  %vm8208_vm10 = vmmov %vm8195_vm2 }
 0x2ed   : > { %v3851_v10 = vsel %vm8193_vm14, %v7089_v0, %v3785_v20  ;;  %vm8209_vm14 = vmmov %vm8199_vm1 }
 0x2ef   : > { %v3787_v1 = vpop.permute.xlu1 %3786 }
 0x2f0   : > { %v3817_v8 = vpop.permute.xlu0 %3816  ;;  %v3854_v58 = vsel %vm8197_vm7, %v7109_v2, %v3787_v1  ;;  %vm8213_vm7 = vmmov %vm8201_vm6 }
 0x2f1   : > { %v3894_v59 = vsel %vm8194_vm15, %v3851_v10, %v3817_v8  ;;  %5024 = vmatmul.mubr.msk.bf16.gmra.mrb[4].mxu1 %vm8195_vm2, %v3892_v32  ;;  %vm8210_vm15 = vmmov %vm8200_vm0 }
 0x2f2   : > { %5027 = vmatprep.mubr.msk.bf16.mxu1 %vm8196_vm4, %v3894_v59  ;;  %vm8211_vm2 = vmmov %vm8199_vm1 }
 0x2f3   : > { %v3819_v44 = vpop.permute.xlu1 %3818  ;;  %vm8212_vm4 = vmmov %vm8200_vm0 }
 0x2f4   : > { %v3789_v17 = vpop.permute.xlu0 %3788  ;;  %v3896_v46 = vsel %vm8198_vm11, %v3854_v58, %v3819_v44  ;;  %vm8214_vm11 = vmmov %vm8201_vm6  ;;  %v5261_v44 = vld [vmem:[%s5337_s27 + $0x18] sm:$0xff]  }
 0x2f5   : > { %v3857_v22 = vsel %vm8199_vm1, %v7131_v21, %v3789_v17  ;;  %v4235_v17 = vunpack.c.l.bf16 %v5261_v44 }
 0x2f7   : > { %v3791_v47 = vpop.permute.xlu1 %3790 }
 0x2f8   : > { %v3821_v62 = vpop.permute.xlu0 %3820  ;;  %v3860_v55 = vsel %vm8203_vm8, %v7149_v56, %v3791_v47  ;;  %vm8217_vm8 = vmmov %vm8213_vm7 }
 0x2f9   : > { %v3898_v0 = vsel %vm8200_vm0, %v3857_v22, %v3821_v62  ;;  %5028 = vmatmul.mubr.msk.bf16.gmra.mrb[8].mxu1 %vm8201_vm6, %v3896_v46  ;;  %vm8215_vm6 = vmmov %vm8199_vm1  ;;  %v5262_v46 = vld [vmem:[%s5337_s27 + $0x10] sm:$0xff]  }
 0x2fa   : > { %5031 = vmatprep.mubr.msk.bf16.mxu1 %vm8202_vm9, %v3898_v0  ;;  %vm8216_vm9 = vmmov %vm8200_vm0  ;;  %v4233_v22 = vunpack.c.l.bf16 %v5262_v46 }
 0x2fb   : > { %v3823_v14 = vpop.permute.xlu1 %3822 }
 0x2fc   : > { %v3793_v33 = vpop.permute.xlu0 %3792  ;;  %v3900_v2 = vsel %vm8204_vm3, %v3860_v55, %v3823_v14  ;;  %vm8218_vm3 = vmmov %vm8213_vm7  ;;  %v4236_v14 = vunpack.c.h.bf16 %v5261_v44 }
 0x2fd   : > { %v3863_v45 = vsel %vm8205_vm13, %v7166_v50, %v3793_v33  ;;  %vm8219_vm13 = vmmov %vm8199_vm1 }
 0x2ff   : > { %v3795_v31 = vpop.permute.xlu1 %3794 }
 0x300   : > { %v3825_v23 = vpop.permute.xlu0 %3824  ;;  %v3866_v3 = vsel %vm8209_vm14, %v7183_v48, %v3795_v31  ;;  %vm8223_vm14 = vmmov %vm8218_vm3  ;;  %v4234_v31 = vunpack.c.h.bf16 %v5262_v46 }
 0x301   : > { %v3902_v21 = vsel %vm8206_vm5, %v3863_v45, %v3825_v23  ;;  %5032 = vmatmul.mubr.msk.bf16.gmra.mrb[12].mxu1 %vm8207_vm12, %v3900_v2  ;;  %vm8220_vm5 = vmmov %vm8200_vm0 }
 0x302   : > { %5035 = vmatprep.mubr.msk.bf16.mxu1 %vm8208_vm10, %v3902_v21  ;;  %vm8221_vm12 = vmmov %vm8199_vm1 }
 0x303   : > { %v3827_v42 = vpop.permute.xlu1 %3826  ;;  %vm8222_vm10 = vmmov %vm8200_vm0 }
 0x304   : > { %v3797_v16 = vpop.permute.xlu0 %3796  ;;  %v3904_v56 = vsel %vm8210_vm15, %v3866_v3, %v3827_v42  ;;  %vm8224_vm15 = vmmov %vm8218_vm3 }
 0x305   : > { %v3869_v13 = vsel %vm8211_vm2, %v7200_v24, %v3797_v16  ;;  %vm8225_vm2 = vmmov %vm8199_vm1 }
 0x307   : > { %v3799_v57 = vpop.permute.xlu1 %3798 }
 0x308   : > { %v3829_v54 = vpop.permute.xlu0 %3828  ;;  %v3872_v37 = vsel %vm8199_vm1, %v7217_v6, %v3799_v57 }
 0x309   : > { %v3906_v50 = vsel %vm8212_vm4, %v3869_v13, %v3829_v54  ;;  %5036 = vmatmul.mubr.msk.bf16.gmra.mrb[16].mxu1 %vm8213_vm7, %v3904_v56  ;;  %vm8226_vm4 = vmmov %vm8200_vm0  ;;  %v5263_v54 = vld [vmem:[%s5337_s27 + $0x28] sm:$0xff]  }
 0x30a   : > { %5039 = vmatprep.mubr.msk.bf16.mxu1 %vm8214_vm11, %v3906_v50  ;;  %vm8227_vm7 = vmmov %vm8218_vm3  ;;  %v4239_v50 = vunpack.c.l.bf16 %v5263_v54 }
 0x30b   : > { %v3831_v52 = vpop.permute.xlu1 %3830  ;;  %vm8228_vm11 = vmmov %vm8199_vm1 }
 0x30c   : > { %v3801_v5 = vpop.permute.xlu0 %3800  ;;  %v3908_v48 = vsel %vm8200_vm0, %v3872_v37, %v3831_v52  ;;  %vm8229_vm0 = vmmov %vm8199_vm1  ;;  %v5264_v37 = vld [vmem:[%s5337_s27 + $0x20] sm:$0xff]  }
 0x30d   : > { %v3875_v9 = vsel %vm8215_vm6, %v7234_v30, %v3801_v5  ;;  %vm8230_vm6 = vmmov %vm8229_vm0 }
 0x30f   : > { %v3803_v27 = vpop.permute.xlu1 %3802 }
 0x310   : > { %v3833_v12 = vpop.permute.xlu0 %3832  ;;  %v3878_v6 = vsel %vm8219_vm13, %v7249_v26, %v3803_v27  ;;  %v4237_v27 = vunpack.c.l.bf16 %v5264_v37  ;;  %vm8234_vm13 = vmmov %vm8229_vm0 }
 0x311   : > { %v3910_v24 = vsel %vm8216_vm9, %v3875_v9, %v3833_v12  ;;  %5040 = vmatmul.mubr.msk.bf16.gmra.mrb[20].mxu1 %vm8217_vm8, %v3908_v48  ;;  %vm8231_vm9 = vmmov %vm8229_vm0  ;;  %v4240_v12 = vunpack.c.h.bf16 %v5263_v54 }
 0x312   : > { %5043 = vmatprep.mubr.msk.bf16.mxu1 %vm8218_vm3, %v3910_v24  ;;  %vm8232_vm8 = vmmov %vm8229_vm0 }
 0x313   : > { %v3835_v40 = vpop.permute.xlu1 %3834  ;;  %vm8233_vm3 = vmmov %vm8229_vm0 }
 0x314   : > { %v3805_v28 = vpop.permute.xlu0 %3804  ;;  %v3912_v43 = vsel %vm8220_vm5, %v3878_v6, %v3835_v40  ;;  %vm8235_vm5 = vmmov %vm8229_vm0 }
 0x315   : > { %v3881_v30 = vsel %vm8221_vm12, %v7263_v49, %v3805_v28  ;;  %v7438_v49 = vld [vmem:[%s7565_s4] ss:$0 sm:$0xff]  ;;  %v4238_v28 = vunpack.c.h.bf16 %v5264_v37  ;;  %vm8236_vm12 = vmmov %vm8229_vm0 }
 0x317   : > { %v3807_v61 = vpop.permute.xlu1 %3806 }
 0x318   : > { %v3837_v38 = vpop.permute.xlu0 %3836  ;;  %v3884_v41 = vsel %vm8225_vm2, %v7277_v18, %v3807_v61  ;;  %v4232_v18 = vunpack.c.h.bf16 %v5259_v36  ;;  %vm8240_vm2 = vmmov %vm8229_vm0 }
 0x319   : > { %v3914_v11 = vsel %vm8222_vm10, %v3881_v30, %v3837_v38  ;;  %5044 = vmatmul.mubr.msk.bf16.gmra.mrb[24].mxu1 %vm8223_vm14, %v3912_v43  ;;  %v3915_v26 = vsel %vm8226_vm4, %v3884_v41, %v6419_v15  ;;  %vm8237_vm10 = vmmov %vm8229_vm0 }
 0x31a   : > { %5047 = vmatprep.mubr.msk.bf16.mxu1 %vm8224_vm15, %v3914_v11  ;;  %vm8238_vm14 = vmmov %vm8229_vm0 }
 0x31b   : > { %vm8239_vm15 = vmmov %vm8229_vm0 }
 0x31c   : > { %vm8241_vm4 = vmmov %vm8229_vm0 }
 0x321   : > { %5048 = vmatmul.mubr.msk.bf16.gmra.mrb[28].mxu1 %vm8227_vm7, %v3915_v26  ;;  %vm8242_vm7 = vmmov %vm8229_vm0 }
 0x3bc   : > { %v5021_v7 = vpop.f32.mrb[0].mxu1 }
 0x3bd   : > { %v4199_v60 = vadd.f32 %v5021_v7, %v7438_v49  ;;  %v4031_v29 = vpop.f32.mrb[1].mxu1  ;;  %v5265_v7 = vld [vmem:[%s5337_s27 + $0x38] sm:$0xff]  }
 0x3be   : > { %v4197_v15 = vadd.f32 %v7438_v49, %v4031_v29  ;;  %v5022_v35 = vpop.f32.mrb[2].mxu1  ;;  %v4243_v39 = vunpack.c.l.bf16 %v5265_v7  ;;  %v5266_v29 = vld [vmem:[%s5337_s27 + $0x30] sm:$0xff]  }
 0x3bf   : > { %v4263_v19 = vadd.f32 %v4231_v34, %v4199_v60  ;;  %v4200_v63 = vadd.f32 %v5022_v35, %v7438_v49  ;;  %v4034_v4 = vpop.f32.mrb[3].mxu1 }
 0x3c0   : > { %v4261_v20 = vadd.f32 %v4229_v53, %v4197_v15  ;;  %v4198_v51 = vadd.f32 %v7438_v49, %v4034_v4  ;;  %v4242_v4 = vunpack.c.h.bf16 %v5266_v29 }
 0x3c1   : > { %v4295_v1 = vmax.f32 %v4263_v19, 0.0  ;;  %v4264_v32 = vadd.f32 %v4232_v18, %v4200_v63  ;;  %v4241_v18 = vunpack.c.l.bf16 %v5266_v29 }
 0x3c2   : > { %v4293_v10 = vmax.f32 %v4261_v20, 0.0  ;;  %v4262_v8 = vadd.f32 %v4230_v25, %v4198_v51  ;;  %v4244_v25 = vunpack.c.h.bf16 %v5265_v7 }
 0x3c3   : > { %4327 = vst.msk [vmem:[%s7449_s20 + $0x10] sm:$0xff] %vm8228_vm11, %v4295_v1  ;;  %v4296_v59 = vmax.f32 %v4264_v32, 0.0  ;;  %vm8243_vm11 = vmmov %vm8229_vm0 }
 0x3c4   : > { %4325 = vst.msk [vmem:[%s7449_s20] sm:$0xff] %vm8199_vm1, %v4293_v10  ;;  %v4294_v58 = vmax.f32 %v4262_v8, 0.0  ;;  %v5025_v47 = vpop.f32.mrb[4].mxu1  ;;  %vm8244_vm1 = vmmov %vm8229_vm0 }
 0x3c5   : > { %4328 = vst.msk [vmem:[%s7449_s20 + $0x18] sm:$0xff] %vm8229_vm0, %v4296_v59  ;;  %v4203_v62 = vadd.f32 %v5025_v47, %v7438_v49  ;;  %v4047_v0 = vpop.f32.mrb[5].mxu1  ;;  %v5267_v47 = vld [vmem:[%s5337_s27 + $0x48] sm:$0xff]  }
 0x3c6   : > { %4326 = vst.msk [vmem:[%s7449_s20 + $0x8] sm:$0xff] %vm8230_vm6, %v4294_v58  ;;  %v4201_v33 = vadd.f32 %v7438_v49, %v4047_v0  ;;  %v5026_v55 = vpop.f32.mrb[6].mxu1  ;;  %v4247_v46 = vunpack.c.l.bf16 %v5267_v47  ;;  %v5268_v0 = vld [vmem:[%s5337_s27 + $0x40] sm:$0xff]   ;;  %vm8245_vm6 = vmmov %vm8229_vm0 }
 0x3c7   : > { %v4267_v2 = vadd.f32 %v4235_v17, %v4203_v62  ;;  %v4204_v45 = vadd.f32 %v5026_v55, %v7438_v49  ;;  %v4050_v23 = vpop.f32.mrb[7].mxu1 }
 0x3c8   : > { %v4265_v21 = vadd.f32 %v4233_v22, %v4201_v33  ;;  %v4202_v42 = vadd.f32 %v7438_v49, %v4050_v23  ;;  %v4246_v23 = vunpack.c.h.bf16 %v5268_v0 }
 0x3c9   : > { %v4299_v16 = vmax.f32 %v4267_v2, 0.0  ;;  %v4268_v3 = vadd.f32 %v4236_v14, %v4204_v45  ;;  %v4245_v14 = vunpack.c.l.bf16 %v5268_v0 }
 0x3ca   : > { %v4297_v57 = vmax.f32 %v4265_v21, 0.0  ;;  %v4266_v56 = vadd.f32 %v4234_v31, %v4202_v42  ;;  %v4248_v31 = vunpack.c.h.bf16 %v5267_v47 }
 0x3cb   : > { %4331 = vst.msk [vmem:[%s7449_s20 + $0x30] sm:$0xff] %vm8231_vm9, %v4299_v16  ;;  %v4300_v13 = vmax.f32 %v4268_v3, 0.0  ;;  %vm8246_vm9 = vmmov %vm8229_vm0 }
 0x3cc   : > { %4329 = vst.msk [vmem:[%s7449_s20 + $0x20] sm:$0xff] %vm8232_vm8, %v4297_v57  ;;  %v4298_v52 = vmax.f32 %v4266_v56, 0.0  ;;  %v5029_v5 = vpop.f32.mrb[8].mxu1  ;;  %vm8247_vm8 = vmmov %vm8229_vm0 }
 0x3cd   : > { %4332 = vst.msk [vmem:[%s7449_s20 + $0x38] sm:$0xff] %vm8233_vm3, %v4300_v13  ;;  %v4207_v48 = vadd.f32 %v5029_v5, %v7438_v49  ;;  %v4063_v9 = vpop.f32.mrb[9].mxu1  ;;  %v5269_v5 = vld [vmem:[%s5337_s27 + $0x58] sm:$0xff]   ;;  %vm8248_vm3 = vmmov %vm8229_vm0 }
 0x3ce   : > { %4330 = vst.msk [vmem:[%s7449_s20 + $0x28] sm:$0xff] %vm8234_vm13, %v4298_v52  ;;  %v4205_v24 = vadd.f32 %v7438_v49, %v4063_v9  ;;  %v5030_v40 = vpop.f32.mrb[10].mxu1  ;;  %v4251_v37 = vunpack.c.l.bf16 %v5269_v5  ;;  %v5270_v9 = vld [vmem:[%s5337_s27 + $0x50] sm:$0xff]   ;;  %vm8249_vm13 = vmmov %vm8229_vm0 }
 0x3cf   : > { %v4271_v6 = vadd.f32 %v4239_v50, %v4207_v48  ;;  %v4208_v43 = vadd.f32 %v5030_v40, %v7438_v49  ;;  %v4066_v30 = vpop.f32.mrb[11].mxu1 }
 0x3d0   : > { %v4269_v38 = vadd.f32 %v4237_v27, %v4205_v24  ;;  %v4206_v11 = vadd.f32 %v7438_v49, %v4066_v30  ;;  %v4250_v30 = vunpack.c.h.bf16 %v5270_v9 }
 0x3d1   : > { %v4303_v61 = vmax.f32 %v4271_v6, 0.0  ;;  %v4272_v41 = vadd.f32 %v4240_v12, %v4208_v43  ;;  %v4249_v12 = vunpack.c.l.bf16 %v5270_v9 }
 0x3d2   : > { %v4301_v26 = vmax.f32 %v4269_v38, 0.0  ;;  %v4270_v36 = vadd.f32 %v4238_v28, %v4206_v11  ;;  %v4252_v28 = vunpack.c.h.bf16 %v5269_v5 }
 0x3d3   : > { %4335 = vst.msk [vmem:[%s7449_s20 + $0x50] sm:$0xff] %vm8235_vm5, %v4303_v61  ;;  %v4304_v34 = vmax.f32 %v4272_v41, 0.0  ;;  %vm8250_vm5 = vmmov %vm8229_vm0 }
 0x3d4   : > { %4333 = vst.msk [vmem:[%s7449_s20 + $0x40] sm:$0xff] %vm8236_vm12, %v4301_v26  ;;  %v4302_v53 = vmax.f32 %v4270_v36, 0.0  ;;  %v5033_v60 = vpop.f32.mrb[12].mxu1  ;;  %vm8251_vm12 = vmmov %vm8229_vm0 }
 0x3d5   : > { %4336 = vst.msk [vmem:[%s7449_s20 + $0x58] sm:$0xff] %vm8237_vm10, %v4304_v34  ;;  %v4211_v15 = vadd.f32 %v5033_v60, %v7438_v49  ;;  %v4079_v35 = vpop.f32.mrb[13].mxu1  ;;  %v5271_v60 = vld [vmem:[%s5337_s27 + $0x68] sm:$0xff]   ;;  %vm8252_vm10 = vmmov %vm8229_vm0 }
 0x3d6   : > { %4334 = vst.msk [vmem:[%s7449_s20 + $0x48] sm:$0xff] %vm8238_vm14, %v4302_v53  ;;  %v4209_v19 = vadd.f32 %v7438_v49, %v4079_v35  ;;  %v5034_v63 = vpop.f32.mrb[14].mxu1  ;;  %v4255_v29 = vunpack.c.l.bf16 %v5271_v60  ;;  %v5272_v35 = vld [vmem:[%s5337_s27 + $0x60] sm:$0xff]   ;;  %vm8253_vm14 = vmmov %vm8229_vm0 }
 0x3d7   : > { %v4275_v20 = vadd.f32 %v4243_v39, %v4211_v15  ;;  %v4212_v51 = vadd.f32 %v5034_v63, %v7438_v49  ;;  %v4082_v1 = vpop.f32.mrb[15].mxu1 }
 0x3d8   : > { %v4273_v32 = vadd.f32 %v4241_v18, %v4209_v19  ;;  %v4210_v10 = vadd.f32 %v7438_v49, %v4082_v1  ;;  %v4254_v1 = vunpack.c.h.bf16 %v5272_v35 }
 0x3d9   : > { %v4307_v8 = vmax.f32 %v4275_v20, 0.0  ;;  %v4276_v59 = vadd.f32 %v4244_v25, %v4212_v51  ;;  %v4253_v25 = vunpack.c.l.bf16 %v5272_v35 }
 0x3da   : > { %v4305_v44 = vmax.f32 %v4273_v32, 0.0  ;;  %v4274_v17 = vadd.f32 %v4242_v4, %v4210_v10  ;;  %v4256_v4 = vunpack.c.h.bf16 %v5271_v60 }
 0x3db   : > { %4339 = vst.msk [vmem:[%s7449_s20 + $0x70] sm:$0xff] %vm8239_vm15, %v4307_v8  ;;  %v4308_v58 = vmax.f32 %v4276_v59, 0.0  ;;  %vm8254_vm15 = vmmov %vm8229_vm0 }
 0x3dc   : > { %4337 = vst.msk [vmem:[%s7449_s20 + $0x60] sm:$0xff] %vm8240_vm2, %v4305_v44  ;;  %v4306_v22 = vmax.f32 %v4274_v17, 0.0  ;;  %v5037_v62 = vpop.f32.mrb[16].mxu1  ;;  %vm8255_vm2 = vmmov %vm8229_vm0 }
 0x3dd   : > { %4340 = vst.msk [vmem:[%s7449_s20 + $0x78] sm:$0xff] %vm8241_vm4, %v4308_v58  ;;  %v4215_v33 = vadd.f32 %v5037_v62, %v7438_v49  ;;  %v4095_v55 = vpop.f32.mrb[17].mxu1  ;;  %v5273_v62 = vld [vmem:[%s5337_s27 + $0x78] sm:$0xff]   ;;  %vm8256_vm4 = vmmov %vm8229_vm0 }
 0x3de   : > { %4338 = vst.msk [vmem:[%s7449_s20 + $0x68] sm:$0xff] %vm8242_vm7, %v4306_v22  ;;  %v4213_v2 = vadd.f32 %v7438_v49, %v4095_v55  ;;  %v5038_v45 = vpop.f32.mrb[18].mxu1  ;;  %v4259_v0 = vunpack.c.l.bf16 %v5273_v62  ;;  %v5274_v55 = vld [vmem:[%s5337_s27 + $0x70] sm:$0xff]   ;;  %vm8257_vm7 = vmmov %vm8229_vm0 }
 0x3df   : > { %v4279_v21 = vadd.f32 %v4247_v46, %v4215_v33  ;;  %v4216_v42 = vadd.f32 %v5038_v45, %v7438_v49  ;;  %v4098_v16 = vpop.f32.mrb[19].mxu1 }
 0x3e0   : > { %v4277_v3 = vadd.f32 %v4245_v14, %v4213_v2  ;;  %v4214_v57 = vadd.f32 %v7438_v49, %v4098_v16  ;;  %v4258_v16 = vunpack.c.h.bf16 %v5274_v55 }
 0x3e1   : > { %v4311_v56 = vmax.f32 %v4279_v21, 0.0  ;;  %v4280_v13 = vadd.f32 %v4248_v31, %v4216_v42  ;;  %v4257_v31 = vunpack.c.l.bf16 %v5274_v55 }
 0x3e2   : > { %v4309_v54 = vmax.f32 %v4277_v3, 0.0  ;;  %v4278_v50 = vadd.f32 %v4246_v23, %v4214_v57  ;;  %v4260_v23 = vunpack.c.h.bf16 %v5273_v62 }
 0x3e3   : > { %4343 = vst.msk [vmem:[%s7449_s20 + $0x90] sm:$0xff] %vm8243_vm11, %v4311_v56  ;;  %v4312_v52 = vmax.f32 %v4280_v13, 0.0 }
 0x3e4   : > { %4341 = vst.msk [vmem:[%s7449_s20 + $0x80] sm:$0xff] %vm8244_vm1, %v4309_v54  ;;  %v4310_v27 = vmax.f32 %v4278_v50, 0.0  ;;  %v5041_v48 = vpop.f32.mrb[20].mxu1 }
 0x3e5   : > { %4344 = vst.msk [vmem:[%s7449_s20 + $0x98] sm:$0xff] %vm8229_vm0, %v4312_v52  ;;  %v4219_v24 = vadd.f32 %v5041_v48, %v7438_v49  ;;  %v4111_v40 = vpop.f32.mrb[21].mxu1 }
 0x3e6   : > { %4342 = vst.msk [vmem:[%s7449_s20 + $0x88] sm:$0xff] %vm8245_vm6, %v4310_v27  ;;  %v4217_v6 = vadd.f32 %v7438_v49, %v4111_v40  ;;  %v5042_v43 = vpop.f32.mrb[22].mxu1 }
 0x3e7   : > { %v4283_v38 = vadd.f32 %v4251_v37, %v4219_v24  ;;  %v4220_v11 = vadd.f32 %v5042_v43, %v7438_v49  ;;  %v4114_v61 = vpop.f32.mrb[23].mxu1 }
 0x3e8   : > { %v4281_v41 = vadd.f32 %v4249_v12, %v4217_v6  ;;  %v4218_v26 = vadd.f32 %v7438_v49, %v4114_v61 }
 0x3e9   : > { %v4315_v36 = vmax.f32 %v4283_v38, 0.0  ;;  %v4284_v34 = vadd.f32 %v4252_v28, %v4220_v11 }
 0x3ea   : > { %v4313_v7 = vmax.f32 %v4281_v41, 0.0  ;;  %v4282_v39 = vadd.f32 %v4250_v30, %v4218_v26 }
 0x3eb   : > { %4347 = vst.msk [vmem:[%s7449_s20 + $0xb0] sm:$0xff] %vm8246_vm9, %v4315_v36  ;;  %v4316_v53 = vmax.f32 %v4284_v34, 0.0 }
 0x3ec   : > { %4345 = vst.msk [vmem:[%s7449_s20 + $0xa0] sm:$0xff] %vm8247_vm8, %v4313_v7  ;;  %v4314_v18 = vmax.f32 %v4282_v39, 0.0  ;;  %v5045_v15 = vpop.f32.mrb[24].mxu1 }
 0x3ed   : > { %4348 = vst.msk [vmem:[%s7449_s20 + $0xb8] sm:$0xff] %vm8248_vm3, %v4316_v53  ;;  %v4223_v19 = vadd.f32 %v5045_v15, %v7438_v49  ;;  %v4127_v63 = vpop.f32.mrb[25].mxu1 }
 0x3ee   : > { %4346 = vst.msk [vmem:[%s7449_s20 + $0xa8] sm:$0xff] %vm8249_vm13, %v4314_v18  ;;  %v4221_v20 = vadd.f32 %v7438_v49, %v4127_v63  ;;  %v5046_v51 = vpop.f32.mrb[26].mxu1 }
 0x3ef   : > { %v4287_v32 = vadd.f32 %v4255_v29, %v4223_v19  ;;  %v4224_v10 = vadd.f32 %v5046_v51, %v7438_v49  ;;  %v4130_v8 = vpop.f32.mrb[27].mxu1 }
 0x3f0   : > { %v4285_v59 = vadd.f32 %v4253_v25, %v4221_v20  ;;  %v4222_v44 = vadd.f32 %v7438_v49, %v4130_v8 }
 0x3f1   : > { %v4319_v17 = vmax.f32 %v4287_v32, 0.0  ;;  %v4288_v58 = vadd.f32 %v4256_v4, %v4224_v10 }
 0x3f2   : > { %v4317_v47 = vmax.f32 %v4285_v59, 0.0  ;;  %v4286_v46 = vadd.f32 %v4254_v1, %v4222_v44 }
 0x3f3   : > { %4351 = vst.msk [vmem:[%s7449_s20 + $0xd0] sm:$0xff] %vm8250_vm5, %v4319_v17  ;;  %v4320_v22 = vmax.f32 %v4288_v58, 0.0 }
 0x3f4   : > { %4349 = vst.msk [vmem:[%s7449_s20 + $0xc0] sm:$0xff] %vm8251_vm12, %v4317_v47  ;;  %v4318_v14 = vmax.f32 %v4286_v46, 0.0  ;;  %v5049_v33 = vpop.f32.mrb[28].mxu1 }
 0x3f5   : > { %4352 = vst.msk [vmem:[%s7449_s20 + $0xd8] sm:$0xff] %vm8252_vm10, %v4320_v22  ;;  %v4227_v2 = vadd.f32 %v5049_v33, %v7438_v49  ;;  %v4143_v45 = vpop.f32.mrb[29].mxu1 }
 0x3f6   : > { %4350 = vst.msk [vmem:[%s7449_s20 + $0xc8] sm:$0xff] %vm8253_vm14, %v4318_v14  ;;  %v4225_v21 = vadd.f32 %v7438_v49, %v4143_v45  ;;  %v5050_v42 = vpop.f32.mrb[30].mxu1 }
 0x3f7   : > { %v4291_v3 = vadd.f32 %v4259_v0, %v4227_v2  ;;  %v4228_v57 = vadd.f32 %v5050_v42, %v7438_v49  ;;  %v4146_v56 = vpop.f32.mrb[31].mxu1 }
 0x3f8   : > { %v4289_v13 = vadd.f32 %v4257_v31, %v4225_v21  ;;  %v4226_v54 = vadd.f32 %v7438_v49, %v4146_v56 }
 0x3f9   : > { %v4323_v50 = vmax.f32 %v4291_v3, 0.0  ;;  %v4292_v52 = vadd.f32 %v4260_v23, %v4228_v57 }
 0x3fa   : > { %v4321_v5 = vmax.f32 %v4289_v13, 0.0  ;;  %v4290_v37 = vadd.f32 %v4258_v16, %v4226_v54 }
 0x3fb   : > { %4355 = vst.msk [vmem:[%s7449_s20 + $0xf0] sm:$0xff] %vm8254_vm15, %v4323_v50  ;;  %v4324_v27 = vmax.f32 %v4292_v52, 0.0 }
 0x3fc   : > { %4353 = vst.msk [vmem:[%s7449_s20 + $0xe0] sm:$0xff] %vm8255_vm2, %v4321_v5  ;;  %v4322_v48 = vmax.f32 %v4290_v37, 0.0 }
 0x3fd   : > { %4356 = vst.msk [vmem:[%s7449_s20 + $0xf8] sm:$0xff] %vm8256_vm4, %v4324_v27 }
 0x3fe   : > { %4354 = vst.msk [vmem:[%s7449_s20 + $0xe8] sm:$0xff] %vm8257_vm7, %v4322_v48 }
 0x3ff PF: > { %s15_s18 = sadd.s32 1, %s5281_s18  }
 0x400   : > { %p12_p4 = scmp.ge.s32.totalorder %s15_s18, 4  }
 0x402   :  { %14 = sbr.rel (!%p12_p4) target bundleno = 1 (0x1), region = 74 }

</bundles_post_ra>
